<compile_context>
chip_gen: v7x
topology: tpu7x:2x2x1
jax: 0.10.0
libtpu: 0.0.40
codegen_flags: <defaults>
</compile_context>

<pallas_src>
import jax
import jax.numpy as jnp
from jax.experimental import pallas as pl
from jax.experimental.pallas import tpu as pltpu

# Layer widths of the PyTorch Sequential:
#   latent -> 512 -> 256 -> 128 -> 64 -> 512 -> 256 -> 128 -> 64 -> output_dim
HIDDEN_WIDTHS = [512, 256, 128, 64, 512, 256, 128, 64]
N_HIDDEN = len(HIDDEN_WIDTHS)
N_LAYERS = N_HIDDEN + 1        # + final Linear (-> Tanh)
NEG_SLOPE = 0.2
BN_EPS = 1e-5
TILE_B = 128                   # batch tile: multiple of 8 sublanes, MXU-friendly
LATENT_PAD = 128               # latent zero-padded to a full lane width
PACK_W = 512                   # lane width of packed bias / BN slabs


def _leaky_relu(x, neg_slope):
    return jnp.where(x > 0, x, neg_slope * x)


def generator_kernel(*refs):
    """refs = (x, w0..w8, bias_slab, bn_scale_slab, bn_shift_slab, out)."""
    x_ref = refs[0]
    w_refs = refs[1:1 + N_LAYERS]          # bf16, shape (in, out) each
    b_ref = refs[1 + N_LAYERS]             # (N_LAYERS, PACK_W) f32 biases
    s_ref = refs[2 + N_LAYERS]             # (N_HIDDEN, PACK_W) f32 BN scale
    t_ref = refs[3 + N_LAYERS]             # (N_HIDDEN, PACK_W) f32 BN shift
    o_ref = refs[4 + N_LAYERS]

    h = x_ref[...].astype(jnp.float32)
    for li in range(N_HIDDEN):
        d = HIDDEN_WIDTHS[li]
        # Linear: bf16 MXU matmul, f32 accumulation.
        z = jnp.dot(h.astype(jnp.bfloat16), w_refs[li][...],
                    preferred_element_type=jnp.float32)
        z = z + b_ref[li:li + 1, :d]
        # LeakyReLU(0.2) then eval-mode BatchNorm1d folded to scale/shift (VPU).
        a = _leaky_relu(z, NEG_SLOPE)
        h = a * s_ref[li:li + 1, :d] + t_ref[li:li + 1, :d]
    # Final Linear -> Tanh.
    out_dim = o_ref.shape[-1]
    z = jnp.dot(h.astype(jnp.bfloat16), w_refs[-1][...],
                preferred_element_type=jnp.float32)
    z = z + b_ref[N_HIDDEN:N_HIDDEN + 1, :out_dim]
    o_ref[...] = jnp.tanh(z).astype(o_ref.dtype)


def init_params(latent_dim, output_dim, key=0):
    """PyTorch-style init: U(-1/sqrt(fan_in), 1/sqrt(fan_in)); non-trivial BN stats."""
    widths = HIDDEN_WIDTHS + [output_dim]
    rng = jax.random.PRNGKey(key)
    fan_in = latent_dim
    w_list, b_list = [], []
    for out_dim in widths:
        rng, kw, kb = jax.random.split(rng, 3)
        bound = 1.0 / float(fan_in) ** 0.5
        # stored transposed vs torch: (in, out), so y = x @ W + b
        w_list.append(jax.random.uniform(kw, (fan_in, out_dim), jnp.float32, -bound, bound))
        b_list.append(jax.random.uniform(kb, (out_dim,), jnp.float32, -bound, bound))
        fan_in = out_dim
    gammas, betas, means, variances = [], [], [], []
    for out_dim in HIDDEN_WIDTHS:
        rng, k1, k2, k3, k4 = jax.random.split(rng, 5)
        gammas.append(jax.random.uniform(k1, (out_dim,), jnp.float32, 0.9, 1.1))
        betas.append(jax.random.uniform(k2, (out_dim,), jnp.float32, -0.1, 0.1))
        means.append(jax.random.uniform(k3, (out_dim,), jnp.float32, -0.1, 0.1))
        variances.append(jax.random.uniform(k4, (out_dim,), jnp.float32, 0.8, 1.2))
    return w_list, b_list, (gammas, betas, means, variances)


def pack_params(w_list, b_list, bn_params, latent_dim):
    """Pad layer-0 K to 128, cast weights to bf16, pack biases / BN into slabs."""
    gammas, betas, means, variances = bn_params
    w0 = jnp.zeros((LATENT_PAD, w_list[0].shape[1]), jnp.float32)
    w0 = w0.at[:latent_dim].set(w_list[0])
    w_packed = [w0.astype(jnp.bfloat16)] + [w.astype(jnp.bfloat16) for w in w_list[1:]]

    pack_w = max(PACK_W, w_list[-1].shape[1])
    bias_slab = jnp.zeros((N_LAYERS, pack_w), jnp.float32)
    for li, b in enumerate(b_list):
        bias_slab = bias_slab.at[li, :b.shape[0]].set(b)

    scale_slab = jnp.zeros((N_HIDDEN, pack_w), jnp.float32)
    shift_slab = jnp.zeros((N_HIDDEN, pack_w), jnp.float32)
    for li in range(N_HIDDEN):
        scale = gammas[li] / jnp.sqrt(variances[li] + BN_EPS)
        shift = betas[li] - means[li] * scale
        scale_slab = scale_slab.at[li, :scale.shape[0]].set(scale)
        shift_slab = shift_slab.at[li, :shift.shape[0]].set(shift)
    return w_packed, bias_slab, scale_slab, shift_slab


@jax.jit
def generator_forward(x, w_packed, bias_slab, scale_slab, shift_slab):
    B, latent = x.shape
    k_pad = w_packed[0].shape[0]
    output_dim = w_packed[-1].shape[1]
    b_pad = pl.cdiv(B, TILE_B) * TILE_B

    # Zero-pad batch to a multiple of TILE_B and latent features to k_pad.
    x_p = jnp.zeros((b_pad, k_pad), jnp.float32).at[:B, :latent].set(x.astype(jnp.float32))

    # x / out tiles march over the batch; params are VMEM-resident (block (0,0)).
    in_specs = [pl.BlockSpec((TILE_B, k_pad), lambda i: (i, 0))]
    for w in w_packed:
        in_specs.append(pl.BlockSpec(w.shape, lambda i: (0, 0)))
    for p in (bias_slab, scale_slab, shift_slab):
        in_specs.append(pl.BlockSpec(p.shape, lambda i: (0, 0)))
    out_spec = pl.BlockSpec((TILE_B, output_dim), lambda i: (i, 0))

    flops = 2 * b_pad * sum(w.shape[0] * w.shape[1] for w in w_packed)
    bytes_accessed = (x_p.size * 4
                      + sum(w.size * 2 for w in w_packed)
                      + (bias_slab.size + scale_slab.size + shift_slab.size) * 4
                      + b_pad * output_dim * 4)

    out = pl.pallas_call(
        generator_kernel,
        out_shape=jax.ShapeDtypeStruct((b_pad, output_dim), jnp.float32),
        grid=(b_pad // TILE_B,),
        in_specs=in_specs,
        out_specs=out_spec,
        compiler_params=pltpu.CompilerParams(
            dimension_semantics=("parallel",),
            vmem_limit_bytes=16 << 20),
        cost_estimate=pl.CostEstimate(
            flops=flops,
            transcendentals=b_pad * output_dim,
            bytes_accessed=bytes_accessed),
    )(x_p, *w_packed, bias_slab, scale_slab, shift_slab)
    return out[:B]


def reference_forward(x, w_list, b_list, bn_params):
    """Pure-JAX f32 reference of the PyTorch Generator forward (eval mode)."""
    gammas, betas, means, variances = bn_params
    h = x.astype(jnp.float32)
    for li in range(N_HIDDEN):
        z = jnp.dot(h, w_list[li], precision=jax.lax.Precision.HIGHEST) + b_list[li]
        a = _leaky_relu(z, NEG_SLOPE)
        h = gammas[li] * (a - means[li]) / jnp.sqrt(variances[li] + BN_EPS) + betas[li]
    z = jnp.dot(h, w_list[-1], precision=jax.lax.Precision.HIGHEST) + b_list[-1]
    return jnp.tanh(z)


if __name__ == "__main__":
    B, LATENT_DIM, OUTPUT_DIM = 256, 64, 128
    key = jax.random.PRNGKey(0)
    z = jax.random.normal(key, (B, LATENT_DIM), jnp.float32)

    w_list, b_list, bn_params = init_params(LATENT_DIM, OUTPUT_DIM, key=0)
    w_packed, bias_slab, scale_slab, shift_slab = pack_params(
        w_list, b_list, bn_params, LATENT_DIM)

    out = generator_forward(z, w_packed, bias_slab, scale_slab, shift_slab)
    out = jax.block_until_ready(out)

    ref = reference_forward(z, w_list, b_list, bn_params)
    assert out.shape == (B, OUTPUT_DIM), out.shape
    # bf16 weights/activations in the matmuls => relaxed tolerance vs f32 reference.
    err = float(jnp.max(jnp.abs(out - ref)))
    assert jnp.allclose(out, ref, atol=3e-2, rtol=3e-2), err
    print("KERNEL_OK")
</pallas_src>

<mosaic_0001>
module attributes {stable_mosaic.version = 11 : i64} {
  func.func @generator_kernel(%arg0: i32, %arg1: memref<128x128xf32, #tpu.memory_space<vmem>>, %arg2: memref<128x512xbf16, #tpu.memory_space<vmem>>, %arg3: memref<512x256xbf16, #tpu.memory_space<vmem>>, %arg4: memref<256x128xbf16, #tpu.memory_space<vmem>>, %arg5: memref<128x64xbf16, #tpu.memory_space<vmem>>, %arg6: memref<64x512xbf16, #tpu.memory_space<vmem>>, %arg7: memref<512x256xbf16, #tpu.memory_space<vmem>>, %arg8: memref<256x128xbf16, #tpu.memory_space<vmem>>, %arg9: memref<128x64xbf16, #tpu.memory_space<vmem>>, %arg10: memref<64x128xbf16, #tpu.memory_space<vmem>>, %arg11: memref<9x512xf32, #tpu.memory_space<vmem>>, %arg12: memref<8x512xf32, #tpu.memory_space<vmem>>, %arg13: memref<8x512xf32, #tpu.memory_space<vmem>>, %arg14: memref<128x128xf32, #tpu.memory_space<vmem>>) attributes {dimension_semantics = [#tpu.dimension_semantics<parallel>], iteration_bounds = array<i64: 2>, scalar_prefetch = 0 : i64, scratch_operands = 0 : i64, tpu.core_type = #tpu.core_type<tc>, window_params = [{transform_indices = @transform_0, window_bounds = array<i64: 128, 128>}, {pipeline_mode = #tpu.pipeline_mode<synchronous>, transform_indices = @transform_1, window_bounds = array<i64: 128, 512>}, {pipeline_mode = #tpu.pipeline_mode<synchronous>, transform_indices = @transform_2, window_bounds = array<i64: 512, 256>}, {pipeline_mode = #tpu.pipeline_mode<synchronous>, transform_indices = @transform_3, window_bounds = array<i64: 256, 128>}, {pipeline_mode = #tpu.pipeline_mode<synchronous>, transform_indices = @transform_4, window_bounds = array<i64: 128, 64>}, {pipeline_mode = #tpu.pipeline_mode<synchronous>, transform_indices = @transform_5, window_bounds = array<i64: 64, 512>}, {pipeline_mode = #tpu.pipeline_mode<synchronous>, transform_indices = @transform_6, window_bounds = array<i64: 512, 256>}, {pipeline_mode = #tpu.pipeline_mode<synchronous>, transform_indices = @transform_7, window_bounds = array<i64: 256, 128>}, {pipeline_mode = #tpu.pipeline_mode<synchronous>, transform_indices = @transform_8, window_bounds = array<i64: 128, 64>}, {pipeline_mode = #tpu.pipeline_mode<synchronous>, transform_indices = @transform_9, window_bounds = array<i64: 64, 128>}, {pipeline_mode = #tpu.pipeline_mode<synchronous>, transform_indices = @transform_10, window_bounds = array<i64: 9, 512>}, {pipeline_mode = #tpu.pipeline_mode<synchronous>, transform_indices = @transform_11, window_bounds = array<i64: 8, 512>}, {pipeline_mode = #tpu.pipeline_mode<synchronous>, transform_indices = @transform_12, window_bounds = array<i64: 8, 512>}, {transform_indices = @transform_13, window_bounds = array<i64: 128, 128>}]} {
    %c0 = arith.constant 0 : index
    %c0_0 = arith.constant 0 : index
    %0 = vector.load %arg1[%c0, %c0_0] : memref<128x128xf32, #tpu.memory_space<vmem>>, vector<128x128xf32>
    %1 = arith.truncf %0 : vector<128x128xf32> to vector<128x128xbf16>
    %c0_1 = arith.constant 0 : index
    %c0_2 = arith.constant 0 : index
    %2 = vector.load %arg2[%c0_1, %c0_2] : memref<128x512xbf16, #tpu.memory_space<vmem>>, vector<128x512xbf16>
    %cst = arith.constant dense<0.000000e+00> : vector<128x512xf32>
    %3 = tpu.matmul %1, %2, %cst {dimension_numbers = #tpu.dot_dimension_numbers<[1], [0], [0], [1], [0, 0, 1, 1], [], []>} : vector<128x128xbf16>, vector<128x512xbf16>, vector<128x512xf32> -> vector<128x512xf32>
    %c0_3 = arith.constant 0 : index
    %c0_4 = arith.constant 0 : index
    %4 = vector.load %arg11[%c0_3, %c0_4] : memref<9x512xf32, #tpu.memory_space<vmem>>, vector<1x512xf32>
    %5 = vector.broadcast %4 : vector<1x512xf32> to vector<128x512xf32>
    %6 = arith.addf %3, %5 : vector<128x512xf32>
    %cst_5 = arith.constant 0.000000e+00 : f32
    %7 = vector.broadcast %cst_5 : f32 to vector<128x512xf32>
    %8 = arith.cmpf ogt, %6, %7 : vector<128x512xf32>
    %cst_6 = arith.constant 2.000000e-01 : f32
    %9 = vector.broadcast %cst_6 : f32 to vector<128x512xf32>
    %10 = arith.mulf %9, %6 : vector<128x512xf32>
    %11 = arith.select %8, %6, %10 : vector<128x512xi1>, vector<128x512xf32>
    %c0_7 = arith.constant 0 : index
    %c0_8 = arith.constant 0 : index
    %12 = vector.load %arg12[%c0_7, %c0_8] : memref<8x512xf32, #tpu.memory_space<vmem>>, vector<1x512xf32>
    %13 = vector.broadcast %12 : vector<1x512xf32> to vector<128x512xf32>
    %14 = arith.mulf %11, %13 : vector<128x512xf32>
    %c0_9 = arith.constant 0 : index
    %c0_10 = arith.constant 0 : index
    %15 = vector.load %arg13[%c0_9, %c0_10] : memref<8x512xf32, #tpu.memory_space<vmem>>, vector<1x512xf32>
    %16 = vector.broadcast %15 : vector<1x512xf32> to vector<128x512xf32>
    %17 = arith.addf %14, %16 : vector<128x512xf32>
    %18 = arith.truncf %17 : vector<128x512xf32> to vector<128x512xbf16>
    %c0_11 = arith.constant 0 : index
    %c0_12 = arith.constant 0 : index
    %19 = vector.load %arg3[%c0_11, %c0_12] : memref<512x256xbf16, #tpu.memory_space<vmem>>, vector<512x256xbf16>
    %cst_13 = arith.constant dense<0.000000e+00> : vector<128x256xf32>
    %20 = tpu.matmul %18, %19, %cst_13 {dimension_numbers = #tpu.dot_dimension_numbers<[1], [0], [0], [1], [0, 0, 1, 1], [], []>} : vector<128x512xbf16>, vector<512x256xbf16>, vector<128x256xf32> -> vector<128x256xf32>
    %c1 = arith.constant 1 : index
    %c0_14 = arith.constant 0 : index
    %21 = vector.load %arg11[%c1, %c0_14] : memref<9x512xf32, #tpu.memory_space<vmem>>, vector<1x256xf32>
    %22 = vector.broadcast %21 : vector<1x256xf32> to vector<128x256xf32>
    %23 = arith.addf %20, %22 : vector<128x256xf32>
    %cst_15 = arith.constant 0.000000e+00 : f32
    %24 = vector.broadcast %cst_15 : f32 to vector<128x256xf32>
    %25 = arith.cmpf ogt, %23, %24 : vector<128x256xf32>
    %cst_16 = arith.constant 2.000000e-01 : f32
    %26 = vector.broadcast %cst_16 : f32 to vector<128x256xf32>
    %27 = arith.mulf %26, %23 : vector<128x256xf32>
    %28 = arith.select %25, %23, %27 : vector<128x256xi1>, vector<128x256xf32>
    %c1_17 = arith.constant 1 : index
    %c0_18 = arith.constant 0 : index
    %29 = vector.load %arg12[%c1_17, %c0_18] : memref<8x512xf32, #tpu.memory_space<vmem>>, vector<1x256xf32>
    %30 = vector.broadcast %29 : vector<1x256xf32> to vector<128x256xf32>
    %31 = arith.mulf %28, %30 : vector<128x256xf32>
    %c1_19 = arith.constant 1 : index
    %c0_20 = arith.constant 0 : index
    %32 = vector.load %arg13[%c1_19, %c0_20] : memref<8x512xf32, #tpu.memory_space<vmem>>, vector<1x256xf32>
    %33 = vector.broadcast %32 : vector<1x256xf32> to vector<128x256xf32>
    %34 = arith.addf %31, %33 : vector<128x256xf32>
    %35 = arith.truncf %34 : vector<128x256xf32> to vector<128x256xbf16>
    %c0_21 = arith.constant 0 : index
    %c0_22 = arith.constant 0 : index
    %36 = vector.load %arg4[%c0_21, %c0_22] : memref<256x128xbf16, #tpu.memory_space<vmem>>, vector<256x128xbf16>
    %cst_23 = arith.constant dense<0.000000e+00> : vector<128x128xf32>
    %37 = tpu.matmul %35, %36, %cst_23 {dimension_numbers = #tpu.dot_dimension_numbers<[1], [0], [0], [1], [0, 0, 1, 1], [], []>} : vector<128x256xbf16>, vector<256x128xbf16>, vector<128x128xf32> -> vector<128x128xf32>
    %c2 = arith.constant 2 : index
    %c0_24 = arith.constant 0 : index
    %38 = vector.load %arg11[%c2, %c0_24] : memref<9x512xf32, #tpu.memory_space<vmem>>, vector<1x128xf32>
    %39 = vector.broadcast %38 : vector<1x128xf32> to vector<128x128xf32>
    %40 = arith.addf %37, %39 : vector<128x128xf32>
    %cst_25 = arith.constant 0.000000e+00 : f32
    %41 = vector.broadcast %cst_25 : f32 to vector<128x128xf32>
    %42 = arith.cmpf ogt, %40, %41 : vector<128x128xf32>
    %cst_26 = arith.constant 2.000000e-01 : f32
    %43 = vector.broadcast %cst_26 : f32 to vector<128x128xf32>
    %44 = arith.mulf %43, %40 : vector<128x128xf32>
    %45 = arith.select %42, %40, %44 : vector<128x128xi1>, vector<128x128xf32>
    %c2_27 = arith.constant 2 : index
    %c0_28 = arith.constant 0 : index
    %46 = vector.load %arg12[%c2_27, %c0_28] : memref<8x512xf32, #tpu.memory_space<vmem>>, vector<1x128xf32>
    %47 = vector.broadcast %46 : vector<1x128xf32> to vector<128x128xf32>
    %48 = arith.mulf %45, %47 : vector<128x128xf32>
    %c2_29 = arith.constant 2 : index
    %c0_30 = arith.constant 0 : index
    %49 = vector.load %arg13[%c2_29, %c0_30] : memref<8x512xf32, #tpu.memory_space<vmem>>, vector<1x128xf32>
    %50 = vector.broadcast %49 : vector<1x128xf32> to vector<128x128xf32>
    %51 = arith.addf %48, %50 : vector<128x128xf32>
    %52 = arith.truncf %51 : vector<128x128xf32> to vector<128x128xbf16>
    %c0_31 = arith.constant 0 : index
    %c0_32 = arith.constant 0 : index
    %53 = vector.load %arg5[%c0_31, %c0_32] : memref<128x64xbf16, #tpu.memory_space<vmem>>, vector<128x64xbf16>
    %cst_33 = arith.constant dense<0.000000e+00> : vector<128x64xf32>
    %54 = tpu.matmul %52, %53, %cst_33 {dimension_numbers = #tpu.dot_dimension_numbers<[1], [0], [0], [1], [0, 0, 1, 1], [], []>} : vector<128x128xbf16>, vector<128x64xbf16>, vector<128x64xf32> -> vector<128x64xf32>
    %c3 = arith.constant 3 : index
    %c0_34 = arith.constant 0 : index
    %55 = vector.load %arg11[%c3, %c0_34] : memref<9x512xf32, #tpu.memory_space<vmem>>, vector<1x64xf32>
    %56 = vector.broadcast %55 : vector<1x64xf32> to vector<128x64xf32>
    %57 = arith.addf %54, %56 : vector<128x64xf32>
    %cst_35 = arith.constant 0.000000e+00 : f32
    %58 = vector.broadcast %cst_35 : f32 to vector<128x64xf32>
    %59 = arith.cmpf ogt, %57, %58 : vector<128x64xf32>
    %cst_36 = arith.constant 2.000000e-01 : f32
    %60 = vector.broadcast %cst_36 : f32 to vector<128x64xf32>
    %61 = arith.mulf %60, %57 : vector<128x64xf32>
    %62 = arith.select %59, %57, %61 : vector<128x64xi1>, vector<128x64xf32>
    %c3_37 = arith.constant 3 : index
    %c0_38 = arith.constant 0 : index
    %63 = vector.load %arg12[%c3_37, %c0_38] : memref<8x512xf32, #tpu.memory_space<vmem>>, vector<1x64xf32>
    %64 = vector.broadcast %63 : vector<1x64xf32> to vector<128x64xf32>
    %65 = arith.mulf %62, %64 : vector<128x64xf32>
    %c3_39 = arith.constant 3 : index
    %c0_40 = arith.constant 0 : index
    %66 = vector.load %arg13[%c3_39, %c0_40] : memref<8x512xf32, #tpu.memory_space<vmem>>, vector<1x64xf32>
    %67 = vector.broadcast %66 : vector<1x64xf32> to vector<128x64xf32>
    %68 = arith.addf %65, %67 : vector<128x64xf32>
    %69 = arith.truncf %68 : vector<128x64xf32> to vector<128x64xbf16>
    %c0_41 = arith.constant 0 : index
    %c0_42 = arith.constant 0 : index
    %70 = vector.load %arg6[%c0_41, %c0_42] : memref<64x512xbf16, #tpu.memory_space<vmem>>, vector<64x512xbf16>
    %cst_43 = arith.constant dense<0.000000e+00> : vector<128x512xf32>
    %71 = tpu.matmul %69, %70, %cst_43 {dimension_numbers = #tpu.dot_dimension_numbers<[1], [0], [0], [1], [0, 0, 1, 1], [], []>} : vector<128x64xbf16>, vector<64x512xbf16>, vector<128x512xf32> -> vector<128x512xf32>
    %c4 = arith.constant 4 : index
    %c0_44 = arith.constant 0 : index
    %72 = vector.load %arg11[%c4, %c0_44] : memref<9x512xf32, #tpu.memory_space<vmem>>, vector<1x512xf32>
    %73 = vector.broadcast %72 : vector<1x512xf32> to vector<128x512xf32>
    %74 = arith.addf %71, %73 : vector<128x512xf32>
    %cst_45 = arith.constant 0.000000e+00 : f32
    %75 = vector.broadcast %cst_45 : f32 to vector<128x512xf32>
    %76 = arith.cmpf ogt, %74, %75 : vector<128x512xf32>
    %cst_46 = arith.constant 2.000000e-01 : f32
    %77 = vector.broadcast %cst_46 : f32 to vector<128x512xf32>
    %78 = arith.mulf %77, %74 : vector<128x512xf32>
    %79 = arith.select %76, %74, %78 : vector<128x512xi1>, vector<128x512xf32>
    %c4_47 = arith.constant 4 : index
    %c0_48 = arith.constant 0 : index
    %80 = vector.load %arg12[%c4_47, %c0_48] : memref<8x512xf32, #tpu.memory_space<vmem>>, vector<1x512xf32>
    %81 = vector.broadcast %80 : vector<1x512xf32> to vector<128x512xf32>
    %82 = arith.mulf %79, %81 : vector<128x512xf32>
    %c4_49 = arith.constant 4 : index
    %c0_50 = arith.constant 0 : index
    %83 = vector.load %arg13[%c4_49, %c0_50] : memref<8x512xf32, #tpu.memory_space<vmem>>, vector<1x512xf32>
    %84 = vector.broadcast %83 : vector<1x512xf32> to vector<128x512xf32>
    %85 = arith.addf %82, %84 : vector<128x512xf32>
    %86 = arith.truncf %85 : vector<128x512xf32> to vector<128x512xbf16>
    %c0_51 = arith.constant 0 : index
    %c0_52 = arith.constant 0 : index
    %87 = vector.load %arg7[%c0_51, %c0_52] : memref<512x256xbf16, #tpu.memory_space<vmem>>, vector<512x256xbf16>
    %cst_53 = arith.constant dense<0.000000e+00> : vector<128x256xf32>
    %88 = tpu.matmul %86, %87, %cst_53 {dimension_numbers = #tpu.dot_dimension_numbers<[1], [0], [0], [1], [0, 0, 1, 1], [], []>} : vector<128x512xbf16>, vector<512x256xbf16>, vector<128x256xf32> -> vector<128x256xf32>
    %c5 = arith.constant 5 : index
    %c0_54 = arith.constant 0 : index
    %89 = vector.load %arg11[%c5, %c0_54] : memref<9x512xf32, #tpu.memory_space<vmem>>, vector<1x256xf32>
    %90 = vector.broadcast %89 : vector<1x256xf32> to vector<128x256xf32>
    %91 = arith.addf %88, %90 : vector<128x256xf32>
    %cst_55 = arith.constant 0.000000e+00 : f32
    %92 = vector.broadcast %cst_55 : f32 to vector<128x256xf32>
    %93 = arith.cmpf ogt, %91, %92 : vector<128x256xf32>
    %cst_56 = arith.constant 2.000000e-01 : f32
    %94 = vector.broadcast %cst_56 : f32 to vector<128x256xf32>
    %95 = arith.mulf %94, %91 : vector<128x256xf32>
    %96 = arith.select %93, %91, %95 : vector<128x256xi1>, vector<128x256xf32>
    %c5_57 = arith.constant 5 : index
    %c0_58 = arith.constant 0 : index
    %97 = vector.load %arg12[%c5_57, %c0_58] : memref<8x512xf32, #tpu.memory_space<vmem>>, vector<1x256xf32>
    %98 = vector.broadcast %97 : vector<1x256xf32> to vector<128x256xf32>
    %99 = arith.mulf %96, %98 : vector<128x256xf32>
    %c5_59 = arith.constant 5 : index
    %c0_60 = arith.constant 0 : index
    %100 = vector.load %arg13[%c5_59, %c0_60] : memref<8x512xf32, #tpu.memory_space<vmem>>, vector<1x256xf32>
    %101 = vector.broadcast %100 : vector<1x256xf32> to vector<128x256xf32>
    %102 = arith.addf %99, %101 : vector<128x256xf32>
    %103 = arith.truncf %102 : vector<128x256xf32> to vector<128x256xbf16>
    %c0_61 = arith.constant 0 : index
    %c0_62 = arith.constant 0 : index
    %104 = vector.load %arg8[%c0_61, %c0_62] : memref<256x128xbf16, #tpu.memory_space<vmem>>, vector<256x128xbf16>
    %cst_63 = arith.constant dense<0.000000e+00> : vector<128x128xf32>
    %105 = tpu.matmul %103, %104, %cst_63 {dimension_numbers = #tpu.dot_dimension_numbers<[1], [0], [0], [1], [0, 0, 1, 1], [], []>} : vector<128x256xbf16>, vector<256x128xbf16>, vector<128x128xf32> -> vector<128x128xf32>
    %c6 = arith.constant 6 : index
    %c0_64 = arith.constant 0 : index
    %106 = vector.load %arg11[%c6, %c0_64] : memref<9x512xf32, #tpu.memory_space<vmem>>, vector<1x128xf32>
    %107 = vector.broadcast %106 : vector<1x128xf32> to vector<128x128xf32>
    %108 = arith.addf %105, %107 : vector<128x128xf32>
    %cst_65 = arith.constant 0.000000e+00 : f32
    %109 = vector.broadcast %cst_65 : f32 to vector<128x128xf32>
    %110 = arith.cmpf ogt, %108, %109 : vector<128x128xf32>
    %cst_66 = arith.constant 2.000000e-01 : f32
    %111 = vector.broadcast %cst_66 : f32 to vector<128x128xf32>
    %112 = arith.mulf %111, %108 : vector<128x128xf32>
    %113 = arith.select %110, %108, %112 : vector<128x128xi1>, vector<128x128xf32>
    %c6_67 = arith.constant 6 : index
    %c0_68 = arith.constant 0 : index
    %114 = vector.load %arg12[%c6_67, %c0_68] : memref<8x512xf32, #tpu.memory_space<vmem>>, vector<1x128xf32>
    %115 = vector.broadcast %114 : vector<1x128xf32> to vector<128x128xf32>
    %116 = arith.mulf %113, %115 : vector<128x128xf32>
    %c6_69 = arith.constant 6 : index
    %c0_70 = arith.constant 0 : index
    %117 = vector.load %arg13[%c6_69, %c0_70] : memref<8x512xf32, #tpu.memory_space<vmem>>, vector<1x128xf32>
    %118 = vector.broadcast %117 : vector<1x128xf32> to vector<128x128xf32>
    %119 = arith.addf %116, %118 : vector<128x128xf32>
    %120 = arith.truncf %119 : vector<128x128xf32> to vector<128x128xbf16>
    %c0_71 = arith.constant 0 : index
    %c0_72 = arith.constant 0 : index
    %121 = vector.load %arg9[%c0_71, %c0_72] : memref<128x64xbf16, #tpu.memory_space<vmem>>, vector<128x64xbf16>
    %cst_73 = arith.constant dense<0.000000e+00> : vector<128x64xf32>
    %122 = tpu.matmul %120, %121, %cst_73 {dimension_numbers = #tpu.dot_dimension_numbers<[1], [0], [0], [1], [0, 0, 1, 1], [], []>} : vector<128x128xbf16>, vector<128x64xbf16>, vector<128x64xf32> -> vector<128x64xf32>
    %c7 = arith.constant 7 : index
    %c0_74 = arith.constant 0 : index
    %123 = vector.load %arg11[%c7, %c0_74] : memref<9x512xf32, #tpu.memory_space<vmem>>, vector<1x64xf32>
    %124 = vector.broadcast %123 : vector<1x64xf32> to vector<128x64xf32>
    %125 = arith.addf %122, %124 : vector<128x64xf32>
    %cst_75 = arith.constant 0.000000e+00 : f32
    %126 = vector.broadcast %cst_75 : f32 to vector<128x64xf32>
    %127 = arith.cmpf ogt, %125, %126 : vector<128x64xf32>
    %cst_76 = arith.constant 2.000000e-01 : f32
    %128 = vector.broadcast %cst_76 : f32 to vector<128x64xf32>
    %129 = arith.mulf %128, %125 : vector<128x64xf32>
    %130 = arith.select %127, %125, %129 : vector<128x64xi1>, vector<128x64xf32>
    %c7_77 = arith.constant 7 : index
    %c0_78 = arith.constant 0 : index
    %131 = vector.load %arg12[%c7_77, %c0_78] : memref<8x512xf32, #tpu.memory_space<vmem>>, vector<1x64xf32>
    %132 = vector.broadcast %131 : vector<1x64xf32> to vector<128x64xf32>
    %133 = arith.mulf %130, %132 : vector<128x64xf32>
    %c7_79 = arith.constant 7 : index
    %c0_80 = arith.constant 0 : index
    %134 = vector.load %arg13[%c7_79, %c0_80] : memref<8x512xf32, #tpu.memory_space<vmem>>, vector<1x64xf32>
    %135 = vector.broadcast %134 : vector<1x64xf32> to vector<128x64xf32>
    %136 = arith.addf %133, %135 : vector<128x64xf32>
    %137 = arith.truncf %136 : vector<128x64xf32> to vector<128x64xbf16>
    %c0_81 = arith.constant 0 : index
    %c0_82 = arith.constant 0 : index
    %138 = vector.load %arg10[%c0_81, %c0_82] : memref<64x128xbf16, #tpu.memory_space<vmem>>, vector<64x128xbf16>
    %cst_83 = arith.constant dense<0.000000e+00> : vector<128x128xf32>
    %139 = tpu.matmul %137, %138, %cst_83 {dimension_numbers = #tpu.dot_dimension_numbers<[1], [0], [0], [1], [0, 0, 1, 1], [], []>} : vector<128x64xbf16>, vector<64x128xbf16>, vector<128x128xf32> -> vector<128x128xf32>
    %c8 = arith.constant 8 : index
    %c0_84 = arith.constant 0 : index
    %140 = vector.load %arg11[%c8, %c0_84] : memref<9x512xf32, #tpu.memory_space<vmem>>, vector<1x128xf32>
    %141 = vector.broadcast %140 : vector<1x128xf32> to vector<128x128xf32>
    %142 = arith.addf %139, %141 : vector<128x128xf32>
    %143 = math.tanh %142 : vector<128x128xf32>
    %c0_85 = arith.constant 0 : index
    %c0_86 = arith.constant 0 : index
    %144 = vector.load %arg14[%c0_85, %c0_86] : memref<128x128xf32, #tpu.memory_space<vmem>>, vector<128x128xf32>
    tpu.vector_store %arg14[%c0_85, %c0_86], %143 {strides = array<i32>} : memref<128x128xf32, #tpu.memory_space<vmem>>, vector<128x128xf32>,
    return
  }
  func.func @transform_0(%arg0: i32) -> (i32, i32) {
    %c0_i32 = arith.constant 0 : i32
    %c0_i32_0 = arith.constant 0 : i32
    return %arg0, %c0_i32 : i32, i32
  }
  func.func @transform_1(%arg0: i32) -> (i32, i32) {
    %c0_i32 = arith.constant 0 : i32
    %c0_i32_0 = arith.constant 0 : i32
    %c0_i32_1 = arith.constant 0 : i32
    return %c0_i32, %c0_i32_0 : i32, i32
  }
  func.func @transform_2(%arg0: i32) -> (i32, i32) {
    %c0_i32 = arith.constant 0 : i32
    %c0_i32_0 = arith.constant 0 : i32
    %c0_i32_1 = arith.constant 0 : i32
    return %c0_i32, %c0_i32_0 : i32, i32
  }
  func.func @transform_3(%arg0: i32) -> (i32, i32) {
    %c0_i32 = arith.constant 0 : i32
    %c0_i32_0 = arith.constant 0 : i32
    %c0_i32_1 = arith.constant 0 : i32
    return %c0_i32, %c0_i32_0 : i32, i32
  }
  func.func @transform_4(%arg0: i32) -> (i32, i32) {
    %c0_i32 = arith.constant 0 : i32
    %c0_i32_0 = arith.constant 0 : i32
    %c0_i32_1 = arith.constant 0 : i32
    return %c0_i32, %c0_i32_0 : i32, i32
  }
  func.func @transform_5(%arg0: i32) -> (i32, i32) {
    %c0_i32 = arith.constant 0 : i32
    %c0_i32_0 = arith.constant 0 : i32
    %c0_i32_1 = arith.constant 0 : i32
    return %c0_i32, %c0_i32_0 : i32, i32
  }
  func.func @transform_6(%arg0: i32) -> (i32, i32) {
    %c0_i32 = arith.constant 0 : i32
    %c0_i32_0 = arith.constant 0 : i32
    %c0_i32_1 = arith.constant 0 : i32
    return %c0_i32, %c0_i32_0 : i32, i32
  }
  func.func @transform_7(%arg0: i32) -> (i32, i32) {
    %c0_i32 = arith.constant 0 : i32
    %c0_i32_0 = arith.constant 0 : i32
    %c0_i32_1 = arith.constant 0 : i32
    return %c0_i32, %c0_i32_0 : i32, i32
  }
  func.func @transform_8(%arg0: i32) -> (i32, i32) {
    %c0_i32 = arith.constant 0 : i32
    %c0_i32_0 = arith.constant 0 : i32
    %c0_i32_1 = arith.constant 0 : i32
    return %c0_i32, %c0_i32_0 : i32, i32
  }
  func.func @transform_9(%arg0: i32) -> (i32, i32) {
    %c0_i32 = arith.constant 0 : i32
    %c0_i32_0 = arith.constant 0 : i32
    %c0_i32_1 = arith.constant 0 : i32
    return %c0_i32, %c0_i32_0 : i32, i32
  }
  func.func @transform_10(%arg0: i32) -> (i32, i32) {
    %c0_i32 = arith.constant 0 : i32
    %c0_i32_0 = arith.constant 0 : i32
    %c0_i32_1 = arith.constant 0 : i32
    return %c0_i32, %c0_i32_0 : i32, i32
  }
  func.func @transform_11(%arg0: i32) -> (i32, i32) {
    %c0_i32 = arith.constant 0 : i32
    %c0_i32_0 = arith.constant 0 : i32
    %c0_i32_1 = arith.constant 0 : i32
    return %c0_i32, %c0_i32_0 : i32, i32
  }
  func.func @transform_12(%arg0: i32) -> (i32, i32) {
    %c0_i32 = arith.constant 0 : i32
    %c0_i32_0 = arith.constant 0 : i32
    %c0_i32_1 = arith.constant 0 : i32
    return %c0_i32, %c0_i32_0 : i32, i32
  }
  func.func @transform_13(%arg0: i32) -> (i32, i32) {
    %c0_i32 = arith.constant 0 : i32
    %c0_i32_0 = arith.constant 0 : i32
    return %arg0, %c0_i32 : i32, i32
  }
}

</mosaic_0001>

<bundles_post_ra>
// kernel: generator_forward.1
= control target key start
LH: loop header
LB: loop body
LE: loop exit
PB: predicated region body
PF: predicated region fallthrough
CT: control target
= control target key end

     0   :  { %s8935_s0 = inlined_call_operand.vmem [shape: f32[256,128], index: 0, kind: input, shape index: {}]   ;;  %s8936_s1 = inlined_call_operand.vmem [shape: bf16[128,512], index: 1, kind: input, shape index: {}]   ;;  %s8937_s2 = inlined_call_operand.vmem [shape: bf16[512,256], index: 2, kind: input, shape index: {}]   ;;  %s8938_s3 = inlined_call_operand.vmem [shape: bf16[256,128], index: 3, kind: input, shape index: {}]   ;;  %s8939_s4 = inlined_call_operand.vmem [shape: bf16[128,64], index: 4, kind: input, shape index: {}]   ;;  %s8940_s5 = inlined_call_operand.hbm [shape: bf16[64,512], index: 5, kind: input, shape index: {}]   ;;  %s8941_s6 = inlined_call_operand.vmem [shape: bf16[512,256], index: 6, kind: input, shape index: {}]   ;;  %s8942_s7 = inlined_call_operand.hbm [shape: bf16[256,128], index: 7, kind: input, shape index: {}]   ;;  %s8943_s8 = inlined_call_operand.vmem [shape: bf16[128,64], index: 8, kind: input, shape index: {}]   ;;  %s8944_s9 = inlined_call_operand.vmem [shape: bf16[64,128], index: 9, kind: input, shape index: {}]   ;;  %s8945_s10 = inlined_call_operand.vmem [shape: f32[9,512], index: 10, kind: input, shape index: {}]   ;;  %s8946_s11 = inlined_call_operand.hbm [shape: f32[8,512], index: 11, kind: input, shape index: {}]   ;;  %s8947_s12 = inlined_call_operand.hbm [shape: f32[8,512], index: 12, kind: input, shape index: {}]   ;;  %s8948_s13 = inlined_call_operand.hbm [shape: f32[256,128], index: 13, kind: output, shape index: {}]  }
   0x1   :  { %8974 = sst [smem:[#allocation44_spill]] %s8942_s7 }
   0x2   :  { %8975 = sst [smem:[#allocation45_spill]] %s8948_s13 }
   0x3   :  { %18 = vsyncpa [#allocation3], 0 }
   0x4   :  { %19 = vsyncpa [#allocation6], 0 }
   0x5   :  { %20 = vsyncpa [#allocation9], 0 }
   0x6   :  { %21 = vsyncpa [#allocation4], 0 }
   0x7   :  { %23 = vsyncpa [#allocation4 + $0x1], 0  ;;  %s6600_s25 = smov 0   ;;  %s6602_s26 = smov 0  }
   0x8   :  { %s6604_s27 = smov 0   ;;  %s6606_s28 = smov 0  }
   0x9 LB: > { %8976 = sst [smem:[#allocation15_spill]] %s6504_s25  ;;  %s6621_s29 = sadd.s32 4294967295, %s6516_s28   ;;  %s6516_s28 = sphi %s6606_s28, %s9048_s28   ;;  %s6512_s27 = sphi %s6604_s27, %s9050_s27   ;;  %s6508_s26 = sphi %s6602_s26, %s9052_s26   ;;  %s6504_s25 = sphi %s6600_s25, %s9051_s25  }
   0xa   : > { %8977 = sst [smem:[#allocation16_spill]] %s6512_s27  ;;  %s5215_s30 = sadd.s32 4294967294, %s6516_s28  }
   0xb   : > { %8978 = sst [smem:[#allocation17_spill]] %s6516_s28  ;;  %s6625_s14 = sadd.s32 1, %s6516_s28  }
   0xc   : > { %8979 = sst [smem:[#allocation18_spill]] %s6625_s14  ;;  %s314_s15 = sadd.s32 1, %s6512_s27 }
   0xd   : > { %s311_s16 = ssub.s32 %s6516_s28, %s6625_s14  ;;  %p324_p0 = scmp.ne.s32.totalorder %s6512_s27, %s6508_s26 }
   0xe   : > { %p312_p1 = scmp.eq.s32.totalorder %s311_s16, 0  ;;  %p325_p2 = scmp.eq.s32.totalorder %s6621_s29, 1 }
   0xf   : > { %p330_p3 = scmp.ne.s32.totalorder %s6508_s26, %s6504_s25  ;;  %p331_p4 = scmp.eq.s32.totalorder %s5215_s30, 1 }
  0x10   : > { %s6636_s17 = scalar_select %p312_p1, %s6512_s27, %s314_s15  }
  0x11   : > { %p6638_p5 = por %p325_p2, %p324_p0  ;;  %p6642_p6 = por %p331_p4, %p330_p3 }
  0x12   : > { %8980 = sst [smem:[#allocation19_spill]] %s6636_s17  ;;  %p5216_p7 = scmp.ge.s32.totalorder %s6516_s28, 1 }
  0x13   : > { %s8981_s18 = scalar_select %p6638_p5, 1, 0 }
  0x14   : > { %s8983_s19 = scalar_select %p6642_p6, 1, 0 }
  0x15   : > { %8982 = sst [smem:[#allocation20_spill]] %s8981_s18  ;;  %p338_p8 = scmp.lt.s32.totalorder %s6516_s28, 3 }
  0x16   : > { %8984 = sst [smem:[#allocation21_spill]] %s8983_s19  ;;  %p8953_p9 = scmp.eq.s32.totalorder %s6621_s29, 0 }
  0x17   : > { %p6649_p10 = pnand %p5216_p7, %p338_p8  ;;  %s6518_s21 = smov [#allocation5]  }
  0x18   : > { %s378_s22 = sshll.u32 %s6518_s21, 4  ;;  %s6519_s24 = smov [#allocation2]   ;;  %s379_s22 = int_to_ptr.vmem [resolvable:$true] %s378_s22 }
  0x19   : > { %s8985_s20 = scalar_select %p6649_p10, 1, 0 }
  0x1a   : > { %p5913_p11 = pneg %p6649_p10  ;;  %s362_s30 = sshll.u32 %s6519_s24, 4  ;;  %s6661_s30 = int_to_ptr.vmem [resolvable:$true] %s362_s30 }
  0x1b   : > { %s8987_s7 = sld [smem:[#allocation44_spill]] }
  0x1c   : > { %p6657_p12 = pnand %p8953_p9, %p5913_p11 }
  0x1e   : > { %p6671_p0 = pneg %p6657_p12 }
  0x21   : > { %s6330_s17 = scalar_lea.hbm %s8987_s7, 2048 }
  0x22   : > { %p6331_p13 = scmp.ne.s32.totalorder %s8987_s7, %s6330_s17  ;;  %p6337_p3 = scmp.lt.u32.totalorder %s6330_s17, %s8987_s7 }
  0x24   : > { %p6333_p1 = pnand %p6671_p0, %p6331_p13 }
  0x26   : > { %p6334_p2 = pneg %p6333_p1 }
  0x28   : > { %p6339_p4 = pnand %p6337_p3, %p6334_p2 }
  0x2a   : > { %6342 = shalt.err (!%p6339_p4)
}
  0x2b   : > { %s6343_s15 = scalar_lea.vmem %s379_s22, 2048  ;;  %p6351_p9 = scmp.lt.s32.totalorder %s379_s22, %s379_s22 }
  0x2c   : > { %p6344_p7 = scmp.ne.s32.totalorder %s379_s22, %s6343_s15  ;;  %p6352_p6 = scmp.lt.s32.totalorder %s6343_s15, %s6343_s15 }
  0x2e   : > { %p6346_p8 = pnand %p6344_p7, %p6671_p0  ;;  %p6353_p5 = por %p6352_p6, %p6351_p9 }
  0x30   : > { %p6347_p11 = pneg %p6346_p8 }
  0x32   : > { %p6354_p10 = pnand %p6353_p5, %p6347_p11 }
  0x34   : > { %6357 = shalt.err (!%p6354_p10)
}
  0x35   : > { %s6520_s27 = smov 64   ;;  %s6521_s14 = smov 4  }
  0x36   : > { %5919 = dma.hbm_to_vmem [thread:$0]  (!%p6657_p12), %s8987_s7, 2048, %s379_s22, [#allocation6], %s6520_s27, %s6520_s27, %s6521_s14  }
  0x37   : > { %s6358_s25 = scalar_lea.hbm %s8940_s5, 2048 }
  0x38   : > { %p6359_p13 = scmp.ne.s32.totalorder %s8940_s5, %s6358_s25  ;;  %p6365_p9 = scmp.lt.u32.totalorder %s6358_s25, %s8940_s5 }
  0x3a   : > { %p6361_p5 = pnand %p6359_p13, %p6671_p0 }
  0x3c   : > { %p6362_p6 = pneg %p6361_p5 }
  0x3e   : > { %p6367_p10 = pnand %p6365_p9, %p6362_p6 }
  0x40   : > { %6370 = shalt.err (!%p6367_p10)
}
  0x41   : > { %s6371_s22 = scalar_lea.vmem %s6661_s30, 2048  ;;  %p6379_p4 = scmp.lt.s32.totalorder %s6661_s30, %s6661_s30 }
  0x42   : > { %p6372_p1 = scmp.ne.s32.totalorder %s6661_s30, %s6371_s22  ;;  %p6380_p7 = scmp.lt.s32.totalorder %s6371_s22, %s6371_s22 }
  0x44   : > { %p6374_p2 = pnand %p6372_p1, %p6671_p0  ;;  %p6381_p8 = por %p6380_p7, %p6379_p4 }
  0x46   : > { %p6375_p3 = pneg %p6374_p2 }
  0x48   : > { %p6382_p11 = pnand %p6381_p8, %p6375_p3 }
  0x4a   : > { %6385 = shalt.err (!%p6382_p11)
}
  0x4b   : > { %s6522_s13 = smov 256   ;;  %s6523_s25 = smov 16  }
  0x4c   : > { %5916 = dma.hbm_to_vmem [thread:$0]  (!%p6657_p12), %s8940_s5, 2048, %s6661_s30, [#allocation3], %s6522_s13, %s6522_s13, %s6523_s25  }
  0x4d   : > { %s6524_s27 = smov [#allocation7]   ;;  %s6525_s19 = smov [#allocation8]  }
  0x4e   : > { %s401_s14 = sshll.u32 %s6524_s27, 4  ;;  %s412_s17 = sshll.u32 %s6525_s19, 4  ;;  %s402_s14 = int_to_ptr.vmem [resolvable:$true] %s401_s14  ;;  %s6710_s17 = int_to_ptr.vmem [resolvable:$true] %s412_s17 }
  0x4f   : > { %s6386_s15 = scalar_lea.hbm %s8946_s11, 512 }
  0x50   : > { %p6387_p13 = scmp.ne.s32.totalorder %s8946_s11, %s6386_s15  ;;  %p6393_p9 = scmp.lt.u32.totalorder %s6386_s15, %s8946_s11 }
  0x52   : > { %p6389_p5 = pnand %p6387_p13, %p6671_p0 }
  0x54   : > { %p6390_p6 = pneg %p6389_p5 }
  0x56   : > { %p6395_p10 = pnand %p6393_p9, %p6390_p6 }
  0x58   : > { %6398 = shalt.err (!%p6395_p10)
}
  0x59   : > { %s6399_s13 = scalar_lea.vmem %s402_s14, 512  ;;  %p6407_p4 = scmp.lt.s32.totalorder %s402_s14, %s402_s14 }
  0x5a   : > { %p6400_p1 = scmp.ne.s32.totalorder %s402_s14, %s6399_s13  ;;  %p6408_p7 = scmp.lt.s32.totalorder %s6399_s13, %s6399_s13 }
  0x5c   : > { %p6402_p2 = pnand %p6400_p1, %p6671_p0  ;;  %p6409_p8 = por %p6408_p7, %p6407_p4 }
  0x5e   : > { %p6403_p3 = pneg %p6402_p2 }
  0x60   : > { %p6410_p11 = pnand %p6409_p8, %p6403_p3 }
  0x62   : > { %6413 = shalt.err (!%p6410_p11)
}
  0x63   : > { %5922 = dma.hbm_to_vmem [thread:$0]  (!%p6657_p12), %s8946_s11, 512, %s402_s14, [#allocation6]  }
  0x64   : > { %s6414_s19 = scalar_lea.hbm %s8947_s12, 512 }
  0x65   : > { %p6415_p13 = scmp.ne.s32.totalorder %s8947_s12, %s6414_s19  ;;  %p6421_p9 = scmp.lt.u32.totalorder %s6414_s19, %s8947_s12 }
  0x67   : > { %p6417_p5 = pnand %p6415_p13, %p6671_p0 }
  0x69   : > { %p6418_p6 = pneg %p6417_p5 }
  0x6b   : > { %p6423_p10 = pnand %p6421_p9, %p6418_p6 }
  0x6d   : > { %6426 = shalt.err (!%p6423_p10)
}
  0x6e   : > { %s6427_s14 = scalar_lea.vmem %s6710_s17, 512  ;;  %p6435_p4 = scmp.lt.s32.totalorder %s6710_s17, %s6710_s17 }
  0x6f   : > { %p6428_p1 = scmp.ne.s32.totalorder %s6710_s17, %s6427_s14  ;;  %p6436_p7 = scmp.lt.s32.totalorder %s6427_s14, %s6427_s14 }
  0x71   : > { %p6430_p2 = pnand %p6428_p1, %p6671_p0  ;;  %p6437_p8 = por %p6436_p7, %p6435_p4 }
  0x73   : > { %p6431_p3 = pneg %p6430_p2 }
  0x75   : > { %p6438_p11 = pnand %p6437_p8, %p6431_p3 }
  0x77   : > { %6441 = shalt.err (!%p6438_p11)
}
  0x78   : > { %5925 = dma.hbm_to_vmem [thread:$0]  (!%p6657_p12), %s8947_s12, 512, %s6710_s17, [#allocation9]  }
  0x79   : > { %p8989_p13 = scmp.ne.s32.totalorder %s8985_s20, 0 }
  0x7b   : > { %434 = sbr.rel (%p8989_p13) target bundleno = 2459 (0x99b), region = 72 }
  0x82   : > { %p8990_p5 = scmp.eq.s32.totalorder %s6621_s29, 0 }
  0x84   : > { %6487 = dma.done.wait (%p8990_p5), [#allocation3], 2048   ;;  %p8991_p0 = pmov %p8990_p5 }
  0x86   : > { %6489 = vsyncadd (%p8991_p0), [#allocation3], 4294965248  ;;  %p8992_p6 = pmov %p8991_p0 }
  0x87   : > { %p8993_p9 = pmov %p8991_p0 }
  0x88   : > { %6491 = dma.done.wait (%p8992_p6), [#allocation6], 2560  }
  0x89   : > { %6493 = vsyncadd (%p8993_p9), [#allocation6], 4294964736  ;;  %p8994_p10 = pmov %p8991_p0 }
  0x8a   : > { %p8995_p12 = pmov %p8991_p0 }
  0x8b   : > { %6495 = dma.done.wait (%p8994_p10), [#allocation9], 512  }
  0x8c   : > { %6497 = vsyncadd (%p8995_p12), [#allocation9], 4294966784  ;;  %v6526_v0 = vmov 0   ;;  %v5982_v1 = vld [vmem:[%s8936_s1 + $0x4] ss:$16 sps:$4 sm:$0xff]   ;;  %s5228_s14 = sshll.u32 %s6621_s29, 4 }
  0x8d   : > { %768 = vmatprep.mubr.bf16.mxu0 %v6526_v0  ;;  %881 = vmatprep.mubr.bf16.mxu1 %v6526_v0  ;;  %v5984_v2 = vld [vmem:[%s8936_s1] ss:$16 sps:$4 sm:$0xff]   ;;  %v5985_v3 = vld [vmem:[%s8936_s1 + $0x24] ss:$16 sps:$4 sm:$0xff]   ;;  %p491_p1 = scmp.lt.s32.totalorder %s5228_s14, 31  ;;  %s487_s24 = sand.u32 1, %s6508_s26  }
  0x8e   : > { %736 = vmatprep.subr.bf16.mxu0 %v5982_v1  ;;  %v5987_v4 = vld [vmem:[%s8936_s1 + $0x20] ss:$16 sps:$4 sm:$0xff]   ;;  %v5988_v5 = vld [vmem:[%s8936_s1 + $0x44] ss:$16 sps:$4 sm:$0xff]   ;;  %v6006_v10 = vld [vmem:[%s8936_s1 + $0xc] ss:$16 sps:$4 sm:$0xff]  }
  0x8f   : > { %737 = vmatpush1.bf16.msra.mxu0 %v5984_v2  ;;  %v5990_v6 = vld [vmem:[%s8936_s1 + $0x40] ss:$16 sps:$4 sm:$0xff]   ;;  %v5991_v7 = vld [vmem:[%s8936_s1 + $0x64] ss:$16 sps:$4 sm:$0xff]   ;;  %v6008_v11 = vld [vmem:[%s8936_s1 + $0x8] ss:$16 sps:$4 sm:$0xff]   ;;  %849 = vmatprep.subr.bf16.mxu1 %v6006_v10 }
  0x90   : > { %738 = vmatprep.subr.bf16.mxu0 %v5985_v3  ;;  %v5993_v8 = vld [vmem:[%s8936_s1 + $0x60] ss:$16 sps:$4 sm:$0xff]   ;;  %v5994_v9 = vld [vmem:[%s8936_s1 + $0x84] ss:$16 sps:$4 sm:$0xff]   ;;  %v6009_v13 = vld [vmem:[%s8936_s1 + $0x2c] ss:$16 sps:$4 sm:$0xff]   ;;  %850 = vmatpush1.bf16.msra.mxu1 %v6008_v11 }
  0x91   : > { %v5996_v12 = vld [vmem:[%s8936_s1 + $0x80] ss:$16 sps:$4 sm:$0xff]   ;;  %v5997_v14 = vld [vmem:[%s8936_s1 + $0xa4] ss:$16 sps:$4 sm:$0xff]   ;;  %s9054_s14 = smov (!%p491_p1, %s5228_s14), 31  ;;  %851 = vmatprep.subr.bf16.mxu1 %v6009_v13  ;;  %s5227_s15 = sshll.u32 %s487_s24, 7 }
  0x92   : > { %v6011_v15 = vld [vmem:[%s8936_s1 + $0x28] ss:$16 sps:$4 sm:$0xff]   ;;  %v6012_v16 = vld [vmem:[%s8936_s1 + $0x4c] ss:$16 sps:$4 sm:$0xff]   ;;  %v5999_v17 = vld [vmem:[%s8936_s1 + $0xa0] ss:$16 sps:$4 sm:$0xff]  }
  0x93   : > { %739 = vmatpush1.bf16.msra.mxu0 %v5987_v4  ;;  %v6000_v18 = vld [vmem:[%s8936_s1 + $0xc4] ss:$16 sps:$4 sm:$0xff]   ;;  %s5229_s13 = sshll.u32 %s9054_s14, 3  ;;  %v6014_v19 = vld [vmem:[%s8936_s1 + $0x48] ss:$16 sps:$4 sm:$0xff]   ;;  %s8853_s14 = scalar_lea.vmem [#allocation10], %s5227_s15 }
  0x94   : > { %740 = vmatprep.subr.bf16.mxu0 %v5988_v5  ;;  %852 = vmatpush1.bf16.msra.mxu1 %v6011_v15  ;;  %v6015_v20 = vld [vmem:[%s8936_s1 + $0x6c] ss:$16 sps:$4 sm:$0xff]   ;;  %v6002_v21 = vld [vmem:[%s8936_s1 + $0xc0] ss:$16 sps:$4 sm:$0xff]   ;;  %v6003_v22 = vld [vmem:[%s8936_s1 + $0xe4] ss:$16 sps:$4 sm:$0xff]   ;;  %s6839_s28 = scalar_lea.vmem %s8935_s0, %s5229_s13 }
  0x95   : > { %853 = vmatprep.subr.bf16.mxu1 %v6012_v16  ;;  %v6017_v23 = vld [vmem:[%s8936_s1 + $0x68] ss:$16 sps:$4 sm:$0xff]   ;;  %v6005_v24 = vld [vmem:[%s8936_s1 + $0xe0] ss:$16 sps:$4 sm:$0xff]   ;;  %v6018_v25 = vld [vmem:[%s8936_s1 + $0x8c] ss:$16 sps:$4 sm:$0xff]  }
  0x96   : > { %v498_v26 = vld [vmem:[%s6839_s28] sm:$0xff]  ;;  %v499_v27 = vld [vmem:[%s6839_s28 + $0x8] sm:$0xff]  ;;  %v6035_v33 = vld [vmem:[%s8937_s2 + $0x14] ss:$8 sps:$4 sm:$0xff]   ;;  %s9041_s22 = sld [smem:[#allocation20_spill]]  ;;  %s5490_s30 = sshll.u32 %s6621_s29, 11 }
  0x97   : > { %741 = vmatpush1.bf16.msra.mxu0 %v5990_v6  ;;  %v6032_v28 = vld [vmem:[%s8937_s2 + $0x4] ss:$8 sps:$4 sm:$0xff]   ;;  %v6020_v29 = vld [vmem:[%s8936_s1 + $0x88] ss:$16 sps:$4 sm:$0xff]   ;;  %v514_v30 = vpack.c.bf16 %v499_v27, %v498_v26  ;;  %v500_v35 = vld [vmem:[%s6839_s28 + $0x10] sm:$0xff]  ;;  %v556_v27 = vlaneseq  ;;  %s5112_s20 = sshll.u32 %s8853_s14, 4  ;;  %s8887_s20 = int_to_ptr.vmem [resolvable:$true] %s5112_s20 }
  0x98   : > { %742 = vmatprep.subr.bf16.mxu0 %v5991_v7  ;;  %854 = vmatpush1.bf16.msra.mxu1 %v6014_v19  ;;  %v6021_v31 = vld [vmem:[%s8936_s1 + $0xac] ss:$16 sps:$4 sm:$0xff]   ;;  %v6030_v32 = vld [vmem:[%s8937_s2] ss:$8 sps:$4 sm:$0xff]   ;;  %v6033_v38 = vld [vmem:[%s8937_s2 + $0x10] ss:$8 sps:$4 sm:$0xff]  }
  0x99   : > { %855 = vmatprep.subr.bf16.mxu1 %v6015_v20  ;;  %v6023_v34 = vld [vmem:[%s8936_s1 + $0xa8] ss:$16 sps:$4 sm:$0xff]   ;;  %v6024_v36 = vld [vmem:[%s8936_s1 + $0xcc] ss:$16 sps:$4 sm:$0xff]   ;;  %v502_v46 = vld [vmem:[%s6839_s28 + $0x20] sm:$0xff]  ;;  %s9042_s17 = sld [smem:[#allocation45_spill]] }
  0x9a   : > { %v501_v37 = vld [vmem:[%s6839_s28 + $0x18] sm:$0xff]  ;;  %v6038_v39 = vld [vmem:[%s8937_s2 + $0x24] ss:$8 sps:$4 sm:$0xff]   ;;  %v6036_v43 = vld [vmem:[%s8937_s2 + $0x20] ss:$8 sps:$4 sm:$0xff]   ;;  %s8894_s29 = scalar_lea.sflag [#allocation4], %s487_s24 }
  0x9b   : > { %743 = vmatpush1.bf16.msra.mxu0 %v5993_v8  ;;  %v6026_v40 = vld [vmem:[%s8936_s1 + $0xc8] ss:$16 sps:$4 sm:$0xff]   ;;  %v515_v41 = vpack.c.bf16 %v501_v37, %v500_v35  ;;  %v6027_v42 = vld [vmem:[%s8936_s1 + $0xec] ss:$16 sps:$4 sm:$0xff]   ;;  %v504_v53 = vld [vmem:[%s6839_s28 + $0x30] sm:$0xff]  ;;  %s6442_s13 = scalar_lea.vmem %s8887_s20, 2048 }
  0x9c   : > { %744 = vmatprep.subr.bf16.mxu0 %v5994_v9  ;;  %856 = vmatpush1.bf16.msra.mxu1 %v6017_v23  ;;  %v6041_v44 = vld [vmem:[%s8937_s2 + $0x34] ss:$8 sps:$4 sm:$0xff]   ;;  %v6029_v45 = vld [vmem:[%s8936_s1 + $0xe8] ss:$16 sps:$4 sm:$0xff]   ;;  %v6044_v49 = vld [vmem:[%s8937_s2 + $0x44] ss:$8 sps:$4 sm:$0xff]   ;;  %p6443_p2 = scmp.ne.s32.totalorder %s8887_s20, %s6442_s13 }
  0x9d   : > { %857 = vmatprep.subr.bf16.mxu1 %v6018_v25  ;;  %v503_v47 = vld [vmem:[%s6839_s28 + $0x28] sm:$0xff]  ;;  %v6039_v48 = vld [vmem:[%s8937_s2 + $0x30] ss:$8 sps:$4 sm:$0xff]   ;;  %v6047_v52 = vld [vmem:[%s8937_s2 + $0x54] ss:$8 sps:$4 sm:$0xff]   ;;  %p9043_p3 = scmp.ne.s32.totalorder %s9041_s22, 0 }
  0x9e   : > { %v6042_v50 = vld [vmem:[%s8937_s2 + $0x40] ss:$8 sps:$4 sm:$0xff]   ;;  %v516_v51 = vpack.c.bf16 %v503_v47, %v502_v46  ;;  %v505_v54 = vld [vmem:[%s6839_s28 + $0x38] sm:$0xff]  ;;  %v6050_v56 = vld [vmem:[%s8937_s2 + $0x64] ss:$8 sps:$4 sm:$0xff]   ;;  %s6527_s25 = smov [#allocation10]  }
  0x9f   : > { %745 = vmatpush1.bf16.msra.mxu0 %v5996_v12  ;;  %v6045_v55 = vld [vmem:[%s8937_s2 + $0x50] ss:$8 sps:$4 sm:$0xff]   ;;  %v6048_v57 = vld [vmem:[%s8937_s2 + $0x60] ss:$8 sps:$4 sm:$0xff]   ;;  %v517_v58 = vpack.c.bf16 %v505_v54, %v504_v53  ;;  %v6053_v59 = vld [vmem:[%s8937_s2 + $0x74] ss:$8 sps:$4 sm:$0xff]   ;;  %s8885_s7 = scalar_lea.hbm %s9042_s17, %s5490_s30  ;;  %p6444_p4 = pnand %p6443_p2, %p9043_p3 }
  0xa0   : > { %746 = vmatprep.subr.bf16.mxu0 %v5997_v14  ;;  %858 = vmatpush1.bf16.msra.mxu1 %v6020_v29  ;;  %v506_v60 = vld [vmem:[%s6839_s28 + $0x40] sm:$0xff]  ;;  %v507_v61 = vld [vmem:[%s6839_s28 + $0x48] sm:$0xff]  ;;  %v6051_v62 = vld [vmem:[%s8937_s2 + $0x70] ss:$8 sps:$4 sm:$0xff]   ;;  %s6446_s18 = sshll.u32 %s6527_s25, 4  ;;  %s6447_s18 = int_to_ptr.vmem [resolvable:$false] %s6446_s18 }
  0xa1   : > { %859 = vmatprep.subr.bf16.mxu1 %v6021_v31  ;;  %v6056_v63 = vld [vmem:[%s8937_s2 + $0x84] ss:$8 sps:$4 sm:$0xff]   ;;  %v6054_v1 = vld [vmem:[%s8937_s2 + $0x80] ss:$8 sps:$4 sm:$0xff]   ;;  %v518_v2 = vpack.c.bf16 %v507_v61, %v506_v60  ;;  %v6059_v3 = vld [vmem:[%s8937_s2 + $0x94] ss:$8 sps:$4 sm:$0xff]   ;;  %p6445_p7 = pneg %p6444_p4  ;;  %p6449_p8 = scmp.lt.s32.totalorder %s8887_s20, %s6447_s18 }
  0xa2   : > { %v508_v4 = vld [vmem:[%s6839_s28 + $0x50] sm:$0xff]  ;;  %v509_v5 = vld [vmem:[%s6839_s28 + $0x58] sm:$0xff]  ;;  %v6062_v7 = vld [vmem:[%s8937_s2 + $0xa4] ss:$8 sps:$4 sm:$0xff]   ;;  %s6448_s27 = scalar_lea.vmem %s6447_s18, 4096 }
  0xa3   : > { %747 = vmatpush1.bf16.msra.mxu0 %v5999_v17  ;;  %v6057_v6 = vld [vmem:[%s8937_s2 + $0x90] ss:$8 sps:$4 sm:$0xff]   ;;  %v6060_v8 = vld [vmem:[%s8937_s2 + $0xa0] ss:$8 sps:$4 sm:$0xff]   ;;  %v519_v9 = vpack.c.bf16 %v509_v5, %v508_v4  ;;  %v6065_v10 = vld [vmem:[%s8937_s2 + $0xb4] ss:$8 sps:$4 sm:$0xff]   ;;  %p6450_p11 = scmp.lt.s32.totalorder %s6448_s27, %s6442_s13 }
  0xa4   : > { %748 = vmatprep.subr.bf16.mxu0 %v6000_v18  ;;  %860 = vmatpush1.bf16.msra.mxu1 %v6023_v34  ;;  %v510_v11 = vld [vmem:[%s6839_s28 + $0x60] sm:$0xff]  ;;  %v511_v12 = vld [vmem:[%s6839_s28 + $0x68] sm:$0xff]  ;;  %v6063_v13 = vld [vmem:[%s8937_s2 + $0xb0] ss:$8 sps:$4 sm:$0xff]  }
  0xa5   : > { %861 = vmatprep.subr.bf16.mxu1 %v6024_v36  ;;  %v6068_v14 = vld [vmem:[%s8937_s2 + $0xc4] ss:$8 sps:$4 sm:$0xff]   ;;  %v6066_v15 = vld [vmem:[%s8937_s2 + $0xc0] ss:$8 sps:$4 sm:$0xff]   ;;  %v520_v16 = vpack.c.bf16 %v511_v12, %v510_v11  ;;  %v512_v17 = vld [vmem:[%s6839_s28 + $0x70] sm:$0xff]  ;;  %p6451_p13 = por %p6450_p11, %p6449_p8 }
  0xa6   : > { %v513_v18 = vld [vmem:[%s6839_s28 + $0x78] sm:$0xff]  ;;  %v6072_v23 = vld [vmem:[%s8937_s2 + $0xe0] ss:$8 sps:$4 sm:$0xff]   ;;  %v6080_v26 = vld [vmem:[%s8937_s2 + $0x104] ss:$8 sps:$4 sm:$0xff]  }
  0xa7   : > { %749 = vmatpush1.bf16.msra.mxu0 %v6002_v21  ;;  %v521_v19 = vpack.c.bf16 %v513_v18, %v512_v17  ;;  %v6071_v20 = vld [vmem:[%s8937_s2 + $0xd4] ss:$8 sps:$4 sm:$0xff]   ;;  %v6069_v21 = vld [vmem:[%s8937_s2 + $0xd0] ss:$8 sps:$4 sm:$0xff]   ;;  %v6127_v4 = vld [vmem:[%s8938_s3] sm:$0xff]   ;;  %p6452_p5 = pnand %p6451_p13, %p6445_p7 }
  0xa8   : > { %750 = vmatprep.subr.bf16.mxu0 %v6003_v22  ;;  %862 = vmatpush1.bf16.msra.mxu1 %v6026_v40  ;;  %v6074_v22 = vld [vmem:[%s8937_s2 + $0xe4] ss:$8 sps:$4 sm:$0xff]   ;;  %v6075_v25 = vld [vmem:[%s8937_s2 + $0xf0] ss:$8 sps:$4 sm:$0xff]  }
  0xa9   : > { %863 = vmatprep.subr.bf16.mxu1 %v6027_v42  ;;  %v1154_v34 = vld [vmem:[#allocation7] ss:$8 sm:$0xf] }
  0xaa   : > { %v1240_v37 = vld [vmem:[#allocation8] ss:$8 sm:$0xf] }
  0xab   : > { %751 = vmatpush1.bf16.msra.mxu0 %v6005_v24  ;;  %v6077_v24 = vld [vmem:[%s8937_s2 + $0xf4] ss:$8 sps:$4 sm:$0xff]   ;;  %v6128_v5 = vld [vmem:[%s8938_s3 + $0x48] sm:$0xff]  }
  0xac   : > { %1755 = vmatprep.subr.bf16.mxu0 %v6032_v28  ;;  %864 = vmatpush1.bf16.msra.mxu1 %v6029_v45  ;;  %v557_v28 = vshrl.u32 %v556_v27, 7  ;;  %v6078_v27 = vld [vmem:[%s8937_s2 + $0x100] ss:$8 sps:$4 sm:$0xff]  }
  0xae   : > { %769 = vmatmul.mubr.bf16.vlgmr.msra.gmra.mrb[0].mxu0 %v514_v30  ;;  %v7000_v29 = vsub.s32 0, %v557_v28  ;;  %v7005_v31 = vsub.s32 1, %v557_v28  ;;  %v7024_v47 = vsub.s32 3, %v557_v28 }
  0xaf   : > { %778 = vmatprep.mubr.bf16.mxu0 %v6526_v0  ;;  %1756 = vmatpush1.bf16.msra.mxu0 %v6030_v32 }
  0xb0   : > { %1757 = vmatprep.subr.bf16.mxu0 %v6035_v33  ;;  %882 = vmatmul.mubr.bf16.vlgmr.msra.gmra.mrb[0].mxu1 %v514_v30  ;;  %8996 = vst [vmem:[#allocation22_spill] sm:$0xff] %v7000_v29  ;;  %v554_v30 = vld [vmem:[%s8945_s10] ss:$8 sm:$0xf]  ;;  %8997 = vst [vmem:[#allocation23_spill] sm:$0xff] %v7005_v31  ;;  %v7031_v53 = vrot.slane %v1240_v37, %v7005_v31 }
  0xb1   : > { %891 = vmatprep.mubr.bf16.mxu1 %v6526_v0  ;;  %v7008_v32 = vrot.slane %v554_v30, %v7000_v29  ;;  %v7011_v33 = vrot.slane %v554_v30, %v7005_v31  ;;  %v7039_v60 = vrot.slane %v554_v30, %v7024_v47 }
  0xb3   : > { %1758 = vmatpush1.bf16.msra.mxu0 %v6033_v38 }
  0xb4   : > { %1759 = vmatprep.subr.bf16.mxu0 %v6038_v39  ;;  %v7015_v39 = vrot.slane %v1154_v34, %v7000_v29 }
  0xb6   : > { %779 = vmatmul.mubr.bf16.gmra.mrb[4].mxu0 %v515_v41 }
  0xb7   : > { %788 = vmatprep.mubr.bf16.mxu0 %v6526_v0  ;;  %1760 = vmatpush1.bf16.msra.mxu0 %v6036_v43  ;;  %v7021_v43 = vsub.s32 2, %v557_v28  ;;  %v6130_v28 = vld [vmem:[%s8938_s3 + $0x50] sm:$0xff]  }
  0xb8   : > { %1761 = vmatprep.subr.bf16.mxu0 %v6041_v44  ;;  %892 = vmatmul.mubr.bf16.gmra.mrb[4].mxu1 %v515_v41  ;;  %v7019_v41 = vrot.slane %v1154_v34, %v7005_v31 }
  0xb9   : > { %901 = vmatprep.mubr.bf16.mxu1 %v6526_v0 }
  0xbb   : > { %1762 = vmatpush1.bf16.msra.mxu0 %v6039_v48  ;;  %v7027_v48 = vrot.slane %v1240_v37, %v7000_v29 }
  0xbc   : > { %1763 = vmatprep.subr.bf16.mxu0 %v6044_v49 }
  0xbe   : > { %789 = vmatmul.mubr.bf16.gmra.mrb[8].mxu0 %v516_v51 }
  0xbf   : > { %798 = vmatprep.mubr.bf16.mxu0 %v6526_v0  ;;  %1764 = vmatpush1.bf16.msra.mxu0 %v6042_v50 }
  0xc0   : > { %1765 = vmatprep.subr.bf16.mxu0 %v6047_v52  ;;  %902 = vmatmul.mubr.bf16.gmra.mrb[8].mxu1 %v516_v51 }
  0xc1   : > { %911 = vmatprep.mubr.bf16.mxu1 %v6526_v0 }
  0xc3   : > { %1766 = vmatpush1.bf16.msra.mxu0 %v6045_v55 }
  0xc4   : > { %1767 = vmatprep.subr.bf16.mxu0 %v6050_v56 }
  0xc6   : > { %799 = vmatmul.mubr.bf16.gmra.mrb[12].mxu0 %v517_v58 }
  0xc7   : > { %808 = vmatprep.mubr.bf16.mxu0 %v6526_v0  ;;  %1768 = vmatpush1.bf16.msra.mxu0 %v6048_v57 }
  0xc8   : > { %1769 = vmatprep.subr.bf16.mxu0 %v6053_v59  ;;  %912 = vmatmul.mubr.bf16.gmra.mrb[12].mxu1 %v517_v58  ;;  %v7036_v59 = vrot.slane %v554_v30, %v7021_v43 }
  0xc9   : > { %921 = vmatprep.mubr.bf16.mxu1 %v6526_v0 }
  0xcb   : > { %1770 = vmatpush1.bf16.msra.mxu0 %v6051_v62 }
  0xcc   : > { %1771 = vmatprep.subr.bf16.mxu0 %v6056_v63 }
  0xce   : > { %809 = vmatmul.mubr.bf16.gmra.mrb[16].mxu0 %v518_v2 }
  0xcf   : > { %818 = vmatprep.mubr.bf16.mxu0 %v6526_v0  ;;  %1772 = vmatpush1.bf16.msra.mxu0 %v6054_v1  ;;  %v7043_v1 = vrot.slane %v1154_v34, %v7021_v43 }
  0xd0   : > { %1773 = vmatprep.subr.bf16.mxu0 %v6059_v3  ;;  %922 = vmatmul.mubr.bf16.gmra.mrb[16].mxu1 %v518_v2  ;;  %v7046_v2 = vrot.slane %v1240_v37, %v7021_v43  ;;  %v6126_v3 = vld [vmem:[%s8938_s3 + $0x40] sm:$0xff]  }
  0xd1   : > { %931 = vmatprep.mubr.bf16.mxu1 %v6526_v0  ;;  %5491 = vmatprep.subr.bf16.mxu1 %v6126_v3 }
  0xd2   : > { %5492 = vmatpush3.bf16.msra.mxu1 %v6127_v4 }
  0xd3   : > { %1774 = vmatpush1.bf16.msra.mxu0 %v6057_v6  ;;  %5493 = vmatprep.subr.bf16.mxu1 %v6128_v5  ;;  %v6086_v5 = vld [vmem:[%s8937_s2 + $0x124] ss:$8 sps:$4 sm:$0xff]  }
  0xd4   : > { %1775 = vmatprep.subr.bf16.mxu0 %v6062_v7 }
  0xd6   : > { %819 = vmatmul.mubr.bf16.gmra.mrb[20].mxu0 %v519_v9 }
  0xd7   : > { %828 = vmatprep.mubr.bf16.mxu0 %v6526_v0  ;;  %1776 = vmatpush1.bf16.msra.mxu0 %v6060_v8 }
  0xd8   : > { %1777 = vmatprep.subr.bf16.mxu0 %v6065_v10  ;;  %932 = vmatmul.mubr.bf16.gmra.mrb[20].mxu1 %v519_v9  ;;  %v7060_v9 = vrot.slane %v1154_v34, %v7024_v47  ;;  %v7063_v10 = vrot.slane %v1240_v37, %v7024_v47 }
  0xd9   : > { %941 = vmatprep.mubr.bf16.mxu1 %v6526_v0 }
  0xdb   : > { %1778 = vmatpush1.bf16.msra.mxu0 %v6063_v13 }
  0xdc   : > { %1779 = vmatprep.subr.bf16.mxu0 %v6068_v14 }
  0xde   : > { %829 = vmatmul.mubr.bf16.gmra.mrb[24].mxu0 %v520_v16 }
  0xdf   : > { %838 = vmatprep.mubr.bf16.mxu0 %v6526_v0  ;;  %1780 = vmatpush1.bf16.msra.mxu0 %v6066_v15 }
  0xe0   : > { %942 = vmatmul.mubr.bf16.gmra.mrb[24].mxu1 %v520_v16  ;;  %1781 = vmatprep.subr.bf16.mxu0 %v6071_v20  ;;  %v6129_v20 = vld [vmem:[%s8938_s3 + $0x8] sm:$0xff]  }
  0xe1   : > { %951 = vmatprep.mubr.bf16.mxu1 %v6526_v0  ;;  %5494 = vmatpush3.bf16.msra.mxu1 %v6129_v20 }
  0xe2   : > { %5495 = vmatprep.subr.bf16.mxu1 %v6130_v28 }
  0xe3   : > { %1782 = vmatpush1.bf16.msra.mxu0 %v6069_v21 }
  0xe4   : > { %1783 = vmatprep.subr.bf16.mxu0 %v6074_v22 }
  0xe6   : > { %839 = vmatmul.mubr.bf16.gmra.mrb[28].mxu0 %v521_v19 }
  0xe7   : > { %1784 = vmatpush1.bf16.msra.mxu0 %v6072_v23 }
  0xe8   : > { %952 = vmatmul.mubr.bf16.gmra.mrb[28].mxu1 %v521_v19  ;;  %1785 = vmatprep.subr.bf16.mxu0 %v6077_v24 }
  0xeb   : > { %1786 = vmatpush1.bf16.msra.mxu0 %v6075_v25 }
  0xec   : > { %1868 = vmatprep.subr.bf16.mxu0 %v6080_v26 }
 0x181   : > { %v770_v35 = vpop.f32.mrb[0].mxu0 }
 0x182   : > { %v771_v36 = vadd.f32 %v770_v35, %v7008_v32  ;;  %v772_v38 = vpop.f32.mrb[1].mxu0 }
 0x183   : > { %v773_v40 = vadd.f32 %v772_v38, %v7011_v33  ;;  %v774_v42 = vpop.f32.mrb[2].mxu0  ;;  %v883_v37 = vpop.f32.mrb[0].mxu1 }
 0x184   : > { %vm962_vm0 = vcmp.gt.f32.partialorder %v771_v36, 0.0  ;;  %v1026_v44 = vmul.f32 0.2, %v771_v36  ;;  %v775_v45 = vadd.f32 %v774_v42, %v7008_v32  ;;  %v776_v46 = vpop.f32.mrb[3].mxu0  ;;  %v884_v42 = vadd.f32 %v883_v37, %v7036_v59 }
 0x185   : > { %vm963_vm1 = vcmp.gt.f32.partialorder %v773_v40, 0.0  ;;  %v1027_v49 = vmul.f32 0.2, %v773_v40  ;;  %v777_v50 = vadd.f32 %v776_v46, %v7011_v33 }
 0x186   : > { %v1090_v51 = vsel %vm962_vm0, %v771_v36, %v1026_v44  ;;  %vm966_vm2 = vcmp.gt.f32.partialorder %v775_v45, 0.0  ;;  %v1030_v52 = vmul.f32 0.2, %v775_v45  ;;  %v6083_v36 = vld [vmem:[%s8937_s2 + $0x114] ss:$8 sps:$4 sm:$0xff]   ;;  %v885_v44 = vpop.f32.mrb[1].mxu1 }
 0x187   : > { %v1176_v54 = vmul.f32 %v7015_v39, %v1090_v51  ;;  %v1091_v55 = vsel %vm963_vm1, %v773_v40, %v1027_v49  ;;  %vm967_vm3 = vcmp.gt.f32.partialorder %v777_v50, 0.0  ;;  %v1031_v56 = vmul.f32 0.2, %v777_v50 }
 0x188   : > { %v1177_v57 = vmul.f32 %v7019_v41, %v1091_v55  ;;  %v1094_v58 = vsel %vm966_vm2, %v775_v45, %v1030_v52  ;;  %v6131_v45 = vld [vmem:[%s8938_s3 + $0x10] sm:$0xff]   ;;  %v7093_v52 = vadd.f32 %v885_v44, %v7039_v60  ;;  %v6132_v55 = vld [vmem:[%s8938_s3 + $0x58] sm:$0xff]   ;;  %vm964_vm8 = vcmp.gt.f32.partialorder %v884_v42, 0.0 }
 0x189   : > { %v1180_v61 = vmul.f32 %v7015_v39, %v1094_v58  ;;  %v1095_v62 = vsel %vm967_vm3, %v777_v50, %v1031_v56  ;;  %v780_v63 = vpop.f32.mrb[4].mxu0  ;;  %v1262_v11 = vadd.f32 %v7027_v48, %v1176_v54  ;;  %v7095_v54 = vpop.f32.mrb[2].mxu1  ;;  %5496 = vmatpush3.bf16.msra.mxu1 %v6131_v45 }
 0x18a   : > { %v1181_v6 = vmul.f32 %v7019_v41, %v1095_v62  ;;  %v781_v7 = vadd.f32 %v780_v63, %v7008_v32  ;;  %v782_v8 = vpop.f32.mrb[5].mxu0  ;;  %v1263_v15 = vadd.f32 %v7031_v53, %v1177_v57  ;;  %v7106_v63 = vpop.f32.mrb[3].mxu1  ;;  %vm965_vm9 = vcmp.gt.f32.partialorder %v7093_v52, 0.0  ;;  %5497 = vmatprep.subr.bf16.mxu1 %v6132_v55  ;;  %v6087_v55 = vld [vmem:[%s8937_s2 + $0x130] ss:$8 sps:$4 sm:$0xff]  }
 0x18b   : > { %v1266_v12 = vadd.f32 %v7027_v48, %v1180_v61  ;;  %v783_v13 = vadd.f32 %v782_v8, %v7011_v33  ;;  %v784_v14 = vpop.f32.mrb[6].mxu0  ;;  %v6081_v61 = vld [vmem:[%s8937_s2 + $0x110] ss:$8 sps:$4 sm:$0xff]  }
 0x18c   : > { %vm970_vm4 = vcmp.gt.f32.partialorder %v781_v7, 0.0  ;;  %v1034_v16 = vmul.f32 0.2, %v781_v7  ;;  %v785_v17 = vadd.f32 %v784_v14, %v7008_v32  ;;  %v786_v18 = vpop.f32.mrb[7].mxu0  ;;  %v1267_v19 = vadd.f32 %v7031_v53, %v1181_v6  ;;  %v6133_v14 = vld [vmem:[%s8938_s3 + $0x18] sm:$0xff]  }
 0x18d   : > { %v1326_v21 = vpack.c.bf16 %v1266_v12, %v1262_v11  ;;  %vm971_vm5 = vcmp.gt.f32.partialorder %v783_v13, 0.0  ;;  %v1035_v22 = vmul.f32 0.2, %v783_v13  ;;  %v787_v23 = vadd.f32 %v786_v18, %v7011_v33  ;;  %5498 = vmatpush3.bf16.msra.mxu1 %v6133_v14 }
 0x18e   : > { %v1098_v24 = vsel %vm970_vm4, %v781_v7, %v1034_v16  ;;  %vm974_vm6 = vcmp.gt.f32.partialorder %v785_v17, 0.0  ;;  %v1038_v25 = vmul.f32 0.2, %v785_v17  ;;  %v1327_v26 = vpack.c.bf16 %v1267_v19, %v1263_v15 }
 0x18f   : > { %v1184_v30 = vmul.f32 %v7015_v39, %v1098_v24  ;;  %v1099_v34 = vsel %vm971_vm5, %v783_v13, %v1035_v22  ;;  %vm975_vm7 = vcmp.gt.f32.partialorder %v787_v23, 0.0  ;;  %v1039_v35 = vmul.f32 0.2, %v787_v23 }
 0x190   : > { %v1185_v38 = vmul.f32 %v7019_v41, %v1099_v34  ;;  %v1102_v40 = vsel %vm974_vm6, %v785_v17, %v1038_v25  ;;  %1787 = vmatprep.mubr.bf16.mxu0 %v1327_v26  ;;  %v1028_v7 = vmul.f32 0.2, %v884_v42  ;;  %v6089_v25 = vld [vmem:[%s8937_s2 + $0x134] ss:$8 sps:$4 sm:$0xff]   ;;  %v7127_v26 = vpop.f32.mrb[4].mxu1 }
 0x191   : > { %v1188_v46 = vmul.f32 %v7015_v39, %v1102_v40  ;;  %v1103_v49 = vsel %vm975_vm7, %v787_v23, %v1039_v35  ;;  %v790_v50 = vpop.f32.mrb[8].mxu0  ;;  %1788 = vmatmul.mubr.bf16.vlgmr.msra.gmra.mrb[32].mxu0 %v1326_v21  ;;  %v1270_v51 = vadd.f32 %v7027_v48, %v1184_v30  ;;  %v6084_v21 = vld [vmem:[%s8937_s2 + $0x120] ss:$8 sps:$4 sm:$0xff]   ;;  %v1029_v34 = vmul.f32 0.2, %v7093_v52  ;;  %v7132_v35 = vpop.f32.mrb[5].mxu1 }
 0x192   : > { %v1189_v56 = vmul.f32 %v7019_v41, %v1103_v49  ;;  %v791_v57 = vadd.f32 %v790_v50, %v7008_v32  ;;  %1869 = vmatpush1.bf16.msra.mxu0 %v6078_v27  ;;  %v792_v58 = vpop.f32.mrb[9].mxu0  ;;  %v1271_v62 = vadd.f32 %v7031_v53, %v1185_v38  ;;  %v1092_v30 = vsel %vm964_vm8, %v884_v42, %v1028_v7  ;;  %v6135_v42 = vld [vmem:[%s8938_s3 + $0x20] sm:$0xff]  }
 0x193   : > { %v793_v3 = vadd.f32 %v792_v58, %v7011_v33  ;;  %v794_v4 = vpop.f32.mrb[10].mxu0  ;;  %1870 = vmatprep.subr.bf16.mxu0 %v6083_v36  ;;  %v1274_v6 = vadd.f32 %v7027_v48, %v1188_v46  ;;  %v6134_v36 = vld [vmem:[%s8938_s3 + $0x60] sm:$0xff]   ;;  %v1178_v45 = vmul.f32 %v7043_v1, %v1092_v30  ;;  %v7140_v46 = vpop.f32.mrb[6].mxu1 }
 0x194   : > { %vm978_vm10 = vcmp.gt.f32.partialorder %v791_v57, 0.0  ;;  %v1042_v8 = vmul.f32 0.2, %v791_v57  ;;  %v795_v11 = vadd.f32 %v794_v4, %v7008_v32  ;;  %v796_v12 = vpop.f32.mrb[11].mxu0  ;;  %v1275_v13 = vadd.f32 %v7031_v53, %v1189_v56  ;;  %v7154_v58 = vpop.f32.mrb[7].mxu1  ;;  %5499 = vmatprep.subr.bf16.mxu1 %v6134_v36 }
 0x195   : > { %vm979_vm11 = vcmp.gt.f32.partialorder %v793_v3, 0.0  ;;  %v1043_v15 = vmul.f32 0.2, %v793_v3  ;;  %v797_v16 = vadd.f32 %v796_v12, %v7011_v33  ;;  %v1330_v17 = vpack.c.bf16 %v1274_v6, %v1270_v51  ;;  %v6092_v4 = vld [vmem:[%s8937_s2 + $0x144] ss:$8 sps:$4 sm:$0xff]   ;;  %5500 = vmatpush3.bf16.msra.mxu1 %v6135_v42 }
 0x196   : > { %v1106_v18 = vsel %vm978_vm10, %v791_v57, %v1042_v8  ;;  %vm982_vm12 = vcmp.gt.f32.partialorder %v795_v11, 0.0  ;;  %v1046_v19 = vmul.f32 0.2, %v795_v11  ;;  %1871 = vmatpush1.bf16.msra.mxu0 %v6081_v61  ;;  %v1331_v20 = vpack.c.bf16 %v1275_v13, %v1271_v62  ;;  %v6136_v61 = vld [vmem:[%s8938_s3 + $0x68] sm:$0xff]  }
 0x197   : > { %v1192_v22 = vmul.f32 %v7015_v39, %v1106_v18  ;;  %v1107_v23 = vsel %vm979_vm11, %v793_v3, %v1043_v15  ;;  %vm983_vm13 = vcmp.gt.f32.partialorder %v797_v16, 0.0  ;;  %v1047_v24 = vmul.f32 0.2, %v797_v16  ;;  %1872 = vmatprep.subr.bf16.mxu0 %v6086_v5  ;;  %v6090_v15 = vld [vmem:[%s8937_s2 + $0x140] ss:$8 sps:$4 sm:$0xff]   ;;  %5501 = vmatprep.subr.bf16.mxu1 %v6136_v61 }
 0x198   : > { %v1193_v27 = vmul.f32 %v7019_v41, %v1107_v23  ;;  %v1110_v28 = vsel %vm982_vm12, %v795_v11, %v1046_v19  ;;  %1797 = vmatprep.mubr.bf16.mxu0 %v1331_v20  ;;  %v1093_v57 = vsel %vm965_vm9, %v7093_v52, %v1029_v34  ;;  %v7165_v6 = vadd.f32 %v7046_v2, %v1178_v45  ;;  %v6095_v20 = vld [vmem:[%s8937_s2 + $0x154] ss:$8 sps:$4 sm:$0xff]   ;;  %v6098_v61 = vld [vmem:[%s8937_s2 + $0x164] ss:$8 sps:$4 sm:$0xff]  }
 0x199   : > { %v1196_v37 = vmul.f32 %v7015_v39, %v1110_v28  ;;  %v1111_v38 = vsel %vm983_vm13, %v797_v16, %v1047_v24  ;;  %v800_v40 = vpop.f32.mrb[12].mxu0  ;;  %1798 = vmatmul.mubr.bf16.gmra.mrb[36].mxu0 %v1330_v17  ;;  %v1278_v44 = vadd.f32 %v7027_v48, %v1192_v22  ;;  %v7168_v52 = vmul.f32 %v7060_v9, %v1093_v57 }
 0x19a   : > { %v1197_v49 = vmul.f32 %v7019_v41, %v1111_v38  ;;  %v801_v50 = vadd.f32 %v800_v40, %v7008_v32  ;;  %1873 = vmatpush1.bf16.msra.mxu0 %v6084_v21  ;;  %v802_v51 = vpop.f32.mrb[13].mxu0  ;;  %v1279_v56 = vadd.f32 %v7031_v53, %v1193_v27  ;;  %v6137_v21 = vld [vmem:[%s8938_s3 + $0x28] sm:$0xff]   ;;  %v6138_v27 = vld [vmem:[%s8938_s3 + $0x70] sm:$0xff]   ;;  %v888_v34 = vadd.f32 %v7095_v54, %v7036_v59 }
 0x19b   : > { %v803_v62 = vadd.f32 %v802_v51, %v7011_v33  ;;  %v804_v3 = vpop.f32.mrb[14].mxu0  ;;  %1874 = vmatprep.subr.bf16.mxu0 %v6089_v25  ;;  %v1282_v5 = vadd.f32 %v7027_v48, %v1196_v37  ;;  %v7183_v25 = vpop.f32.mrb[8].mxu1  ;;  %v7193_v36 = vadd.f32 %v7106_v63, %v7039_v60  ;;  %v7201_v42 = vadd.f32 %v7127_v26, %v7036_v59  ;;  %v6093_v51 = vld [vmem:[%s8937_s2 + $0x150] ss:$8 sps:$4 sm:$0xff]  }
 0x19c   : > { %vm986_vm14 = vcmp.gt.f32.partialorder %v801_v50, 0.0  ;;  %v1050_v7 = vmul.f32 0.2, %v801_v50  ;;  %v805_v8 = vadd.f32 %v804_v3, %v7008_v32  ;;  %v806_v11 = vpop.f32.mrb[15].mxu0  ;;  %v1283_v12 = vadd.f32 %v7031_v53, %v1197_v49  ;;  %v7195_v37 = vpop.f32.mrb[9].mxu1  ;;  %5502 = vmatpush3.bf16.msra.mxu1 %v6137_v21 }
 0x19d   : > { %vm987_vm15 = vcmp.gt.f32.partialorder %v803_v62, 0.0  ;;  %v1051_v13 = vmul.f32 0.2, %v803_v62  ;;  %v807_v14 = vadd.f32 %v806_v11, %v7011_v33  ;;  %v1334_v16 = vpack.c.bf16 %v1282_v5, %v1278_v44  ;;  %v7203_v49 = vpop.f32.mrb[10].mxu1  ;;  %5503 = vmatprep.subr.bf16.mxu1 %v6138_v27  ;;  %v6101_v21 = vld [vmem:[%s8937_s2 + $0x174] ss:$8 sps:$4 sm:$0xff]  }
 0x19e   : > { %v1114_v17 = vsel %vm986_vm14, %v801_v50, %v1050_v7  ;;  %vm990_vm0 = vcmp.gt.f32.partialorder %v805_v8, 0.0  ;;  %v1054_v18 = vmul.f32 0.2, %v805_v8  ;;  %1875 = vmatpush1.bf16.msra.mxu0 %v6087_v55  ;;  %v1335_v19 = vpack.c.bf16 %v1283_v12, %v1279_v56  ;;  %v7211_v56 = vpop.f32.mrb[11].mxu1 }
 0x19f   : > { %v1200_v22 = vmul.f32 %v7015_v39, %v1114_v17  ;;  %v1115_v23 = vsel %vm987_vm15, %v803_v62, %v1051_v13  ;;  %vm991_vm1 = vcmp.gt.f32.partialorder %v807_v14, 0.0  ;;  %v1055_v24 = vmul.f32 0.2, %v807_v14  ;;  %1876 = vmatprep.subr.bf16.mxu0 %v6092_v4  ;;  %v6096_v17 = vld [vmem:[%s8937_s2 + $0x160] ss:$8 sps:$4 sm:$0xff]  }
 0x1a0   : > { %v1201_v28 = vmul.f32 %v7019_v41, %v1115_v23  ;;  %v1118_v30 = vsel %vm990_vm0, %v805_v8, %v1054_v18  ;;  %1807 = vmatprep.mubr.bf16.mxu0 %v1335_v19  ;;  %vm968_vm2 = vcmp.gt.f32.partialorder %v888_v34, 0.0  ;;  %v1032_v3 = vmul.f32 0.2, %v888_v34 }
 0x1a1   : > { %v1204_v38 = vmul.f32 %v7015_v39, %v1118_v30  ;;  %v1119_v40 = vsel %vm991_vm1, %v807_v14, %v1055_v24  ;;  %v810_v44 = vpop.f32.mrb[16].mxu0  ;;  %1808 = vmatmul.mubr.bf16.gmra.mrb[40].mxu0 %v1334_v16  ;;  %v1286_v45 = vadd.f32 %v7027_v48, %v1200_v22  ;;  %vm969_vm3 = vcmp.gt.f32.partialorder %v7193_v36, 0.0  ;;  %v7229_v22 = vpop.f32.mrb[12].mxu1 }
 0x1a2   : > { %v1205_v54 = vmul.f32 %v7019_v41, %v1119_v40  ;;  %v811_v63 = vadd.f32 %v810_v44, %v7008_v32  ;;  %1877 = vmatpush1.bf16.msra.mxu0 %v6090_v15  ;;  %v812_v50 = vpop.f32.mrb[17].mxu0  ;;  %v1287_v55 = vadd.f32 %v7031_v53, %v1201_v28  ;;  %v1096_v27 = vsel %vm968_vm2, %v888_v34, %v1032_v3  ;;  %v7234_v30 = vpop.f32.mrb[13].mxu1 }
 0x1a3   : > { %v813_v26 = vadd.f32 %v812_v50, %v7011_v33  ;;  %v814_v57 = vpop.f32.mrb[18].mxu0  ;;  %1878 = vmatprep.subr.bf16.mxu0 %v6095_v20  ;;  %v1290_v62 = vadd.f32 %v7027_v48, %v1204_v38  ;;  %v1033_v28 = vmul.f32 0.2, %v7193_v36  ;;  %vm972_vm12 = vcmp.gt.f32.partialorder %v7201_v42, 0.0 }
 0x1a4   : > { %vm994_vm4 = vcmp.gt.f32.partialorder %v811_v63, 0.0  ;;  %v1058_v4 = vmul.f32 0.2, %v811_v63  ;;  %v815_v5 = vadd.f32 %v814_v57, %v7008_v32  ;;  %v816_v7 = vpop.f32.mrb[19].mxu0  ;;  %v1291_v8 = vadd.f32 %v7031_v53, %v1205_v54 }
 0x1a5   : > { %vm995_vm5 = vcmp.gt.f32.partialorder %v813_v26, 0.0  ;;  %v1059_v11 = vmul.f32 0.2, %v813_v26  ;;  %v817_v12 = vadd.f32 %v816_v7, %v7011_v33  ;;  %v1338_v13 = vpack.c.bf16 %v1290_v62, %v1286_v45 }
 0x1a6   : > { %v1122_v14 = vsel %vm994_vm4, %v811_v63, %v1058_v4  ;;  %vm998_vm6 = vcmp.gt.f32.partialorder %v815_v5, 0.0  ;;  %v1062_v15 = vmul.f32 0.2, %v815_v5  ;;  %1879 = vmatpush1.bf16.msra.mxu0 %v6093_v51  ;;  %v1339_v16 = vpack.c.bf16 %v1291_v8, %v1287_v55  ;;  %v7239_v63 = vpop.f32.mrb[14].mxu1  ;;  %v6099_v55 = vld [vmem:[%s8937_s2 + $0x170] ss:$8 sps:$4 sm:$0xff]  }
 0x1a7   : > { %v1208_v18 = vmul.f32 %v7015_v39, %v1122_v14  ;;  %v1123_v19 = vsel %vm995_vm5, %v813_v26, %v1059_v11  ;;  %vm999_vm7 = vcmp.gt.f32.partialorder %v817_v12, 0.0  ;;  %v1063_v20 = vmul.f32 0.2, %v817_v12  ;;  %1880 = vmatprep.subr.bf16.mxu0 %v6098_v61  ;;  %v7250_v61 = vpop.f32.mrb[15].mxu1  ;;  %v6104_v4 = vld [vmem:[%s8937_s2 + $0x184] ss:$8 sps:$4 sm:$0xff]  }
 0x1a8   : > { %v1209_v23 = vmul.f32 %v7019_v41, %v1123_v19  ;;  %v1126_v24 = vsel %vm998_vm6, %v815_v5, %v1062_v15  ;;  %1817 = vmatprep.mubr.bf16.mxu0 %v1339_v16  ;;  %v1182_v54 = vmul.f32 %v7043_v1, %v1096_v27  ;;  %v1097_v57 = vsel %vm969_vm3, %v7193_v36, %v1033_v28  ;;  %v6107_v27 = vld [vmem:[%s8937_s2 + $0x194] ss:$8 sps:$4 sm:$0xff]   ;;  %v7273_v28 = vpop.f32.mrb[16].mxu1 }
 0x1a9   : > { %v1212_v38 = vmul.f32 %v7015_v39, %v1126_v24  ;;  %v1127_v40 = vsel %vm999_vm7, %v817_v12, %v1063_v20  ;;  %v820_v44 = vpop.f32.mrb[20].mxu0  ;;  %1818 = vmatmul.mubr.bf16.gmra.mrb[44].mxu0 %v1338_v13  ;;  %v1294_v45 = vadd.f32 %v7027_v48, %v1208_v18  ;;  %v7261_v8 = vmul.f32 %v7060_v9, %v1097_v57  ;;  %v6102_v20 = vld [vmem:[%s8937_s2 + $0x180] ss:$8 sps:$4 sm:$0xff]  }
 0x1aa   : > { %v1213_v50 = vmul.f32 %v7019_v41, %v1127_v40  ;;  %v821_v51 = vadd.f32 %v820_v44, %v7008_v32  ;;  %1881 = vmatpush1.bf16.msra.mxu0 %v6096_v17  ;;  %v822_v34 = vpop.f32.mrb[21].mxu0  ;;  %v1295_v26 = vadd.f32 %v7031_v53, %v1209_v23  ;;  %v7258_v7 = vadd.f32 %v7046_v2, %v1182_v54 }
 0x1ab   : > { %v823_v62 = vadd.f32 %v822_v34, %v7011_v33  ;;  %v824_v3 = vpop.f32.mrb[22].mxu0  ;;  %1882 = vmatprep.subr.bf16.mxu0 %v6101_v21  ;;  %v1298_v5 = vadd.f32 %v7027_v48, %v1212_v38 }
 0x1ac   : > { %vm1002_vm8 = vcmp.gt.f32.partialorder %v821_v51, 0.0  ;;  %v1066_v36 = vmul.f32 0.2, %v821_v51  ;;  %v825_v11 = vadd.f32 %v824_v3, %v7008_v32  ;;  %v826_v12 = vpop.f32.mrb[23].mxu0  ;;  %v1299_v13 = vadd.f32 %v7031_v53, %v1213_v50 }
 0x1ad   : > { %vm1003_vm9 = vcmp.gt.f32.partialorder %v823_v62, 0.0  ;;  %v1067_v14 = vmul.f32 0.2, %v823_v62  ;;  %v827_v15 = vadd.f32 %v826_v12, %v7011_v33  ;;  %v1342_v16 = vpack.c.bf16 %v1298_v5, %v1294_v45  ;;  %v7279_v45 = vpop.f32.mrb[17].mxu1 }
 0x1ae   : > { %v1130_v17 = vsel %vm1002_vm8, %v821_v51, %v1066_v36  ;;  %vm1006_vm10 = vcmp.gt.f32.partialorder %v825_v11, 0.0  ;;  %v1070_v18 = vmul.f32 0.2, %v825_v11  ;;  %1883 = vmatpush1.bf16.msra.mxu0 %v6099_v55  ;;  %v1343_v19 = vpack.c.bf16 %v1299_v13, %v1295_v26  ;;  %v7284_v26 = vpop.f32.mrb[18].mxu1 }
 0x1af   : > { %v1216_v21 = vmul.f32 %v7015_v39, %v1130_v17  ;;  %v1131_v23 = vsel %vm1003_vm9, %v823_v62, %v1067_v14  ;;  %vm1007_vm11 = vcmp.gt.f32.partialorder %v827_v15, 0.0  ;;  %v1071_v24 = vmul.f32 0.2, %v827_v15  ;;  %1884 = vmatprep.subr.bf16.mxu0 %v6104_v4  ;;  %v6105_v4 = vld [vmem:[%s8937_s2 + $0x190] ss:$8 sps:$4 sm:$0xff]  }
 0x1b0   : > { %v1217_v38 = vmul.f32 %v7019_v41, %v1131_v23  ;;  %v1134_v40 = vsel %vm1006_vm10, %v825_v11, %v1070_v18  ;;  %1827 = vmatprep.mubr.bf16.mxu0 %v1343_v19  ;;  %v1328_v44 = vpack.c.bf16 %v7258_v7, %v7165_v6  ;;  %v1036_v55 = vmul.f32 0.2, %v7201_v42  ;;  %v7294_v11 = vpop.f32.mrb[19].mxu1  ;;  %v6110_v14 = vld [vmem:[%s8937_s2 + $0x1a4] ss:$8 sps:$4 sm:$0xff]  }
 0x1b1   : > { %v1220_v54 = vmul.f32 %v7015_v39, %v1134_v40  ;;  %v1135_v50 = vsel %vm1007_vm11, %v827_v15, %v1071_v24  ;;  %v830_v51 = vpop.f32.mrb[24].mxu0  ;;  %1828 = vmatmul.mubr.bf16.gmra.mrb[48].mxu0 %v1342_v16  ;;  %v1302_v34 = vadd.f32 %v7027_v48, %v1216_v21  ;;  %v896_v36 = vadd.f32 %v7132_v35, %v7039_v60 }
 0x1b2   : > { %v1221_v57 = vmul.f32 %v7019_v41, %v1135_v50  ;;  %v831_v62 = vadd.f32 %v830_v51, %v7008_v32  ;;  %1885 = vmatpush1.bf16.msra.mxu0 %v6102_v20  ;;  %v832_v3 = vpop.f32.mrb[25].mxu0  ;;  %v1303_v5 = vadd.f32 %v7031_v53, %v1217_v38  ;;  %v1100_v16 = vsel %vm972_vm12, %v7201_v42, %v1036_v55  ;;  %v6113_v51 = vld [vmem:[%s8937_s2 + $0x1b4] ss:$8 sps:$4 sm:$0xff]  }
 0x1b3   : > { %v833_v12 = vadd.f32 %v832_v3, %v7011_v33  ;;  %v834_v13 = vpop.f32.mrb[26].mxu0  ;;  %1886 = vmatprep.subr.bf16.mxu0 %v6107_v27  ;;  %v1306_v15 = vadd.f32 %v7027_v48, %v1220_v54  ;;  %v7306_v17 = vadd.f32 %v7140_v46, %v7036_v59  ;;  %v6108_v46 = vld [vmem:[%s8937_s2 + $0x1a0] ss:$8 sps:$4 sm:$0xff]   ;;  %vm973_vm1 = vcmp.gt.f32.partialorder %v896_v36, 0.0 }
 0x1b4   : > { %vm1010_vm13 = vcmp.gt.f32.partialorder %v831_v62, 0.0  ;;  %v1074_v35 = vmul.f32 0.2, %v831_v62  ;;  %v835_v18 = vadd.f32 %v834_v13, %v7008_v32  ;;  %v836_v19 = vpop.f32.mrb[27].mxu0  ;;  %v1307_v20 = vadd.f32 %v7031_v53, %v1221_v57 }
 0x1b5   : > { %vm1011_vm14 = vcmp.gt.f32.partialorder %v833_v12, 0.0  ;;  %v1075_v21 = vmul.f32 0.2, %v833_v12  ;;  %v837_v23 = vadd.f32 %v836_v19, %v7011_v33  ;;  %v1346_v24 = vpack.c.bf16 %v1306_v15, %v1302_v34  ;;  %v7318_v34 = vpop.f32.mrb[20].mxu1  ;;  %v6111_v19 = vld [vmem:[%s8937_s2 + $0x1b0] ss:$8 sps:$4 sm:$0xff]  }
 0x1b6   : > { %v1138_v27 = vsel %vm1010_vm13, %v831_v62, %v1074_v35  ;;  %vm1014_vm15 = vcmp.gt.f32.partialorder %v835_v18, 0.0  ;;  %v1078_v38 = vmul.f32 0.2, %v835_v18  ;;  %1887 = vmatpush1.bf16.msra.mxu0 %v6105_v4  ;;  %v1347_v42 = vpack.c.bf16 %v1307_v20, %v1303_v5  ;;  %v7324_v3 = vpop.f32.mrb[21].mxu1 }
 0x1b7   : > { %v1224_v40 = vmul.f32 %v7015_v39, %v1138_v27  ;;  %v1139_v54 = vsel %vm1011_vm14, %v833_v12, %v1075_v21  ;;  %vm1015_vm0 = vcmp.gt.f32.partialorder %v837_v23, 0.0  ;;  %v1079_v50 = vmul.f32 0.2, %v837_v23  ;;  %1888 = vmatprep.subr.bf16.mxu0 %v6110_v14  ;;  %v7328_v15 = vpop.f32.mrb[22].mxu1  ;;  %v6116_v27 = vld [vmem:[%s8937_s2 + $0x1c4] ss:$8 sps:$4 sm:$0xff]  }
 0x1b8   : > { %v1225_v55 = vmul.f32 %v7019_v41, %v1139_v54  ;;  %v1142_v57 = vsel %vm1014_vm15, %v835_v18, %v1078_v38  ;;  %1837 = vmatprep.mubr.bf16.mxu0 %v1347_v42  ;;  %v7322_v62 = vmul.f32 %v7043_v1, %v1100_v16  ;;  %v1037_v14 = vmul.f32 0.2, %v896_v36  ;;  %v7337_v21 = vpop.f32.mrb[23].mxu1 }
 0x1b9   : > { %v1228_v4 = vmul.f32 %v7015_v39, %v1142_v57  ;;  %v1143_v5 = vsel %vm1015_vm0, %v837_v23, %v1079_v50  ;;  %v840_v12 = vpop.f32.mrb[28].mxu0  ;;  %1838 = vmatmul.mubr.bf16.gmra.mrb[52].mxu0 %v1346_v24  ;;  %v1310_v13 = vadd.f32 %v7027_v48, %v1224_v40  ;;  %vm976_vm2 = vcmp.gt.f32.partialorder %v7306_v17, 0.0 }
 0x1ba   : > { %v1229_v35 = vmul.f32 %v7019_v41, %v1143_v5  ;;  %v841_v18 = vadd.f32 %v840_v12, %v7008_v32  ;;  %1889 = vmatpush1.bf16.msra.mxu0 %v6108_v46  ;;  %v842_v16 = vpop.f32.mrb[29].mxu0  ;;  %v1311_v20 = vadd.f32 %v7031_v53, %v1225_v55  ;;  %v1101_v42 = vsel %vm973_vm1, %v896_v36, %v1037_v14  ;;  %v6114_v36 = vld [vmem:[%s8937_s2 + $0x1c0] ss:$8 sps:$4 sm:$0xff]  }
 0x1bb   : > { %v843_v23 = vadd.f32 %v842_v16, %v7011_v33  ;;  %v844_v24 = vpop.f32.mrb[30].mxu0  ;;  %1890 = vmatprep.subr.bf16.mxu0 %v6113_v51  ;;  %v1314_v38 = vadd.f32 %v7027_v48, %v1228_v4  ;;  %v1040_v46 = vmul.f32 0.2, %v7306_v17  ;;  %v930_v6 = vadd.f32 %v7294_v11, %v7039_v60 }
 0x1bc   : > { %vm1018_vm3 = vcmp.gt.f32.partialorder %v841_v18, 0.0  ;;  %v1082_v40 = vmul.f32 0.2, %v841_v18  ;;  %v845_v54 = vadd.f32 %v844_v24, %v7008_v32  ;;  %v846_v50 = vpop.f32.mrb[31].mxu0  ;;  %v1315_v55 = vadd.f32 %v7031_v53, %v1229_v35 }
 0x1bd   : > { %vm1019_vm4 = vcmp.gt.f32.partialorder %v843_v23, 0.0  ;;  %v1083_v57 = vmul.f32 0.2, %v843_v23  ;;  %v847_v51 = vadd.f32 %v846_v50, %v7011_v33  ;;  %v1350_v5 = vpack.c.bf16 %v1314_v38, %v1310_v13  ;;  %v6119_v33 = vld [vmem:[%s8937_s2 + $0x1d4] ss:$8 sps:$4 sm:$0xff]   ;;  %v7356_v13 = vpop.f32.mrb[24].mxu1 }
 0x1be   : > { %v1146_v12 = vsel %vm1018_vm3, %v841_v18, %v1082_v40  ;;  %vm1022_vm5 = vcmp.gt.f32.partialorder %v845_v54, 0.0  ;;  %v1086_v16 = vmul.f32 0.2, %v845_v54  ;;  %1891 = vmatpush1.bf16.msra.mxu0 %v6111_v19  ;;  %v1351_v4 = vpack.c.bf16 %v1315_v55, %v1311_v20 }
 0x1bf   : > { %v1232_v14 = vmul.f32 %v7015_v39, %v1146_v12  ;;  %v1147_v32 = vsel %vm1019_vm4, %v843_v23, %v1083_v57  ;;  %vm1023_vm6 = vcmp.gt.f32.partialorder %v847_v51, 0.0  ;;  %v1087_v24 = vmul.f32 0.2, %v847_v51  ;;  %1892 = vmatprep.subr.bf16.mxu0 %v6116_v27  ;;  %v7363_v23 = vpop.f32.mrb[25].mxu1 }
 0x1c0   : > { %v1233_v35 = vmul.f32 %v7019_v41, %v1147_v32  ;;  %v1150_v18 = vsel %vm1022_vm5, %v845_v54, %v1086_v16  ;;  %1847 = vmatprep.mubr.bf16.mxu0 %v1351_v4  ;;  %v1187_v19 = vmul.f32 %v7060_v9, %v1101_v42  ;;  %v1104_v20 = vsel %vm976_vm2, %v7306_v17, %v1040_v46  ;;  %v7371_v54 = vpop.f32.mrb[26].mxu1  ;;  %v6117_v17 = vld [vmem:[%s8937_s2 + $0x1d0] ss:$8 sps:$4 sm:$0xff]  }
 0x1c1   : > { %v1236_v27 = vmul.f32 %v7015_v39, %v1150_v18  ;;  %v1151_v38 = vsel %vm1023_vm6, %v847_v51, %v1087_v24  ;;  %1848 = vmatmul.mubr.bf16.gmra.mrb[56].mxu0 %v1350_v5  ;;  %v7367_v40 = vmul.f32 %v7043_v1, %v1104_v20  ;;  %v900_v50 = vadd.f32 %v7154_v58, %v7039_v60  ;;  %v7381_v57 = vpop.f32.mrb[27].mxu1 }
 0x1c2   : > { %v1237_v42 = vmul.f32 %v7019_v41, %v1151_v38  ;;  %1893 = vmatpush1.bf16.msra.mxu0 %v6114_v36  ;;  %v1319_v46 = vadd.f32 %v7031_v53, %v1233_v35  ;;  %v1318_v39 = vadd.f32 %v7027_v48, %v1232_v14  ;;  %v1265_v55 = vadd.f32 %v7063_v10, %v7168_v52  ;;  %v6122_v41 = vld [vmem:[%s8937_s2 + $0x1e4] ss:$8 sps:$4 sm:$0xff]   ;;  %v6120_v14 = vld [vmem:[%s8937_s2 + $0x1e0] ss:$8 sps:$4 sm:$0xff]   ;;  %v7406_v20 = vpop.f32.mrb[28].mxu1 }
 0x1c3   : > { %1894 = vmatprep.subr.bf16.mxu0 %v6119_v33  ;;  %vm977_vm7 = vcmp.gt.f32.partialorder %v900_v50, 0.0  ;;  %v1041_v58 = vmul.f32 0.2, %v900_v50  ;;  %v1322_v51 = vadd.f32 %v7027_v48, %v1236_v27  ;;  %v1269_v5 = vadd.f32 %v7063_v10, %v7261_v8 }
 0x1c4   : > { %v1323_v12 = vadd.f32 %v7031_v53, %v1237_v42  ;;  %v904_v16 = vadd.f32 %v7183_v25, %v7036_v59  ;;  %v906_v52 = vadd.f32 %v7195_v37, %v7039_v60  ;;  %v908_v4 = vadd.f32 %v7203_v49, %v7036_v59  ;;  %v6125_v37 = vld [vmem:[%s8937_s2 + $0x1f4] ss:$8 sps:$4 sm:$0xff]  }
 0x1c5   : > { %v1105_v36 = vsel %vm977_vm7, %v900_v50, %v1041_v58  ;;  %v1354_v48 = vpack.c.bf16 %v1322_v51, %v1318_v39  ;;  %v1329_v32 = vpack.c.bf16 %v1269_v5, %v1265_v55  ;;  %v910_v8 = vadd.f32 %v7211_v56, %v7039_v60 }
 0x1c6   : > { %1895 = vmatpush1.bf16.msra.mxu0 %v6117_v17  ;;  %v1191_v53 = vmul.f32 %v7060_v9, %v1105_v36  ;;  %v1355_v25 = vpack.c.bf16 %v1323_v12, %v1319_v46  ;;  %vm980_vm8 = vcmp.gt.f32.partialorder %v904_v16, 0.0  ;;  %v1044_v24 = vmul.f32 0.2, %v904_v16  ;;  %v7410_v17 = vpop.f32.mrb[29].mxu1  ;;  %v6123_v46 = vld [vmem:[%s8937_s2 + $0x1f0] ss:$8 sps:$4 sm:$0xff]  }
 0x1c7   : > { %1896 = vmatprep.subr.bf16.mxu0 %v6122_v41  ;;  %vm981_vm9 = vcmp.gt.f32.partialorder %v906_v52, 0.0  ;;  %v1045_v49 = vmul.f32 0.2, %v906_v52  ;;  %vm984_vm10 = vcmp.gt.f32.partialorder %v908_v4, 0.0  ;;  %v1048_v33 = vmul.f32 0.2, %v908_v4 }
 0x1c8   : > { %1857 = vmatprep.mubr.bf16.mxu0 %v1355_v25  ;;  %v1108_v35 = vsel %vm980_vm8, %v904_v16, %v1044_v24  ;;  %vm985_vm11 = vcmp.gt.f32.partialorder %v910_v8, 0.0  ;;  %v1049_v18 = vmul.f32 0.2, %v910_v8  ;;  %v1273_v56 = vadd.f32 %v7063_v10, %v1187_v19  ;;  %v7417_v58 = vpop.f32.mrb[30].mxu1 }
 0x1c9   : > { %1858 = vmatmul.mubr.bf16.gmra.mrb[60].mxu0 %v1354_v48  ;;  %v1194_v27 = vmul.f32 %v7043_v1, %v1108_v35  ;;  %v1109_v38 = vsel %vm981_vm9, %v906_v52, %v1045_v49  ;;  %v1112_v50 = vsel %vm984_vm10, %v908_v4, %v1048_v33  ;;  %v1277_v42 = vadd.f32 %v7063_v10, %v1191_v53  ;;  %v7424_v16 = vpop.f32.mrb[31].mxu1 }
 0x1ca   : > { %1897 = vmatpush1.bf16.msra.mxu0 %v6120_v14  ;;  %1900 = vmatprep.mubr.bf16.mxu0 %v1329_v32  ;;  %v1195_v39 = vmul.f32 %v7060_v9, %v1109_v38  ;;  %v1198_v19 = vmul.f32 %v7043_v1, %v1112_v50  ;;  %v1113_v55 = vsel %vm985_vm11, %v910_v8, %v1049_v18  ;;  %vm1001_vm3 = vcmp.gt.f32.partialorder %v930_v6, 0.0 }
 0x1cb   : > { %1898 = vmatprep.subr.bf16.mxu0 %v6125_v37  ;;  %v1199_v41 = vmul.f32 %v7060_v9, %v1113_v55  ;;  %v1333_v51 = vpack.c.bf16 %v1277_v42, %v1273_v56  ;;  %v914_v5 = vadd.f32 %v7229_v22, %v7036_v59  ;;  %v916_v12 = vadd.f32 %v7234_v30, %v7039_v60 }
 0x1cc   : > { %v918_v52 = vadd.f32 %v7239_v63, %v7036_v59  ;;  %v920_v4 = vadd.f32 %v7250_v61, %v7039_v60  ;;  %v1272_v36 = vadd.f32 %v7046_v2, %v7322_v62  ;;  %v1276_v14 = vadd.f32 %v7046_v2, %v7367_v40 }
 0x1cd   : > { %vm988_vm12 = vcmp.gt.f32.partialorder %v914_v5, 0.0  ;;  %v1052_v48 = vmul.f32 0.2, %v914_v5  ;;  %vm989_vm13 = vcmp.gt.f32.partialorder %v916_v12, 0.0  ;;  %v1053_v22 = vmul.f32 0.2, %v916_v12 }
 0x1ce   : > { %1899 = vmatpush1.bf16.msra.mxu0 %v6123_v46  ;;  %vm992_vm14 = vcmp.gt.f32.partialorder %v918_v52, 0.0  ;;  %v1056_v30 = vmul.f32 0.2, %v918_v52  ;;  %vm993_vm15 = vcmp.gt.f32.partialorder %v920_v4, 0.0  ;;  %v1057_v32 = vmul.f32 0.2, %v920_v4 }
 0x1cf   : > { %v1116_v8 = vsel %vm988_vm12, %v914_v5, %v1052_v48  ;;  %v1117_v63 = vsel %vm989_vm13, %v916_v12, %v1053_v22  ;;  %v1332_v53 = vpack.c.bf16 %v1276_v14, %v1272_v36  ;;  %v1281_v61 = vadd.f32 %v7063_v10, %v1195_v39 }
 0x1d0   : > { %v1202_v25 = vmul.f32 %v7043_v1, %v1116_v8  ;;  %v1203_v62 = vmul.f32 %v7060_v9, %v1117_v63  ;;  %v1120_v24 = vsel %vm992_vm14, %v918_v52, %v1056_v30  ;;  %v1121_v40 = vsel %vm993_vm15, %v920_v4, %v1057_v32 }
 0x1d1   : > { %1901 = vmatmul.mubr.bf16.vlgmr.msra.gmra.mrb[32].mxu0 %v1328_v44  ;;  %v1206_v37 = vmul.f32 %v7043_v1, %v1120_v24  ;;  %v1207_v49 = vmul.f32 %v7060_v9, %v1121_v40  ;;  %v1285_v33 = vadd.f32 %v7063_v10, %v1199_v41  ;;  %v924_v35 = vadd.f32 %v7273_v28, %v7036_v59 }
 0x1d2   : > { %1910 = vmatprep.mubr.bf16.mxu0 %v1333_v51  ;;  %v926_v18 = vadd.f32 %v7279_v45, %v7039_v60  ;;  %v928_v56 = vadd.f32 %v7284_v26, %v7036_v59  ;;  %v1280_v7 = vadd.f32 %v7046_v2, %v1194_v27  ;;  %v1284_v50 = vadd.f32 %v7046_v2, %v1198_v19 }
 0x1d3   : > { %v1337_v44 = vpack.c.bf16 %v1285_v33, %v1281_v61  ;;  %vm996_vm0 = vcmp.gt.f32.partialorder %v924_v35, 0.0  ;;  %v1060_v38 = vmul.f32 0.2, %v924_v35  ;;  %v1065_v45 = vmul.f32 0.2, %v930_v6 }
 0x1d4   : > { %vm997_vm1 = vcmp.gt.f32.partialorder %v926_v18, 0.0  ;;  %v1061_v42 = vmul.f32 0.2, %v926_v18  ;;  %vm1000_vm2 = vcmp.gt.f32.partialorder %v928_v56, 0.0  ;;  %v1064_v28 = vmul.f32 0.2, %v928_v56 }
 0x1d5   : > { %v1124_v46 = vsel %vm996_vm0, %v924_v35, %v1060_v38  ;;  %v1336_v39 = vpack.c.bf16 %v1284_v50, %v1280_v7  ;;  %v1289_v11 = vadd.f32 %v7063_v10, %v1203_v62  ;;  %v1129_v5 = vsel %vm1001_vm3, %v930_v6, %v1065_v45 }
 0x1d6   : > { %v1210_v26 = vmul.f32 %v7043_v1, %v1124_v46  ;;  %v1125_v55 = vsel %vm997_vm1, %v926_v18, %v1061_v42  ;;  %v1128_v41 = vsel %vm1000_vm2, %v928_v56, %v1064_v28  ;;  %v1293_v19 = vadd.f32 %v7063_v10, %v1207_v49 }
 0x1d7   : > { %v1211_v27 = vmul.f32 %v7060_v9, %v1125_v55  ;;  %v1214_v51 = vmul.f32 %v7043_v1, %v1128_v41  ;;  %v1215_v12 = vmul.f32 %v7060_v9, %v1129_v5  ;;  %v934_v52 = vadd.f32 %v7318_v34, %v7036_v59 }
 0x1d8   : > { %v936_v4 = vadd.f32 %v7324_v3, %v7039_v60  ;;  %v938_v36 = vadd.f32 %v7328_v15, %v7036_v59  ;;  %v1341_v14 = vpack.c.bf16 %v1293_v19, %v1289_v11  ;;  %v940_v48 = vadd.f32 %v7337_v21, %v7039_v60 }
 0x1d9   : > { %1911 = vmatmul.mubr.bf16.gmra.mrb[36].mxu0 %v1332_v53  ;;  %v7468_v22 = vadd.f32 %v7046_v2, %v1202_v25  ;;  %v7471_v30 = vadd.f32 %v7046_v2, %v1206_v37  ;;  %vm1004_vm4 = vcmp.gt.f32.partialorder %v934_v52, 0.0  ;;  %v1068_v34 = vmul.f32 0.2, %v934_v52 }
 0x1da   : > { %1920 = vmatprep.mubr.bf16.mxu0 %v1337_v44  ;;  %vm1005_vm5 = vcmp.gt.f32.partialorder %v936_v4, 0.0  ;;  %v1069_v32 = vmul.f32 0.2, %v936_v4  ;;  %vm1008_vm6 = vcmp.gt.f32.partialorder %v938_v36, 0.0  ;;  %v1072_v3 = vmul.f32 0.2, %v938_v36 }
 0x1db   : > { %vm1009_vm7 = vcmp.gt.f32.partialorder %v940_v48, 0.0  ;;  %v1073_v15 = vmul.f32 0.2, %v940_v48  ;;  %v1132_v8 = vsel %vm1004_vm4, %v934_v52, %v1068_v34  ;;  %v1340_v21 = vpack.c.bf16 %v7471_v30, %v7468_v22 }
 0x1dc   : > { %v1133_v63 = vsel %vm1005_vm5, %v936_v4, %v1069_v32  ;;  %v1297_v53 = vadd.f32 %v7063_v10, %v1211_v27  ;;  %v1218_v61 = vmul.f32 %v7043_v1, %v1132_v8  ;;  %v1136_v62 = vsel %vm1008_vm6, %v938_v36, %v1072_v3 }
 0x1dd   : > { %v1219_v25 = vmul.f32 %v7060_v9, %v1133_v63  ;;  %v1137_v24 = vsel %vm1009_vm7, %v940_v48, %v1073_v15  ;;  %v1222_v40 = vmul.f32 %v7043_v1, %v1136_v62  ;;  %v1301_v49 = vadd.f32 %v7063_v10, %v1215_v12 }
 0x1de   : > { %v1223_v37 = vmul.f32 %v7060_v9, %v1137_v24  ;;  %v944_v33 = vadd.f32 %v7356_v13, %v7036_v59  ;;  %v946_v35 = vadd.f32 %v7363_v23, %v7039_v60  ;;  %v948_v18 = vadd.f32 %v7371_v54, %v7036_v59 }
 0x1df   : > { %v950_v56 = vadd.f32 %v7381_v57, %v7039_v60  ;;  %v1296_v6 = vadd.f32 %v7046_v2, %v1210_v26  ;;  %v1345_v7 = vpack.c.bf16 %v1301_v49, %v1297_v53  ;;  %v1300_v38 = vadd.f32 %v7046_v2, %v1214_v51  ;;  %v5262_v49 = vld [vmem:[%s8945_s10 + $0x1] ss:$8 sm:$0x3] }
 0x1e0   : > { %vm1012_vm8 = vcmp.gt.f32.partialorder %v944_v33, 0.0  ;;  %v1076_v44 = vmul.f32 0.2, %v944_v33  ;;  %vm1013_vm9 = vcmp.gt.f32.partialorder %v946_v35, 0.0  ;;  %v1077_v50 = vmul.f32 0.2, %v946_v35 }
 0x1e1   : > { %1921 = vmatmul.mubr.bf16.gmra.mrb[40].mxu0 %v1336_v39  ;;  %vm1016_vm10 = vcmp.gt.f32.partialorder %v948_v18, 0.0  ;;  %v1080_v13 = vmul.f32 0.2, %v948_v18  ;;  %vm1017_vm11 = vcmp.gt.f32.partialorder %v950_v56, 0.0  ;;  %v1081_v42 = vmul.f32 0.2, %v950_v56 }
 0x1e2   : > { %1930 = vmatprep.mubr.bf16.mxu0 %v1341_v14  ;;  %v1140_v23 = vsel %vm1012_vm8, %v944_v33, %v1076_v44  ;;  %v1344_v54 = vpack.c.bf16 %v1300_v38, %v1296_v6  ;;  %v1141_v57 = vsel %vm1013_vm9, %v946_v35, %v1077_v50  ;;  %v1305_v45 = vadd.f32 %v7063_v10, %v1219_v25 }
 0x1e3   : > { %v1226_v28 = vmul.f32 %v7043_v1, %v1140_v23  ;;  %v1144_v46 = vsel %vm1016_vm10, %v948_v18, %v1080_v13  ;;  %v1227_v26 = vmul.f32 %v7060_v9, %v1141_v57  ;;  %v1145_v39 = vsel %vm1017_vm11, %v950_v56, %v1081_v42  ;;  %v2078_v18 = vld [vmem:[#allocation7 + $0x1] ss:$8 sm:$0x3] }
 0x1e4   : > { %v1230_v55 = vmul.f32 %v7043_v1, %v1144_v46  ;;  %v1309_v41 = vadd.f32 %v7063_v10, %v1223_v37  ;;  %v1231_v11 = vmul.f32 %v7060_v9, %v1145_v39  ;;  %v954_v27 = vadd.f32 %v7406_v20, %v7036_v59  ;;  %v7532_v37 = vld [vmem:[%s8939_s4] sm:$0xff]  }
 0x1e5   : > { %v956_v51 = vadd.f32 %v7410_v17, %v7039_v60  ;;  %v958_v5 = vadd.f32 %v7417_v58, %v7036_v59  ;;  %v960_v12 = vadd.f32 %v7424_v16, %v7039_v60  ;;  %v1304_v52 = vadd.f32 %v7046_v2, %v1218_v61 }
 0x1e6   : > { %v1349_v19 = vpack.c.bf16 %v1309_v41, %v1305_v45  ;;  %v1308_v4 = vadd.f32 %v7046_v2, %v1222_v40  ;;  %vm1020_vm12 = vcmp.gt.f32.partialorder %v954_v27, 0.0  ;;  %v1084_v36 = vmul.f32 0.2, %v954_v27 }
 0x1e7   : > { %vm1021_vm13 = vcmp.gt.f32.partialorder %v956_v51, 0.0  ;;  %v1085_v14 = vmul.f32 0.2, %v956_v51  ;;  %vm1024_vm14 = vcmp.gt.f32.partialorder %v958_v5, 0.0  ;;  %v1088_v20 = vmul.f32 0.2, %v958_v5 }
 0x1e8   : > { %vm1025_vm15 = vcmp.gt.f32.partialorder %v960_v12, 0.0  ;;  %v1089_v48 = vmul.f32 0.2, %v960_v12  ;;  %v1148_v17 = vsel %vm1020_vm12, %v954_v27, %v1084_v36  ;;  %v1348_v59 = vpack.c.bf16 %v1308_v4, %v1304_v52 }
 0x1e9   : > { %1931 = vmatmul.mubr.bf16.gmra.mrb[44].mxu0 %v1340_v21  ;;  %v1149_v22 = vsel %vm1021_vm13, %v956_v51, %v1085_v14  ;;  %v1313_v58 = vadd.f32 %v7063_v10, %v1227_v26  ;;  %v1234_v60 = vmul.f32 %v7043_v1, %v1148_v17  ;;  %v1152_v30 = vsel %vm1024_vm14, %v958_v5, %v1088_v20 }
 0x1ea   : > { %1940 = vmatprep.mubr.bf16.mxu0 %v1345_v7  ;;  %v1235_v16 = vmul.f32 %v7060_v9, %v1149_v22  ;;  %v1153_v34 = vsel %vm1025_vm15, %v960_v12, %v1089_v48  ;;  %v1238_v32 = vmul.f32 %v7043_v1, %v1152_v30  ;;  %v1317_v15 = vadd.f32 %v7063_v10, %v1231_v11  ;;  %v2123_v7 = vld [vmem:[#allocation8 + $0x1] ss:$8 sm:$0x3] }
 0x1eb   : > { %v1239_v3 = vmul.f32 %v7060_v9, %v1153_v34  ;;  %v1312_v8 = vadd.f32 %v7046_v2, %v1226_v28  ;;  %v1316_v63 = vadd.f32 %v7046_v2, %v1230_v55  ;;  %v1320_v53 = vadd.f32 %v7046_v2, %v1234_v60  ;;  %v6139_v9 = vld [vmem:[%s8938_s3 + $0x30] sm:$0xff]  }
 0x1ec   : > { %v1321_v21 = vadd.f32 %v7063_v10, %v1235_v16  ;;  %v1353_v61 = vpack.c.bf16 %v1317_v15, %v1313_v58  ;;  %v1324_v62 = vadd.f32 %v7046_v2, %v1238_v32  ;;  %5504 = vmatpush3.bf16.msra.mxu1 %v6139_v9  ;;  %v6140_v2 = vld [vmem:[%s8938_s3 + $0x78] sm:$0xff]   ;;  %v7539_v33 = vrot.slane %v5262_v49, %v7000_v29 }
 0x1ed   : > { %v1325_v25 = vadd.f32 %v7063_v10, %v1239_v3  ;;  %v1352_v24 = vpack.c.bf16 %v1316_v63, %v1312_v8  ;;  %v6141_v10 = vld [vmem:[%s8938_s3 + $0x38] sm:$0xff]   ;;  %5505 = vmatprep.subr.bf16.mxu1 %v6140_v2  ;;  %v7542_v35 = vrot.slane %v5262_v49, %v7005_v31  ;;  %v7546_v38 = vrot.slane %v2078_v18, %v7000_v29 }
 0x1ee   : > { %v1356_v1 = vpack.c.bf16 %v1324_v62, %v1320_v53  ;;  %v7550_v42 = vrot.slane %v2078_v18, %v7005_v31  ;;  %v7554_v57 = vrot.slane %v2123_v7, %v7000_v29  ;;  %v7558_v39 = vrot.slane %v2123_v7, %v7005_v31 }
 0x1ef   : > { %v1357_v40 = vpack.c.bf16 %v1325_v25, %v1321_v21  ;;  %v6143_v25 = vld [vmem:[%s8939_s4 + $0x8] sm:$0xff]  }
 0x1f0   : > { %5506 = vmatpush3.bf16.msra.mxu1 %v6141_v10 }
 0x1f1   : > { %1941 = vmatmul.mubr.bf16.gmra.mrb[48].mxu0 %v1344_v54  ;;  %5663 = vmatprep.subr.bf16.mxu1 %v7532_v37 }
 0x1f2   : > { %1950 = vmatprep.mubr.bf16.mxu0 %v1349_v19 }
 0x1f9   : > { %1951 = vmatmul.mubr.bf16.gmra.mrb[52].mxu0 %v1348_v59 }
 0x1fa   : > { %1960 = vmatprep.mubr.bf16.mxu0 %v1353_v61 }
 0x201   : > { %1961 = vmatmul.mubr.bf16.gmra.mrb[56].mxu0 %v1352_v24 }
 0x202   : > { %1970 = vmatprep.mubr.bf16.mxu0 %v1357_v40 }
 0x209   : > { %1971 = vmatmul.mubr.bf16.gmra.mrb[60].mxu0 %v1356_v1 }
 0x20a   : > { %3040 = vmatprep.mubr.bf16.mxu0 %v6526_v0 }
 0x2a4   : > { %v1902_v56 = vpop.f32.mrb[32].mxu0 }
 0x2a5   : > { %v5767_v6 = vadd.f32 %v1902_v56, %v7539_v33  ;;  %v1904_v44 = vpop.f32.mrb[33].mxu0 }
 0x2a6   : > { %v5768_v50 = vadd.f32 %v1904_v44, %v7542_v35  ;;  %v1906_v13 = vpop.f32.mrb[34].mxu0 }
 0x2a7   : > { %vm1981_vm0 = vcmp.gt.f32.partialorder %v5767_v6, 0.0  ;;  %v2013_v23 = vmul.f32 0.2, %v5767_v6  ;;  %v5769_v54 = vadd.f32 %v1906_v13, %v7539_v33  ;;  %v1908_v28 = vpop.f32.mrb[35].mxu0 }
 0x2a8   : > { %vm1982_vm1 = vcmp.gt.f32.partialorder %v5768_v50, 0.0  ;;  %v2014_v46 = vmul.f32 0.2, %v5768_v50  ;;  %v5770_v45 = vadd.f32 %v1908_v28, %v7542_v35 }
 0x2a9   : > { %v2045_v26 = vsel %vm1981_vm0, %v5767_v6, %v2013_v23  ;;  %vm1983_vm2 = vcmp.gt.f32.partialorder %v5769_v54, 0.0  ;;  %v2015_v55 = vmul.f32 0.2, %v5769_v54 }
 0x2aa   : > { %v2090_v41 = vmul.f32 %v7546_v38, %v2045_v26  ;;  %v2046_v11 = vsel %vm1982_vm1, %v5768_v50, %v2014_v46  ;;  %vm1984_vm3 = vcmp.gt.f32.partialorder %v5770_v45, 0.0  ;;  %v2016_v27 = vmul.f32 0.2, %v5770_v45  ;;  %v6144_v50 = vld [vmem:[%s8939_s4 + $0x10] sm:$0xff]  }
 0x2ab   : > { %v2091_v51 = vmul.f32 %v7550_v42, %v2046_v11  ;;  %v2047_v5 = vsel %vm1983_vm2, %v5769_v54, %v2015_v55 }
 0x2ac   : > { %v2092_v19 = vmul.f32 %v7546_v38, %v2047_v5  ;;  %v2048_v12 = vsel %vm1984_vm3, %v5770_v45, %v2016_v27  ;;  %v1912_v52 = vpop.f32.mrb[36].mxu0  ;;  %v2135_v20 = vadd.f32 %v7554_v57, %v2090_v41  ;;  %v6145_v5 = vld [vmem:[%s8939_s4 + $0x18] sm:$0xff]  }
 0x2ad   : > { %v2093_v4 = vmul.f32 %v7550_v42, %v2048_v12  ;;  %v5771_v36 = vadd.f32 %v1912_v52, %v7539_v33  ;;  %v1914_v14 = vpop.f32.mrb[37].mxu0  ;;  %v2136_v59 = vadd.f32 %v7558_v39, %v2091_v51 }
 0x2ae   : > { %v2137_v48 = vadd.f32 %v7554_v57, %v2092_v19  ;;  %v5772_v17 = vadd.f32 %v1914_v14, %v7542_v35  ;;  %v1916_v22 = vpop.f32.mrb[38].mxu0 }
 0x2af   : > { %vm1985_vm4 = vcmp.gt.f32.partialorder %v5771_v36, 0.0  ;;  %v2017_v58 = vmul.f32 0.2, %v5771_v36  ;;  %v5773_v60 = vadd.f32 %v1916_v22, %v7539_v33  ;;  %v1918_v16 = vpop.f32.mrb[39].mxu0  ;;  %v2138_v30 = vadd.f32 %v7558_v39, %v2093_v4 }
 0x2b0   : > { %v2167_v34 = vpack.c.bf16 %v2137_v48, %v2135_v20  ;;  %vm1986_vm5 = vcmp.gt.f32.partialorder %v5772_v17, 0.0  ;;  %v2018_v32 = vmul.f32 0.2, %v5772_v17  ;;  %v5774_v3 = vadd.f32 %v1918_v16, %v7542_v35  ;;  %v6146_v16 = vld [vmem:[%s8939_s4 + $0x20] sm:$0xff]  }
 0x2b1   : > { %v2049_v15 = vsel %vm1985_vm4, %v5771_v36, %v2017_v58  ;;  %vm1987_vm6 = vcmp.gt.f32.partialorder %v5773_v60, 0.0  ;;  %v2019_v8 = vmul.f32 0.2, %v5773_v60  ;;  %v2168_v63 = vpack.c.bf16 %v2138_v30, %v2136_v59 }
 0x2b2   : > { %v2094_v21 = vmul.f32 %v7546_v38, %v2049_v15  ;;  %v2050_v53 = vsel %vm1986_vm5, %v5772_v17, %v2018_v32  ;;  %vm1988_vm7 = vcmp.gt.f32.partialorder %v5774_v3, 0.0  ;;  %v2020_v61 = vmul.f32 0.2, %v5774_v3 }
 0x2b3   : > { %v2095_v62 = vmul.f32 %v7550_v42, %v2050_v53  ;;  %v2051_v24 = vsel %vm1987_vm6, %v5773_v60, %v2019_v8  ;;  %2344 = vmatprep.mubr.bf16.mxu1 %v2168_v63 }
 0x2b4   : > { %v2096_v40 = vmul.f32 %v7546_v38, %v2051_v24  ;;  %v2052_v1 = vsel %vm1988_vm7, %v5774_v3, %v2020_v61  ;;  %v1922_v9 = vpop.f32.mrb[40].mxu0  ;;  %2345 = vmatmul.mubr.bf16.vlgmr.msra.gmra.mrb[32].mxu1 %v2167_v34  ;;  %v2139_v7 = vadd.f32 %v7554_v57, %v2094_v21 }
 0x2b5   : > { %v2097_v2 = vmul.f32 %v7550_v42, %v2052_v1  ;;  %v5775_v10 = vadd.f32 %v1922_v9, %v7539_v33  ;;  %v1924_v49 = vpop.f32.mrb[41].mxu0  ;;  %5664 = vmatpush3.bf16.msra.mxu1 %v7532_v37  ;;  %v2140_v6 = vadd.f32 %v7558_v39, %v2095_v62 }
 0x2b6   : > { %v5776_v18 = vadd.f32 %v1924_v49, %v7542_v35  ;;  %v1926_v56 = vpop.f32.mrb[42].mxu0  ;;  %v2141_v44 = vadd.f32 %v7554_v57, %v2096_v40  ;;  %5665 = vmatprep.subr.bf16.mxu1 %v6143_v25 }
 0x2b7   : > { %vm1989_vm8 = vcmp.gt.f32.partialorder %v5775_v10, 0.0  ;;  %v2021_v13 = vmul.f32 0.2, %v5775_v10  ;;  %v5777_v23 = vadd.f32 %v1926_v56, %v7539_v33  ;;  %v1928_v54 = vpop.f32.mrb[43].mxu0  ;;  %v2142_v37 = vadd.f32 %v7558_v39, %v2097_v2 }
 0x2b8   : > { %vm1990_vm9 = vcmp.gt.f32.partialorder %v5776_v18, 0.0  ;;  %v2022_v28 = vmul.f32 0.2, %v5776_v18  ;;  %v5778_v46 = vadd.f32 %v1928_v54, %v7542_v35  ;;  %v2169_v45 = vpack.c.bf16 %v2141_v44, %v2139_v7 }
 0x2b9   : > { %v2053_v26 = vsel %vm1989_vm8, %v5775_v10, %v2021_v13  ;;  %vm1991_vm10 = vcmp.gt.f32.partialorder %v5777_v23, 0.0  ;;  %v2023_v55 = vmul.f32 0.2, %v5777_v23  ;;  %v2170_v41 = vpack.c.bf16 %v2142_v37, %v2140_v6  ;;  %5666 = vmatpush3.bf16.msra.mxu1 %v6143_v25 }
 0x2ba   : > { %v2098_v11 = vmul.f32 %v7546_v38, %v2053_v26  ;;  %v2054_v27 = vsel %vm1990_vm9, %v5776_v18, %v2022_v28  ;;  %vm1992_vm11 = vcmp.gt.f32.partialorder %v5778_v46, 0.0  ;;  %v2024_v51 = vmul.f32 0.2, %v5778_v46  ;;  %5667 = vmatprep.subr.bf16.mxu1 %v6144_v50 }
 0x2bb   : > { %v2099_v19 = vmul.f32 %v7550_v42, %v2054_v27  ;;  %v2055_v12 = vsel %vm1991_vm10, %v5777_v23, %v2023_v55  ;;  %2352 = vmatprep.mubr.bf16.mxu1 %v2170_v41 }
 0x2bc   : > { %v2100_v52 = vmul.f32 %v7546_v38, %v2055_v12  ;;  %v2056_v4 = vsel %vm1992_vm11, %v5778_v46, %v2024_v51  ;;  %v1932_v36 = vpop.f32.mrb[44].mxu0  ;;  %2353 = vmatmul.mubr.bf16.gmra.mrb[36].mxu1 %v2169_v45  ;;  %v2143_v58 = vadd.f32 %v7554_v57, %v2098_v11 }
 0x2bd   : > { %v2101_v14 = vmul.f32 %v7550_v42, %v2056_v4  ;;  %v5779_v20 = vadd.f32 %v1932_v36, %v7539_v33  ;;  %v1934_v48 = vpop.f32.mrb[45].mxu0  ;;  %5668 = vmatpush3.bf16.msra.mxu1 %v6144_v50  ;;  %v2144_v59 = vadd.f32 %v7558_v39, %v2099_v19 }
 0x2be   : > { %v5780_v17 = vadd.f32 %v1934_v48, %v7542_v35  ;;  %v1936_v22 = vpop.f32.mrb[46].mxu0  ;;  %v2145_v60 = vadd.f32 %v7554_v57, %v2100_v52  ;;  %5669 = vmatprep.subr.bf16.mxu1 %v6145_v5 }
 0x2bf   : > { %vm1993_vm12 = vcmp.gt.f32.partialorder %v5779_v20, 0.0  ;;  %v2025_v30 = vmul.f32 0.2, %v5779_v20  ;;  %v5781_v34 = vadd.f32 %v1936_v22, %v7539_v33  ;;  %v1938_v32 = vpop.f32.mrb[47].mxu0  ;;  %v2146_v3 = vadd.f32 %v7558_v39, %v2101_v14 }
 0x2c0   : > { %vm1994_vm13 = vcmp.gt.f32.partialorder %v5780_v17, 0.0  ;;  %v2026_v15 = vmul.f32 0.2, %v5780_v17  ;;  %v5782_v8 = vadd.f32 %v1938_v32, %v7542_v35  ;;  %v2171_v63 = vpack.c.bf16 %v2145_v60, %v2143_v58 }
 0x2c1   : > { %v2057_v21 = vsel %vm1993_vm12, %v5779_v20, %v2025_v30  ;;  %vm1995_vm14 = vcmp.gt.f32.partialorder %v5781_v34, 0.0  ;;  %v2027_v53 = vmul.f32 0.2, %v5781_v34  ;;  %v2172_v61 = vpack.c.bf16 %v2146_v3, %v2144_v59  ;;  %5670 = vmatpush3.bf16.msra.mxu1 %v6145_v5 }
 0x2c2   : > { %v2102_v25 = vmul.f32 %v7546_v38, %v2057_v21  ;;  %v2058_v62 = vsel %vm1994_vm13, %v5780_v17, %v2026_v15  ;;  %vm1996_vm15 = vcmp.gt.f32.partialorder %v5782_v8, 0.0  ;;  %v2028_v24 = vmul.f32 0.2, %v5782_v8  ;;  %5671 = vmatprep.subr.bf16.mxu1 %v6146_v16 }
 0x2c3   : > { %v2103_v40 = vmul.f32 %v7550_v42, %v2058_v62  ;;  %v2059_v1 = vsel %vm1995_vm14, %v5781_v34, %v2027_v53  ;;  %2360 = vmatprep.mubr.bf16.mxu1 %v2172_v61 }
 0x2c4   : > { %v2104_v9 = vmul.f32 %v7546_v38, %v2059_v1  ;;  %v2060_v2 = vsel %vm1996_vm15, %v5782_v8, %v2028_v24  ;;  %v1942_v10 = vpop.f32.mrb[48].mxu0  ;;  %2361 = vmatmul.mubr.bf16.gmra.mrb[40].mxu1 %v2171_v63  ;;  %v2147_v50 = vadd.f32 %v7554_v57, %v2102_v25 }
 0x2c5   : > { %v2105_v49 = vmul.f32 %v7550_v42, %v2060_v2  ;;  %v5783_v18 = vadd.f32 %v1942_v10, %v7539_v33  ;;  %v1944_v56 = vpop.f32.mrb[49].mxu0  ;;  %5672 = vmatpush3.bf16.msra.mxu1 %v6146_v16  ;;  %v2148_v44 = vadd.f32 %v7558_v39, %v2103_v40 }
 0x2c6   : > { %v5784_v6 = vadd.f32 %v1944_v56, %v7542_v35  ;;  %v1946_v7 = vpop.f32.mrb[50].mxu0  ;;  %v2149_v13 = vadd.f32 %v7554_v57, %v2104_v9 }
 0x2c7   : > { %vm1997_vm0 = vcmp.gt.f32.partialorder %v5783_v18, 0.0  ;;  %v2029_v23 = vmul.f32 0.2, %v5783_v18  ;;  %v5785_v54 = vadd.f32 %v1946_v7, %v7539_v33  ;;  %v1948_v37 = vpop.f32.mrb[51].mxu0  ;;  %v2150_v28 = vadd.f32 %v7558_v39, %v2105_v49 }
 0x2c8   : > { %vm1998_vm1 = vcmp.gt.f32.partialorder %v5784_v6, 0.0  ;;  %v2030_v46 = vmul.f32 0.2, %v5784_v6  ;;  %v5786_v45 = vadd.f32 %v1948_v37, %v7542_v35  ;;  %v2173_v26 = vpack.c.bf16 %v2149_v13, %v2147_v50 }
 0x2c9   : > { %v2061_v55 = vsel %vm1997_vm0, %v5783_v18, %v2029_v23  ;;  %vm1999_vm2 = vcmp.gt.f32.partialorder %v5785_v54, 0.0  ;;  %v2031_v41 = vmul.f32 0.2, %v5785_v54  ;;  %v2174_v11 = vpack.c.bf16 %v2150_v28, %v2148_v44 }
 0x2ca   : > { %v2106_v27 = vmul.f32 %v7546_v38, %v2061_v55  ;;  %v2062_v51 = vsel %vm1998_vm1, %v5784_v6, %v2030_v46  ;;  %vm2000_vm3 = vcmp.gt.f32.partialorder %v5786_v45, 0.0  ;;  %v2032_v5 = vmul.f32 0.2, %v5786_v45 }
 0x2cb   : > { %v2107_v19 = vmul.f32 %v7550_v42, %v2062_v51  ;;  %v2063_v12 = vsel %vm1999_vm2, %v5785_v54, %v2031_v41  ;;  %2368 = vmatprep.mubr.bf16.mxu1 %v2174_v11 }
 0x2cc   : > { %v2108_v52 = vmul.f32 %v7546_v38, %v2063_v12  ;;  %v2064_v4 = vsel %vm2000_vm3, %v5786_v45, %v2032_v5  ;;  %v1952_v36 = vpop.f32.mrb[52].mxu0  ;;  %2369 = vmatmul.mubr.bf16.gmra.mrb[44].mxu1 %v2173_v26  ;;  %v2151_v58 = vadd.f32 %v7554_v57, %v2106_v27 }
 0x2cd   : > { %v2109_v14 = vmul.f32 %v7550_v42, %v2064_v4  ;;  %v5787_v20 = vadd.f32 %v1952_v36, %v7539_v33  ;;  %v1954_v48 = vpop.f32.mrb[53].mxu0  ;;  %v2152_v59 = vadd.f32 %v7558_v39, %v2107_v19 }
 0x2ce   : > { %v5788_v17 = vadd.f32 %v1954_v48, %v7542_v35  ;;  %v1956_v22 = vpop.f32.mrb[54].mxu0  ;;  %v2153_v60 = vadd.f32 %v7554_v57, %v2108_v52 }
 0x2cf   : > { %vm2001_vm4 = vcmp.gt.f32.partialorder %v5787_v20, 0.0  ;;  %v2033_v16 = vmul.f32 0.2, %v5787_v20  ;;  %v5789_v30 = vadd.f32 %v1956_v22, %v7539_v33  ;;  %v1958_v34 = vpop.f32.mrb[55].mxu0  ;;  %v2154_v32 = vadd.f32 %v7558_v39, %v2109_v14 }
 0x2d0   : > { %vm2002_vm5 = vcmp.gt.f32.partialorder %v5788_v17, 0.0  ;;  %v2034_v3 = vmul.f32 0.2, %v5788_v17  ;;  %v5790_v15 = vadd.f32 %v1958_v34, %v7542_v35  ;;  %v2175_v8 = vpack.c.bf16 %v2153_v60, %v2151_v58 }
 0x2d1   : > { %v2065_v63 = vsel %vm2001_vm4, %v5787_v20, %v2033_v16  ;;  %vm2003_vm6 = vcmp.gt.f32.partialorder %v5789_v30, 0.0  ;;  %v2035_v21 = vmul.f32 0.2, %v5789_v30  ;;  %v2176_v53 = vpack.c.bf16 %v2154_v32, %v2152_v59 }
 0x2d2   : > { %v2110_v61 = vmul.f32 %v7546_v38, %v2065_v63  ;;  %v2066_v25 = vsel %vm2002_vm5, %v5788_v17, %v2034_v3  ;;  %vm2004_vm7 = vcmp.gt.f32.partialorder %v5790_v15, 0.0  ;;  %v2036_v62 = vmul.f32 0.2, %v5790_v15 }
 0x2d3   : > { %v2111_v24 = vmul.f32 %v7550_v42, %v2066_v25  ;;  %v2067_v40 = vsel %vm2003_vm6, %v5789_v30, %v2035_v21  ;;  %2376 = vmatprep.mubr.bf16.mxu1 %v2176_v53 }
 0x2d4   : > { %v2112_v1 = vmul.f32 %v7546_v38, %v2067_v40  ;;  %v2068_v9 = vsel %vm2004_vm7, %v5790_v15, %v2036_v62  ;;  %v1962_v2 = vpop.f32.mrb[56].mxu0  ;;  %2377 = vmatmul.mubr.bf16.gmra.mrb[48].mxu1 %v2175_v8  ;;  %v2155_v44 = vadd.f32 %v7554_v57, %v2110_v61 }
 0x2d5   : > { %v2113_v10 = vmul.f32 %v7550_v42, %v2068_v9  ;;  %v5791_v49 = vadd.f32 %v1962_v2, %v7539_v33  ;;  %v1964_v18 = vpop.f32.mrb[57].mxu0  ;;  %v2156_v7 = vadd.f32 %v7558_v39, %v2111_v24 }
 0x2d6   : > { %v5792_v56 = vadd.f32 %v1964_v18, %v7542_v35  ;;  %v1966_v6 = vpop.f32.mrb[58].mxu0  ;;  %v2157_v50 = vadd.f32 %v7554_v57, %v2112_v1 }
 0x2d7   : > { %vm2005_vm8 = vcmp.gt.f32.partialorder %v5791_v49, 0.0  ;;  %v2037_v13 = vmul.f32 0.2, %v5791_v49  ;;  %v5793_v23 = vadd.f32 %v1966_v6, %v7539_v33  ;;  %v1968_v54 = vpop.f32.mrb[59].mxu0  ;;  %v2158_v37 = vadd.f32 %v7558_v39, %v2113_v10  ;;  %v6161_v6 = vld [vmem:[#allocation2 + $0xc] ss:$16 sps:$4 sm:$0xff]  }
 0x2d8   : > { %vm2006_vm9 = vcmp.gt.f32.partialorder %v5792_v56, 0.0  ;;  %v2038_v28 = vmul.f32 0.2, %v5792_v56  ;;  %v5794_v46 = vadd.f32 %v1968_v54, %v7542_v35  ;;  %v2177_v45 = vpack.c.bf16 %v2157_v50, %v2155_v44  ;;  %3008 = vmatprep.subr.bf16.mxu0 %v6161_v6  ;;  %v7677_v44 = vld [vmem:[%s8945_s10 + $0x2] ss:$0 sm:$0xff] }
 0x2d9   : > { %v2069_v26 = vsel %vm2005_vm8, %v5791_v49, %v2037_v13  ;;  %vm2007_vm10 = vcmp.gt.f32.partialorder %v5793_v23, 0.0  ;;  %v2039_v55 = vmul.f32 0.2, %v5793_v23  ;;  %v2178_v41 = vpack.c.bf16 %v2158_v37, %v2156_v7 }
 0x2da   : > { %v2114_v11 = vmul.f32 %v7546_v38, %v2069_v26  ;;  %v2070_v27 = vsel %vm2006_vm9, %v5792_v56, %v2038_v28  ;;  %vm2008_vm11 = vcmp.gt.f32.partialorder %v5794_v46, 0.0  ;;  %v2040_v51 = vmul.f32 0.2, %v5794_v46  ;;  %v6159_v56 = vld [vmem:[#allocation2 + $0x8] ss:$16 sps:$4 sm:$0xff]  }
 0x2db   : > { %v2115_v5 = vmul.f32 %v7550_v42, %v2070_v27  ;;  %v2071_v19 = vsel %vm2007_vm10, %v5793_v23, %v2039_v55  ;;  %2384 = vmatprep.mubr.bf16.mxu1 %v2178_v41  ;;  %3009 = vmatpush1.bf16.msra.mxu0 %v6159_v56  ;;  %v7681_v26 = vld [vmem:[#allocation7 + $0x2] ss:$0 sm:$0xff] }
 0x2dc   : > { %v2116_v12 = vmul.f32 %v7546_v38, %v2071_v19  ;;  %v2072_v52 = vsel %vm2008_vm11, %v5794_v46, %v2040_v51  ;;  %v1972_v4 = vpop.f32.mrb[60].mxu0  ;;  %2385 = vmatmul.mubr.bf16.gmra.mrb[52].mxu1 %v2177_v45  ;;  %v2159_v59 = vadd.f32 %v7554_v57, %v2114_v11 }
 0x2dd   : > { %v2117_v36 = vmul.f32 %v7550_v42, %v2072_v52  ;;  %v5795_v14 = vadd.f32 %v1972_v4, %v7539_v33  ;;  %v1974_v20 = vpop.f32.mrb[61].mxu0  ;;  %v2160_v22 = vadd.f32 %v7558_v39, %v2115_v5 }
 0x2de   : > { %v5796_v48 = vadd.f32 %v1974_v20, %v7542_v35  ;;  %v1976_v17 = vpop.f32.mrb[62].mxu0  ;;  %v2161_v58 = vadd.f32 %v7554_v57, %v2116_v12  ;;  %v7684_v12 = vld [vmem:[#allocation8 + $0x2] ss:$0 sm:$0xff] }
 0x2df   : > { %vm2009_vm12 = vcmp.gt.f32.partialorder %v5795_v14, 0.0  ;;  %v2041_v60 = vmul.f32 0.2, %v5795_v14  ;;  %v5797_v16 = vadd.f32 %v1976_v17, %v7539_v33  ;;  %v1978_v30 = vpop.f32.mrb[63].mxu0  ;;  %v2162_v34 = vadd.f32 %v7558_v39, %v2117_v36 }
 0x2e0   : > { %vm2010_vm13 = vcmp.gt.f32.partialorder %v5796_v48, 0.0  ;;  %v2042_v32 = vmul.f32 0.2, %v5796_v48  ;;  %v5798_v3 = vadd.f32 %v1978_v30, %v7542_v35  ;;  %v2179_v15 = vpack.c.bf16 %v2161_v58, %v2159_v59 }
 0x2e1   : > { %v2073_v8 = vsel %vm2009_vm12, %v5795_v14, %v2041_v60  ;;  %vm2011_vm14 = vcmp.gt.f32.partialorder %v5797_v16, 0.0  ;;  %v2043_v63 = vmul.f32 0.2, %v5797_v16  ;;  %v2180_v21 = vpack.c.bf16 %v2162_v34, %v2160_v22 }
 0x2e2   : > { %v2118_v53 = vmul.f32 %v7546_v38, %v2073_v8  ;;  %v2074_v61 = vsel %vm2010_vm13, %v5796_v48, %v2042_v32  ;;  %vm2012_vm15 = vcmp.gt.f32.partialorder %v5798_v3, 0.0  ;;  %v2044_v25 = vmul.f32 0.2, %v5798_v3 }
 0x2e3   : > { %v2119_v62 = vmul.f32 %v7550_v42, %v2074_v61  ;;  %v2075_v33 = vsel %vm2011_vm14, %v5797_v16, %v2043_v63  ;;  %2392 = vmatprep.mubr.bf16.mxu1 %v2180_v21 }
 0x2e4   : > { %v2120_v24 = vmul.f32 %v7546_v38, %v2075_v33  ;;  %v2076_v40 = vsel %vm2012_vm15, %v5798_v3, %v2044_v25  ;;  %2393 = vmatmul.mubr.bf16.gmra.mrb[56].mxu1 %v2179_v15  ;;  %v2163_v1 = vadd.f32 %v7554_v57, %v2118_v53  ;;  %v6147_v38 = vld [vmem:[%s8939_s4 + $0x28] sm:$0xff]  }
 0x2e5   : > { %v2121_v35 = vmul.f32 %v7550_v42, %v2076_v40  ;;  %v2164_v2 = vadd.f32 %v7558_v39, %v2119_v62  ;;  %5673 = vmatprep.subr.bf16.mxu1 %v6147_v38  ;;  %v6148_v42 = vld [vmem:[%s8939_s4 + $0x30] sm:$0xff]  }
 0x2e6   : > { %v2165_v9 = vadd.f32 %v7554_v57, %v2120_v24  ;;  %5674 = vmatpush3.bf16.msra.mxu1 %v6147_v38  ;;  %v6149_v57 = vld [vmem:[%s8939_s4 + $0x38] sm:$0xff]   ;;  %v6150_v40 = vld [vmem:[#allocation2] ss:$16 sps:$4 sm:$0xff]  }
 0x2e7   : > { %v2166_v10 = vadd.f32 %v7558_v39, %v2121_v35  ;;  %5675 = vmatprep.subr.bf16.mxu1 %v6148_v42  ;;  %v6152_v39 = vld [vmem:[#allocation2 + $0x4] ss:$16 sps:$4 sm:$0xff]  }
 0x2e8   : > { %v2181_v49 = vpack.c.bf16 %v2165_v9, %v2163_v1  ;;  %v6155_v1 = vld [vmem:[#allocation2 + $0x24] ss:$16 sps:$4 sm:$0xff]  }
 0x2e9   : > { %v2182_v18 = vpack.c.bf16 %v2166_v10, %v2164_v2 }
 0x2ea   : > { %5676 = vmatpush3.bf16.msra.mxu1 %v6148_v42 }
 0x2eb   : > { %2400 = vmatprep.mubr.bf16.mxu1 %v2182_v18  ;;  %5677 = vmatprep.subr.bf16.mxu1 %v6149_v57 }
 0x2ec   : > { %2401 = vmatmul.mubr.bf16.gmra.mrb[60].mxu1 %v2181_v49 }
 0x2ee   : > { %5678 = vmatpush3.bf16.msra.mxu1 %v6149_v57 }
 0x2ef   : > { %2895 = vmatprep.subr.bf16.mxu1 %v6152_v39  ;;  %v6153_v39 = vld [vmem:[#allocation2 + $0x20] ss:$16 sps:$4 sm:$0xff]  }
 0x387   : > { %v5507_v7 = vpop.f32.mrb[32].mxu1 }
 0x388   : > { %v5508_v50 = vpop.f32.mrb[33].mxu1 }
 0x389   : > { %v5509_v13 = vadd.f32 %v5508_v50, %v5507_v7  ;;  %v5510_v23 = vpop.f32.mrb[34].mxu1  ;;  %v6158_v7 = vld [vmem:[#allocation2 + $0x44] ss:$16 sps:$4 sm:$0xff]  }
 0x38a   : > { %v5511_v54 = vpop.f32.mrb[35].mxu1 }
 0x38b   : > { %v2347_v37 = vadd.f32 %v5509_v13, %v7677_v44  ;;  %v5512_v28 = vadd.f32 %v5511_v54, %v5510_v23 }
 0x38d   : > { %vm2409_vm0 = vcmp.gt.f32.partialorder %v2347_v37, 0.0  ;;  %v2425_v46 = vmul.f32 0.2, %v2347_v37  ;;  %v2350_v45 = vadd.f32 %v5512_v28, %v7677_v44 }
 0x38f   : > { %v2441_v55 = vsel %vm2409_vm0, %v2347_v37, %v2425_v46  ;;  %vm2410_vm1 = vcmp.gt.f32.partialorder %v2350_v45, 0.0  ;;  %v2426_v41 = vmul.f32 0.2, %v2350_v45  ;;  %v5513_v11 = vpop.f32.mrb[36].mxu1  ;;  %v6156_v46 = vld [vmem:[#allocation2 + $0x40] ss:$16 sps:$4 sm:$0xff]  }
 0x390   : > { %v5514_v27 = vpop.f32.mrb[37].mxu1  ;;  %v2458_v51 = vmul.f32 %v7681_v26, %v2441_v55 }
 0x391   : > { %v2442_v5 = vsel %vm2410_vm1, %v2350_v45, %v2426_v41  ;;  %v5515_v19 = vadd.f32 %v5514_v27, %v5513_v11  ;;  %v5516_v52 = vpop.f32.mrb[38].mxu1 }
 0x392   : > { %v5517_v4 = vpop.f32.mrb[39].mxu1  ;;  %v2459_v36 = vmul.f32 %v7681_v26, %v2442_v5  ;;  %v2475_v48 = vadd.f32 %v7684_v12, %v2458_v51 }
 0x393   : > { %v2355_v14 = vadd.f32 %v5515_v19, %v7677_v44  ;;  %v5518_v20 = vadd.f32 %v5517_v4, %v5516_v52 }
 0x394   : > { %v2476_v17 = vadd.f32 %v7684_v12, %v2459_v36 }
 0x395   : > { %vm2411_vm2 = vcmp.gt.f32.partialorder %v2355_v14, 0.0  ;;  %v2427_v22 = vmul.f32 0.2, %v2355_v14  ;;  %v2358_v59 = vadd.f32 %v5518_v20, %v7677_v44 }
 0x396   : > { %v2491_v58 = vpack.c.bf16 %v2476_v17, %v2475_v48 }
 0x397   : > { %v2443_v60 = vsel %vm2411_vm2, %v2355_v14, %v2427_v22  ;;  %vm2412_vm3 = vcmp.gt.f32.partialorder %v2358_v59, 0.0  ;;  %v2428_v16 = vmul.f32 0.2, %v2358_v59  ;;  %v5519_v30 = vpop.f32.mrb[40].mxu1 }
 0x398   : > { %v2460_v34 = vmul.f32 %v7681_v26, %v2443_v60  ;;  %v5520_v32 = vpop.f32.mrb[41].mxu1  ;;  %5679 = vmatprep.mubr.bf16.mxu1 %v2491_v58 }
 0x399   : > { %v2444_v3 = vsel %vm2412_vm3, %v2358_v59, %v2428_v16  ;;  %v5521_v15 = vadd.f32 %v5520_v32, %v5519_v30  ;;  %v5522_v8 = vpop.f32.mrb[42].mxu1 }
 0x39a   : > { %v2461_v63 = vmul.f32 %v7681_v26, %v2444_v3  ;;  %v5523_v21 = vpop.f32.mrb[43].mxu1  ;;  %v2477_v25 = vadd.f32 %v7684_v12, %v2460_v34 }
 0x39b   : > { %v2363_v53 = vadd.f32 %v5521_v15, %v7677_v44  ;;  %v5524_v61 = vadd.f32 %v5523_v21, %v5522_v8 }
 0x39c   : > { %v2478_v62 = vadd.f32 %v7684_v12, %v2461_v63 }
 0x39d   : > { %vm2413_vm4 = vcmp.gt.f32.partialorder %v2363_v53, 0.0  ;;  %v2429_v33 = vmul.f32 0.2, %v2363_v53  ;;  %v2366_v24 = vadd.f32 %v5524_v61, %v7677_v44 }
 0x39e   : > { %v2492_v35 = vpack.c.bf16 %v2478_v62, %v2477_v25 }
 0x39f   : > { %v2445_v9 = vsel %vm2413_vm4, %v2363_v53, %v2429_v33  ;;  %vm2414_vm5 = vcmp.gt.f32.partialorder %v2366_v24, 0.0  ;;  %v2430_v2 = vmul.f32 0.2, %v2366_v24  ;;  %v5525_v10 = vpop.f32.mrb[44].mxu1  ;;  %vm2870_vm4 = vcmask 523264  }
 0x3a0   : > { %v5526_v49 = vpop.f32.mrb[45].mxu1  ;;  %5680 = vmatmul.mubr.bf16.vlgmr.msra.gmra.mrb[64].mxu1 %v2492_v35  ;;  %v2462_v18 = vmul.f32 %v7681_v26, %v2445_v9 }
 0x3a1   : > { %v2446_v38 = vsel %vm2414_vm5, %v2366_v24, %v2430_v2  ;;  %v5527_v42 = vadd.f32 %v5526_v49, %v5525_v10  ;;  %v5528_v57 = vpop.f32.mrb[46].mxu1  ;;  %2896 = vmatpush1.bf16.msra.mxu1 %v6150_v40 }
 0x3a2   : > { %v5529_v56 = vpop.f32.mrb[47].mxu1  ;;  %v2463_v6 = vmul.f32 %v7681_v26, %v2446_v38  ;;  %2897 = vmatprep.subr.bf16.mxu1 %v6155_v1  ;;  %v2479_v23 = vadd.f32 %v7684_v12, %v2462_v18 }
 0x3a3   : > { %v2371_v50 = vadd.f32 %v5527_v42, %v7677_v44  ;;  %v5530_v13 = vadd.f32 %v5529_v56, %v5528_v57 }
 0x3a4   : > { %v2480_v54 = vadd.f32 %v7684_v12, %v2463_v6 }
 0x3a5   : > { %vm2415_vm6 = vcmp.gt.f32.partialorder %v2371_v50, 0.0  ;;  %v2431_v37 = vmul.f32 0.2, %v2371_v50  ;;  %v2374_v28 = vadd.f32 %v5530_v13, %v7677_v44  ;;  %2898 = vmatpush1.bf16.msra.mxu1 %v6153_v39 }
 0x3a6   : > { %v2493_v45 = vpack.c.bf16 %v2480_v54, %v2479_v23  ;;  %2899 = vmatprep.subr.bf16.mxu1 %v6158_v7 }
 0x3a7   : > { %v2447_v55 = vsel %vm2415_vm6, %v2371_v50, %v2431_v37  ;;  %vm2416_vm7 = vcmp.gt.f32.partialorder %v2374_v28, 0.0  ;;  %v2432_v41 = vmul.f32 0.2, %v2374_v28  ;;  %v5531_v11 = vpop.f32.mrb[48].mxu1 }
 0x3a8   : > { %v5532_v27 = vpop.f32.mrb[49].mxu1  ;;  %5683 = vmatprep.mubr.bf16.mxu1 %v2493_v45  ;;  %v2464_v51 = vmul.f32 %v7681_v26, %v2447_v55 }
 0x3a9   : > { %v2448_v5 = vsel %vm2416_vm7, %v2374_v28, %v2432_v41  ;;  %v5533_v19 = vadd.f32 %v5532_v27, %v5531_v11  ;;  %v5534_v52 = vpop.f32.mrb[50].mxu1  ;;  %2900 = vmatpush1.bf16.msra.mxu1 %v6156_v46 }
 0x3aa   : > { %v5535_v4 = vpop.f32.mrb[51].mxu1  ;;  %v2465_v36 = vmul.f32 %v7681_v26, %v2448_v5  ;;  %v2481_v48 = vadd.f32 %v7684_v12, %v2464_v51 }
 0x3ab   : > { %v2379_v14 = vadd.f32 %v5533_v19, %v7677_v44  ;;  %v5536_v20 = vadd.f32 %v5535_v4, %v5534_v52 }
 0x3ac   : > { %v2482_v17 = vadd.f32 %v7684_v12, %v2465_v36 }
 0x3ad   : > { %vm2417_vm8 = vcmp.gt.f32.partialorder %v2379_v14, 0.0  ;;  %v2433_v22 = vmul.f32 0.2, %v2379_v14  ;;  %v2382_v59 = vadd.f32 %v5536_v20, %v7677_v44 }
 0x3ae   : > { %v2494_v58 = vpack.c.bf16 %v2482_v17, %v2481_v48 }
 0x3af   : > { %v2449_v60 = vsel %vm2417_vm8, %v2379_v14, %v2433_v22  ;;  %vm2418_vm9 = vcmp.gt.f32.partialorder %v2382_v59, 0.0  ;;  %v2434_v16 = vmul.f32 0.2, %v2382_v59  ;;  %v5537_v30 = vpop.f32.mrb[52].mxu1 }
 0x3b0   : > { %v5538_v34 = vpop.f32.mrb[53].mxu1  ;;  %5684 = vmatmul.mubr.bf16.gmra.mrb[68].mxu1 %v2494_v58  ;;  %v2466_v32 = vmul.f32 %v7681_v26, %v2449_v60 }
 0x3b1   : > { %v2450_v3 = vsel %vm2418_vm9, %v2382_v59, %v2434_v16  ;;  %v5539_v15 = vadd.f32 %v5538_v34, %v5537_v30  ;;  %v5540_v8 = vpop.f32.mrb[54].mxu1  ;;  %v6164_v34 = vld [vmem:[#allocation2 + $0x2c] ss:$16 sps:$4 sm:$0xff]  }
 0x3b2   : > { %v5541_v63 = vpop.f32.mrb[55].mxu1  ;;  %v2467_v21 = vmul.f32 %v7681_v26, %v2450_v3  ;;  %v2483_v25 = vadd.f32 %v7684_v12, %v2466_v32  ;;  %3010 = vmatprep.subr.bf16.mxu0 %v6164_v34  ;;  %v6170_v32 = vld [vmem:[#allocation2 + $0x4c] ss:$16 sps:$4 sm:$0xff]   ;;  %v6168_v3 = vld [vmem:[#allocation2 + $0x48] ss:$16 sps:$4 sm:$0xff]  }
 0x3b3   : > { %v2387_v53 = vadd.f32 %v5539_v15, %v7677_v44  ;;  %v5542_v61 = vadd.f32 %v5541_v63, %v5540_v8  ;;  %v6167_v15 = vld [vmem:[#allocation2 + $0x64] ss:$16 sps:$4 sm:$0xff]   ;;  %v6173_v8 = vld [vmem:[#allocation2 + $0x6c] ss:$16 sps:$4 sm:$0xff]   ;;  %v6165_v63 = vld [vmem:[#allocation2 + $0x60] ss:$16 sps:$4 sm:$0xff]  }
 0x3b4   : > { %v2484_v62 = vadd.f32 %v7684_v12, %v2467_v21  ;;  %2901 = vmatprep.subr.bf16.mxu1 %v6167_v15  ;;  %v7738_v21 = vld [vmem:[%s8945_s10 + $0x3] ss:$0 sm:$0xff] }
 0x3b5   : > { %vm2419_vm10 = vcmp.gt.f32.partialorder %v2387_v53, 0.0  ;;  %v2435_v33 = vmul.f32 0.2, %v2387_v53  ;;  %v2390_v24 = vadd.f32 %v5542_v61, %v7677_v44  ;;  %2902 = vmatpush1.bf16.msra.mxu1 %v6165_v63 }
 0x3b6   : > { %v2495_v40 = vpack.c.bf16 %v2484_v62, %v2483_v25 }
 0x3b7   : > { %v2451_v35 = vsel %vm2419_vm10, %v2387_v53, %v2435_v33  ;;  %vm2420_vm11 = vcmp.gt.f32.partialorder %v2390_v24, 0.0  ;;  %v2436_v1 = vmul.f32 0.2, %v2390_v24  ;;  %v5543_v9 = vpop.f32.mrb[56].mxu1 }
 0x3b8   : > { %v5544_v2 = vpop.f32.mrb[57].mxu1  ;;  %5687 = vmatprep.mubr.bf16.mxu1 %v2495_v40  ;;  %v2468_v10 = vmul.f32 %v7681_v26, %v2451_v35  ;;  %v7742_v40 = vld [vmem:[#allocation7 + $0x3] ss:$0 sm:$0xff] }
 0x3b9   : > { %v2452_v49 = vsel %vm2420_vm11, %v2390_v24, %v2436_v1  ;;  %v5545_v18 = vadd.f32 %v5544_v2, %v5543_v9  ;;  %v5546_v38 = vpop.f32.mrb[58].mxu1 }
 0x3ba   : > { %v5547_v42 = vpop.f32.mrb[59].mxu1  ;;  %v2469_v57 = vmul.f32 %v7681_v26, %v2452_v49  ;;  %v2485_v6 = vadd.f32 %v7684_v12, %v2468_v10 }
 0x3bb   : > { %v2395_v39 = vadd.f32 %v5545_v18, %v7677_v44  ;;  %v5548_v56 = vadd.f32 %v5547_v42, %v5546_v38 }
 0x3bc   : > { %v2486_v7 = vadd.f32 %v7684_v12, %v2469_v57  ;;  %v7747_v57 = vld [vmem:[#allocation8 + $0x3] ss:$0 sm:$0xff] }
 0x3bd   : > { %vm2421_vm12 = vcmp.gt.f32.partialorder %v2395_v39, 0.0  ;;  %v2437_v50 = vmul.f32 0.2, %v2395_v39  ;;  %v2398_v13 = vadd.f32 %v5548_v56, %v7677_v44 }
 0x3be   : > { %v2496_v23 = vpack.c.bf16 %v2486_v7, %v2485_v6 }
 0x3bf   : > { %v2453_v54 = vsel %vm2421_vm12, %v2395_v39, %v2437_v50  ;;  %vm2422_vm13 = vcmp.gt.f32.partialorder %v2398_v13, 0.0  ;;  %v2438_v37 = vmul.f32 0.2, %v2398_v13  ;;  %v5549_v28 = vpop.f32.mrb[60].mxu1 }
 0x3c0   : > { %v5550_v46 = vpop.f32.mrb[61].mxu1  ;;  %5688 = vmatmul.mubr.bf16.gmra.mrb[72].mxu1 %v2496_v23  ;;  %v2470_v45 = vmul.f32 %v7681_v26, %v2453_v54 }
 0x3c1   : > { %v2454_v55 = vsel %vm2422_vm13, %v2398_v13, %v2438_v37  ;;  %v5551_v41 = vadd.f32 %v5550_v46, %v5549_v28  ;;  %v5552_v11 = vpop.f32.mrb[62].mxu1 }
 0x3c2   : > { %v5553_v27 = vpop.f32.mrb[63].mxu1  ;;  %v2471_v51 = vmul.f32 %v7681_v26, %v2454_v55  ;;  %v2487_v52 = vadd.f32 %v7684_v12, %v2470_v45  ;;  %v6174_v45 = vld [vmem:[%s8941_s6] ss:$8 sps:$4 sm:$0xff]   ;;  %v6179_v55 = vld [vmem:[%s8941_s6 + $0x14] ss:$8 sps:$4 sm:$0xff]  }
 0x3c3   : > { %v2403_v5 = vadd.f32 %v5551_v41, %v7677_v44  ;;  %v5554_v19 = vadd.f32 %v5553_v27, %v5552_v11 }
 0x3c4   : > { %v2488_v4 = vadd.f32 %v7684_v12, %v2471_v51  ;;  %v6177_v51 = vld [vmem:[%s8941_s6 + $0x10] ss:$8 sps:$4 sm:$0xff]  }
 0x3c5   : > { %vm2423_vm14 = vcmp.gt.f32.partialorder %v2403_v5, 0.0  ;;  %v2439_v36 = vmul.f32 0.2, %v2403_v5  ;;  %v2406_v14 = vadd.f32 %v5554_v19, %v7677_v44  ;;  %v6162_v44 = vld [vmem:[#allocation2 + $0x28] ss:$16 sps:$4 sm:$0xff]  }
 0x3c6   : > { %v2497_v20 = vpack.c.bf16 %v2488_v4, %v2487_v52  ;;  %3011 = vmatpush1.bf16.msra.mxu0 %v6162_v44  ;;  %v6182_v52 = vld [vmem:[%s8941_s6 + $0x24] ss:$8 sps:$4 sm:$0xff]  }
 0x3c7   : > { %v2455_v48 = vsel %vm2423_vm14, %v2403_v5, %v2439_v36  ;;  %vm2424_vm15 = vcmp.gt.f32.partialorder %v2406_v14, 0.0  ;;  %v2440_v17 = vmul.f32 0.2, %v2406_v14  ;;  %3012 = vmatprep.subr.bf16.mxu0 %v6170_v32 }
 0x3c8   : > { %5691 = vmatprep.mubr.bf16.mxu1 %v2497_v20  ;;  %v2472_v22 = vmul.f32 %v7681_v26, %v2455_v48 }
 0x3c9   : > { %v2456_v59 = vsel %vm2424_vm15, %v2406_v14, %v2440_v17 }
 0x3ca   : > { %v2473_v58 = vmul.f32 %v7681_v26, %v2456_v59  ;;  %v2489_v60 = vadd.f32 %v7684_v12, %v2472_v22  ;;  %3013 = vmatpush1.bf16.msra.mxu0 %v6168_v3  ;;  %v6171_v26 = vld [vmem:[#allocation2 + $0x68] ss:$16 sps:$4 sm:$0xff]  }
 0x3cb   : > { %3014 = vmatprep.subr.bf16.mxu0 %v6173_v8  ;;  %v6180_v59 = vld [vmem:[%s8941_s6 + $0x20] ss:$8 sps:$4 sm:$0xff]   ;;  %v6183_v8 = vld [vmem:[%s8941_s6 + $0x30] ss:$8 sps:$4 sm:$0xff]  }
 0x3cc   : > { %v2490_v16 = vadd.f32 %v7684_v12, %v2473_v58  ;;  %v6176_v12 = vld [vmem:[%s8941_s6 + $0x4] ss:$8 sps:$4 sm:$0xff]  }
 0x3cd   : > { %3916 = vmatprep.subr.bf16.mxu1 %v6176_v12  ;;  %v6188_v12 = vld [vmem:[%s8941_s6 + $0x44] ss:$8 sps:$4 sm:$0xff]  }
 0x3ce   : > { %v2498_v30 = vpack.c.bf16 %v2490_v16, %v2489_v60  ;;  %3015 = vmatpush1.bf16.msra.mxu0 %v6171_v26 }
 0x3d0   : > { %5692 = vmatmul.mubr.bf16.gmra.mrb[76].mxu1 %v2498_v30  ;;  %v6185_v30 = vld [vmem:[%s8941_s6 + $0x34] ss:$8 sps:$4 sm:$0xff]  }
 0x3d1   : > { %2927 = vmatprep.mubr.bf16.mxu1 %v6526_v0 }
 0x473   : > { %v5681_v53 = vpop.f32.mrb[64].mxu1 }
 0x474   : > { %v2607_v61 = vadd.f32 %v5681_v53, %v7738_v21  ;;  %v2598_v25 = vpop.f32.mrb[65].mxu1 }
 0x475   : > { %v2599_v62 = vadd.f32 %v2598_v25, %v7738_v21  ;;  %v5682_v33 = vpop.f32.mrb[66].mxu1 }
 0x476   : > { %vm2663_vm0 = vcmp.gt.f32.partialorder %v2607_v61, 0.0  ;;  %v2679_v24 = vmul.f32 0.2, %v2607_v61  ;;  %v2610_v35 = vadd.f32 %v5682_v33, %v7738_v21  ;;  %v2601_v1 = vpop.f32.mrb[67].mxu1  ;;  %v6186_v33 = vld [vmem:[%s8941_s6 + $0x40] ss:$8 sps:$4 sm:$0xff]  }
 0x477   : > { %vm2661_vm1 = vcmp.gt.f32.partialorder %v2599_v62, 0.0  ;;  %v2677_v9 = vmul.f32 0.2, %v2599_v62  ;;  %v2602_v2 = vadd.f32 %v2601_v1, %v7738_v21 }
 0x478   : > { %v2695_v10 = vsel %vm2663_vm0, %v2607_v61, %v2679_v24  ;;  %vm2664_vm2 = vcmp.gt.f32.partialorder %v2610_v35, 0.0  ;;  %v2680_v49 = vmul.f32 0.2, %v2610_v35  ;;  %v6191_v24 = vld [vmem:[%s8941_s6 + $0x54] ss:$8 sps:$4 sm:$0xff]  }
 0x479   : > { %v2712_v18 = vmul.f32 %v7742_v40, %v2695_v10  ;;  %v2693_v38 = vsel %vm2661_vm1, %v2599_v62, %v2677_v9  ;;  %vm2662_vm3 = vcmp.gt.f32.partialorder %v2602_v2, 0.0  ;;  %v2678_v42 = vmul.f32 0.2, %v2602_v2 }
 0x47a   : > { %v2710_v39 = vmul.f32 %v7742_v40, %v2693_v38  ;;  %v2696_v56 = vsel %vm2664_vm2, %v2610_v35, %v2680_v49 }
 0x47b   : > { %v2713_v6 = vmul.f32 %v7742_v40, %v2696_v56  ;;  %v2694_v7 = vsel %vm2662_vm3, %v2602_v2, %v2678_v42  ;;  %v2729_v13 = vadd.f32 %v7747_v57, %v2712_v18  ;;  %v6189_v2 = vld [vmem:[%s8941_s6 + $0x50] ss:$8 sps:$4 sm:$0xff]   ;;  %v6194_v18 = vld [vmem:[%s8941_s6 + $0x64] ss:$8 sps:$4 sm:$0xff]  }
 0x47c   : > { %v2711_v50 = vmul.f32 %v7742_v40, %v2694_v7  ;;  %v2727_v54 = vadd.f32 %v7747_v57, %v2710_v39 }
 0x47d   : > { %v2730_v23 = vadd.f32 %v7747_v57, %v2713_v6 }
 0x47e   : > { %v2728_v37 = vadd.f32 %v7747_v57, %v2711_v50 }
 0x47f   : > { %v2744_v28 = vpack.c.bf16 %v2730_v23, %v2729_v13  ;;  %v6192_v13 = vld [vmem:[%s8941_s6 + $0x60] ss:$8 sps:$4 sm:$0xff]  }
 0x480   : > { %v2743_v46 = vpack.c.bf16 %v2728_v37, %v2727_v54 }
 0x482   : > { %5368 = vmatmul.mubr.msk.bf16.vlgmr.msra.gmra.mrb[80].mxu1 %vm2870_vm4, %v2743_v46  ;;  %5376 = vmatmul.mubr.msk.bf16.vlgmr.msra.gmra.mrb[64].mxu0 %vm2870_vm4, %v2743_v46 }
 0x483   : > { %v5685_v41 = vpop.f32.mrb[68].mxu1  ;;  %2937 = vmatprep.mubr.bf16.mxu1 %v6526_v0  ;;  %3050 = vmatprep.mubr.bf16.mxu0 %v6526_v0 }
 0x484   : > { %v2623_v11 = vadd.f32 %v5685_v41, %v7738_v21  ;;  %v2614_v27 = vpop.f32.mrb[69].mxu1  ;;  %3917 = vmatpush1.bf16.msra.mxu1 %v6174_v45 }
 0x485   : > { %v2615_v5 = vadd.f32 %v2614_v27, %v7738_v21  ;;  %v5686_v19 = vpop.f32.mrb[70].mxu1  ;;  %3918 = vmatprep.subr.bf16.mxu1 %v6179_v55  ;;  %v6195_v27 = vld [vmem:[%s8941_s6 + $0x70] ss:$8 sps:$4 sm:$0xff]  }
 0x486   : > { %vm2667_vm5 = vcmp.gt.f32.partialorder %v2623_v11, 0.0  ;;  %v2683_v4 = vmul.f32 0.2, %v2623_v11  ;;  %v2626_v36 = vadd.f32 %v5686_v19, %v7738_v21  ;;  %v2617_v14 = vpop.f32.mrb[71].mxu1  ;;  %v6200_v19 = vld [vmem:[%s8941_s6 + $0x84] ss:$8 sps:$4 sm:$0xff]  }
 0x487   : > { %vm2665_vm6 = vcmp.gt.f32.partialorder %v2615_v5, 0.0  ;;  %v2681_v20 = vmul.f32 0.2, %v2615_v5  ;;  %v2618_v48 = vadd.f32 %v2617_v14, %v7738_v21 }
 0x488   : > { %v2699_v17 = vsel %vm2667_vm5, %v2623_v11, %v2683_v4  ;;  %vm2668_vm7 = vcmp.gt.f32.partialorder %v2626_v36, 0.0  ;;  %v2684_v22 = vmul.f32 0.2, %v2626_v36  ;;  %3919 = vmatpush1.bf16.msra.mxu1 %v6177_v51 }
 0x489   : > { %v2716_v58 = vmul.f32 %v7742_v40, %v2699_v17  ;;  %v2697_v60 = vsel %vm2665_vm6, %v2615_v5, %v2681_v20  ;;  %vm2666_vm8 = vcmp.gt.f32.partialorder %v2618_v48, 0.0  ;;  %v2682_v16 = vmul.f32 0.2, %v2618_v48  ;;  %3920 = vmatprep.subr.bf16.mxu1 %v6182_v52  ;;  %v6198_v20 = vld [vmem:[%s8941_s6 + $0x80] ss:$8 sps:$4 sm:$0xff]  }
 0x48a   : > { %v2714_v34 = vmul.f32 %v7742_v40, %v2697_v60  ;;  %v2700_v44 = vsel %vm2668_vm7, %v2626_v36, %v2684_v22  ;;  %5369 = vmatmul.mubr.msk.bf16.gmra.mrb[84].mxu1 %vm2870_vm4, %v2744_v28  ;;  %5377 = vmatmul.mubr.msk.bf16.gmra.mrb[68].mxu0 %vm2870_vm4, %v2744_v28  ;;  %v6197_v28 = vld [vmem:[%s8941_s6 + $0x74] ss:$8 sps:$4 sm:$0xff]  }
 0x48b   : > { %v2717_v32 = vmul.f32 %v7742_v40, %v2700_v44  ;;  %v2698_v3 = vsel %vm2666_vm8, %v2618_v48, %v2682_v16  ;;  %2947 = vmatprep.mubr.bf16.mxu1 %v6526_v0  ;;  %3060 = vmatprep.mubr.bf16.mxu0 %v6526_v0  ;;  %v2733_v63 = vadd.f32 %v7747_v57, %v2716_v58  ;;  %v6203_v48 = vld [vmem:[%s8941_s6 + $0x94] ss:$8 sps:$4 sm:$0xff]   ;;  %v6201_v58 = vld [vmem:[%s8941_s6 + $0x90] ss:$8 sps:$4 sm:$0xff]  }
 0x48c   : > { %v2715_v15 = vmul.f32 %v7742_v40, %v2698_v3  ;;  %3921 = vmatpush1.bf16.msra.mxu1 %v6180_v59  ;;  %v2731_v53 = vadd.f32 %v7747_v57, %v2714_v34 }
 0x48d   : > { %v2734_v26 = vadd.f32 %v7747_v57, %v2717_v32  ;;  %3922 = vmatprep.subr.bf16.mxu1 %v6185_v30  ;;  %v6206_v30 = vld [vmem:[%s8941_s6 + $0xa4] ss:$8 sps:$4 sm:$0xff]  }
 0x48e   : > { %v2732_v61 = vadd.f32 %v7747_v57, %v2715_v15 }
 0x48f   : > { %v2746_v25 = vpack.c.bf16 %v2734_v26, %v2733_v63  ;;  %v6204_v26 = vld [vmem:[%s8941_s6 + $0xa0] ss:$8 sps:$4 sm:$0xff]  }
 0x490   : > { %v2745_v62 = vpack.c.bf16 %v2732_v61, %v2731_v53  ;;  %3923 = vmatpush1.bf16.msra.mxu1 %v6183_v8 }
 0x491   : > { %3924 = vmatprep.subr.bf16.mxu1 %v6188_v12 }
 0x492   : > { %5370 = vmatmul.mubr.msk.bf16.gmra.mrb[88].mxu1 %vm2870_vm4, %v2745_v62  ;;  %5378 = vmatmul.mubr.msk.bf16.gmra.mrb[72].mxu0 %vm2870_vm4, %v2745_v62 }
 0x493   : > { %v5689_v35 = vpop.f32.mrb[72].mxu1  ;;  %2957 = vmatprep.mubr.bf16.mxu1 %v6526_v0  ;;  %3070 = vmatprep.mubr.bf16.mxu0 %v6526_v0 }
 0x494   : > { %v2639_v1 = vadd.f32 %v5689_v35, %v7738_v21  ;;  %v2630_v9 = vpop.f32.mrb[73].mxu1  ;;  %3925 = vmatpush1.bf16.msra.mxu1 %v6186_v33 }
 0x495   : > { %v2631_v10 = vadd.f32 %v2630_v9, %v7738_v21  ;;  %v5690_v49 = vpop.f32.mrb[74].mxu1  ;;  %3926 = vmatprep.subr.bf16.mxu1 %v6191_v24 }
 0x496   : > { %vm2671_vm9 = vcmp.gt.f32.partialorder %v2639_v1, 0.0  ;;  %v2687_v38 = vmul.f32 0.2, %v2639_v1  ;;  %v2642_v42 = vadd.f32 %v5690_v49, %v7738_v21  ;;  %v2633_v39 = vpop.f32.mrb[75].mxu1 }
 0x497   : > { %vm2669_vm10 = vcmp.gt.f32.partialorder %v2631_v10, 0.0  ;;  %v2685_v56 = vmul.f32 0.2, %v2631_v10  ;;  %v2634_v6 = vadd.f32 %v2633_v39, %v7738_v21  ;;  %v6213_v39 = vld [vmem:[%s8941_s6 + $0xd0] ss:$8 sps:$4 sm:$0xff]  }
 0x498   : > { %v2703_v7 = vsel %vm2671_vm9, %v2639_v1, %v2687_v38  ;;  %vm2672_vm11 = vcmp.gt.f32.partialorder %v2642_v42, 0.0  ;;  %v2688_v50 = vmul.f32 0.2, %v2642_v42  ;;  %3927 = vmatpush1.bf16.msra.mxu1 %v6189_v2  ;;  %v6207_v1 = vld [vmem:[%s8941_s6 + $0xb0] ss:$8 sps:$4 sm:$0xff]  }
 0x499   : > { %v2720_v23 = vmul.f32 %v7742_v40, %v2703_v7  ;;  %v2701_v54 = vsel %vm2669_vm10, %v2631_v10, %v2685_v56  ;;  %vm2670_vm12 = vcmp.gt.f32.partialorder %v2634_v6, 0.0  ;;  %v2686_v37 = vmul.f32 0.2, %v2634_v6  ;;  %3928 = vmatprep.subr.bf16.mxu1 %v6194_v18  ;;  %v6212_v10 = vld [vmem:[%s8941_s6 + $0xc4] ss:$8 sps:$4 sm:$0xff]  }
 0x49a   : > { %v2718_v46 = vmul.f32 %v7742_v40, %v2701_v54  ;;  %v2704_v45 = vsel %vm2672_vm11, %v2642_v42, %v2688_v50  ;;  %5371 = vmatmul.mubr.msk.bf16.gmra.mrb[92].mxu1 %vm2870_vm4, %v2746_v25  ;;  %5379 = vmatmul.mubr.msk.bf16.gmra.mrb[76].mxu0 %vm2870_vm4, %v2746_v25  ;;  %v6209_v25 = vld [vmem:[%s8941_s6 + $0xb4] ss:$8 sps:$4 sm:$0xff]   ;;  %v6210_v42 = vld [vmem:[%s8941_s6 + $0xc0] ss:$8 sps:$4 sm:$0xff]   ;;  %v6218_v56 = vld [vmem:[%s8941_s6 + $0xe4] ss:$8 sps:$4 sm:$0xff]  }
 0x49b   : > { %v2721_v55 = vmul.f32 %v7742_v40, %v2704_v45  ;;  %v2702_v41 = vsel %vm2670_vm12, %v2634_v6, %v2686_v37  ;;  %2967 = vmatprep.mubr.bf16.mxu1 %v6526_v0  ;;  %3080 = vmatprep.mubr.bf16.mxu0 %v6526_v0  ;;  %v2737_v51 = vadd.f32 %v7747_v57, %v2720_v23  ;;  %v6221_v6 = vld [vmem:[%s8941_s6 + $0xf4] ss:$8 sps:$4 sm:$0xff]   ;;  %v6219_v7 = vld [vmem:[%s8941_s6 + $0xf0] ss:$8 sps:$4 sm:$0xff]   ;;  %v6224_v50 = vld [vmem:[%s8941_s6 + $0x104] ss:$8 sps:$4 sm:$0xff]  }
 0x49c   : > { %v2719_v11 = vmul.f32 %v7742_v40, %v2702_v41  ;;  %3929 = vmatpush1.bf16.msra.mxu1 %v6192_v13  ;;  %v2735_v52 = vadd.f32 %v7747_v57, %v2718_v46  ;;  %v5351_v13 = vld [vmem:[%s8945_s10 + $0x4] ss:$8 sm:$0xf] }
 0x49d   : > { %v2738_v5 = vadd.f32 %v7747_v57, %v2721_v55  ;;  %3930 = vmatprep.subr.bf16.mxu1 %v6197_v28  ;;  %v7922_v23 = vrot.slane %v5351_v13, %v7000_v29  ;;  %v3314_v54 = vld [vmem:[#allocation7 + $0x4] ss:$8 sm:$0xf]  ;;  %v7925_v37 = vrot.slane %v5351_v13, %v7021_v43  ;;  %v7928_v46 = vrot.slane %v5351_v13, %v7005_v31 }
 0x49e   : > { %v2736_v4 = vadd.f32 %v7747_v57, %v2719_v11  ;;  %v3401_v28 = vld [vmem:[#allocation8 + $0x4] ss:$8 sm:$0xf]  ;;  %v7931_v45 = vrot.slane %v5351_v13, %v7024_v47  ;;  %v7934_v41 = vrot.slane %v3314_v54, %v7000_v29 }
 0x49f   : > { %v2748_v36 = vpack.c.bf16 %v2738_v5, %v2737_v51  ;;  %v7940_v51 = vrot.slane %v3314_v54, %v7005_v31  ;;  %v7943_v5 = vrot.slane %v3314_v54, %v7024_v47 }
 0x4a0   : > { %v2747_v14 = vpack.c.bf16 %v2736_v4, %v2735_v52  ;;  %3931 = vmatpush1.bf16.msra.mxu1 %v6195_v27  ;;  %v7937_v27 = vrot.slane %v3314_v54, %v7021_v43  ;;  %v7947_v52 = vrot.slane %v3401_v28, %v7000_v29 }
 0x4a1   : > { %3932 = vmatprep.subr.bf16.mxu1 %v6200_v19 }
 0x4a2   : > { %5372 = vmatmul.mubr.msk.bf16.gmra.mrb[96].mxu1 %vm2870_vm4, %v2747_v14  ;;  %5380 = vmatmul.mubr.msk.bf16.gmra.mrb[80].mxu0 %vm2870_vm4, %v2747_v14 }
 0x4a3   : > { %v5693_v17 = vpop.f32.mrb[76].mxu1  ;;  %2977 = vmatprep.mubr.bf16.mxu1 %v6526_v0  ;;  %3090 = vmatprep.mubr.bf16.mxu0 %v6526_v0 }
 0x4a4   : > { %v2655_v22 = vadd.f32 %v5693_v17, %v7738_v21  ;;  %v2646_v59 = vpop.f32.mrb[77].mxu1  ;;  %3933 = vmatpush1.bf16.msra.mxu1 %v6198_v20 }
 0x4a5   : > { %v2647_v60 = vadd.f32 %v2646_v59, %v7738_v21  ;;  %v5694_v16 = vpop.f32.mrb[78].mxu1  ;;  %3934 = vmatprep.subr.bf16.mxu1 %v6203_v48 }
 0x4a6   : > { %vm2675_vm13 = vcmp.gt.f32.partialorder %v2655_v22, 0.0  ;;  %v2691_v34 = vmul.f32 0.2, %v2655_v22  ;;  %v2658_v44 = vadd.f32 %v5694_v16, %v7738_v21  ;;  %v2649_v32 = vpop.f32.mrb[79].mxu1 }
 0x4a7   : > { %vm2673_vm14 = vcmp.gt.f32.partialorder %v2647_v60, 0.0  ;;  %v2689_v3 = vmul.f32 0.2, %v2647_v60  ;;  %v2650_v15 = vadd.f32 %v2649_v32, %v7738_v21 }
 0x4a8   : > { %v2707_v8 = vsel %vm2675_vm13, %v2655_v22, %v2691_v34  ;;  %vm2676_vm15 = vcmp.gt.f32.partialorder %v2658_v44, 0.0  ;;  %v2692_v63 = vmul.f32 0.2, %v2658_v44  ;;  %3935 = vmatpush1.bf16.msra.mxu1 %v6201_v58  ;;  %v7956_v58 = vrot.slane %v3401_v28, %v7005_v31 }
 0x4a9   : > { %v2724_v12 = vmul.f32 %v7742_v40, %v2707_v8  ;;  %v2705_v53 = vsel %vm2673_vm14, %v2647_v60, %v2689_v3  ;;  %vm2674_vm0 = vcmp.gt.f32.partialorder %v2650_v15, 0.0  ;;  %v2690_v61 = vmul.f32 0.2, %v2650_v15  ;;  %3936 = vmatprep.subr.bf16.mxu1 %v6206_v30 }
 0x4aa   : > { %v2722_v21 = vmul.f32 %v7742_v40, %v2705_v53  ;;  %v2708_v62 = vsel %vm2676_vm15, %v2658_v44, %v2692_v63  ;;  %5373 = vmatmul.mubr.msk.bf16.gmra.mrb[100].mxu1 %vm2870_vm4, %v2748_v36  ;;  %5381 = vmatmul.mubr.msk.bf16.gmra.mrb[84].mxu0 %vm2870_vm4, %v2748_v36  ;;  %v7951_v36 = vrot.slane %v3401_v28, %v7021_v43 }
 0x4ab   : > { %v2725_v33 = vmul.f32 %v7742_v40, %v2708_v62  ;;  %v2706_v24 = vsel %vm2674_vm0, %v2650_v15, %v2690_v61  ;;  %2987 = vmatprep.mubr.bf16.mxu1 %v6526_v0  ;;  %3100 = vmatprep.mubr.bf16.mxu0 %v6526_v0  ;;  %v2741_v9 = vadd.f32 %v7747_v57, %v2724_v12 }
 0x4ac   : > { %v2723_v35 = vmul.f32 %v7742_v40, %v2706_v24  ;;  %3937 = vmatpush1.bf16.msra.mxu1 %v6204_v26  ;;  %v2739_v49 = vadd.f32 %v7747_v57, %v2722_v21  ;;  %v7959_v60 = vrot.slane %v3401_v28, %v7024_v47 }
 0x4ad   : > { %v2742_v2 = vadd.f32 %v7747_v57, %v2725_v33  ;;  %3938 = vmatprep.subr.bf16.mxu1 %v6209_v25 }
 0x4ae   : > { %v2740_v18 = vadd.f32 %v7747_v57, %v2723_v35  ;;  %v6215_v57 = vld [vmem:[%s8941_s6 + $0xd4] ss:$8 sps:$4 sm:$0xff]  }
 0x4af   : > { %v2750_v38 = vpack.c.bf16 %v2742_v2, %v2741_v9 }
 0x4b0   : > { %v2749_v40 = vpack.c.bf16 %v2740_v18, %v2739_v49  ;;  %3939 = vmatpush1.bf16.msra.mxu1 %v6207_v1 }
 0x4b1   : > { %3940 = vmatprep.subr.bf16.mxu1 %v6212_v10 }
 0x4b2   : > { %5374 = vmatmul.mubr.msk.bf16.gmra.mrb[104].mxu1 %vm2870_vm4, %v2749_v40  ;;  %5382 = vmatmul.mubr.msk.bf16.gmra.mrb[88].mxu0 %vm2870_vm4, %v2749_v40 }
 0x4b3   : > { %2997 = vmatprep.mubr.bf16.mxu1 %v6526_v0  ;;  %3110 = vmatprep.mubr.bf16.mxu0 %v6526_v0  ;;  %v6216_v0 = vld [vmem:[%s8941_s6 + $0xe0] ss:$8 sps:$4 sm:$0xff]  }
 0x4b4   : > { %3941 = vmatpush1.bf16.msra.mxu1 %v6210_v42 }
 0x4b5   : > { %3942 = vmatprep.subr.bf16.mxu1 %v6215_v57 }
 0x4b8   : > { %3943 = vmatpush1.bf16.msra.mxu1 %v6213_v39 }
 0x4b9   : > { %3944 = vmatprep.subr.bf16.mxu1 %v6218_v56 }
 0x4ba   : > { %5375 = vmatmul.mubr.msk.bf16.gmra.mrb[108].mxu1 %vm2870_vm4, %v2750_v38  ;;  %5383 = vmatmul.mubr.msk.bf16.gmra.mrb[92].mxu0 %vm2870_vm4, %v2750_v38 }
 0x4bc   : > { %3945 = vmatpush1.bf16.msra.mxu1 %v6216_v0 }
 0x4bd   : > { %3946 = vmatprep.subr.bf16.mxu1 %v6221_v6 }
 0x4c0   : > { %3947 = vmatpush1.bf16.msra.mxu1 %v6219_v7 }
 0x4c1   : > { %4029 = vmatprep.subr.bf16.mxu1 %v6224_v50 }
 0x555   : > { %v2929_v55 = vpop.f32.mrb[80].mxu1  ;;  %v3042_v11 = vpop.f32.mrb[64].mxu0 }
 0x556   : > { %v2930_v19 = vadd.f32 %v2929_v55, %v7922_v23  ;;  %v3043_v4 = vadd.f32 %v3042_v11, %v7925_v37  ;;  %v2931_v14 = vpop.f32.mrb[81].mxu1  ;;  %v3044_v20 = vpop.f32.mrb[65].mxu0 }
 0x557   : > { %v2932_v48 = vadd.f32 %v2931_v14, %v7928_v46  ;;  %v3045_v17 = vadd.f32 %v3044_v20, %v7931_v45  ;;  %v2933_v22 = vpop.f32.mrb[82].mxu1  ;;  %v3046_v59 = vpop.f32.mrb[66].mxu0 }
 0x558   : > { %vm3121_vm1 = vcmp.gt.f32.partialorder %v2930_v19, 0.0  ;;  %v3185_v16 = vmul.f32 0.2, %v2930_v19  ;;  %vm3123_vm2 = vcmp.gt.f32.partialorder %v3043_v4, 0.0  ;;  %v3187_v30 = vmul.f32 0.2, %v3043_v4 }
 0x559   : > { %vm3122_vm3 = vcmp.gt.f32.partialorder %v2932_v48, 0.0  ;;  %v3186_v43 = vmul.f32 0.2, %v2932_v48  ;;  %vm3124_vm5 = vcmp.gt.f32.partialorder %v3045_v17, 0.0  ;;  %v3188_v34 = vmul.f32 0.2, %v3045_v17 }
 0x55a   : > { %v3249_v44 = vsel %vm3121_vm1, %v2930_v19, %v3185_v16  ;;  %v3251_v32 = vsel %vm3123_vm2, %v3043_v4, %v3187_v30  ;;  %v2934_v3 = vadd.f32 %v2933_v22, %v7922_v23  ;;  %v3047_v15 = vadd.f32 %v3046_v59, %v7925_v37  ;;  %v2935_v8 = vpop.f32.mrb[83].mxu1  ;;  %v3048_v63 = vpop.f32.mrb[67].mxu0 }
 0x55b   : > { %v3336_v26 = vmul.f32 %v7934_v41, %v3249_v44  ;;  %v3338_v47 = vmul.f32 %v7937_v27, %v3251_v32  ;;  %v3250_v12 = vsel %vm3122_vm3, %v2932_v48, %v3186_v43  ;;  %v3252_v53 = vsel %vm3124_vm5, %v3045_v17, %v3188_v34 }
 0x55c   : > { %v3337_v61 = vmul.f32 %v7940_v51, %v3250_v12  ;;  %v7967_v25 = vmul.f32 %v7943_v5, %v3252_v53  ;;  %vm3125_vm6 = vcmp.gt.f32.partialorder %v2934_v3, 0.0  ;;  %v3189_v21 = vmul.f32 0.2, %v2934_v3 }
 0x55d   : > { %v7970_v62 = vadd.f32 %v7947_v52, %v3336_v26  ;;  %v7973_v33 = vadd.f32 %v7951_v36, %v3338_v47  ;;  %vm3127_vm7 = vcmp.gt.f32.partialorder %v3047_v15, 0.0  ;;  %v3191_v24 = vmul.f32 0.2, %v3047_v15  ;;  %v2939_v35 = vpop.f32.mrb[84].mxu1  ;;  %v3052_v1 = vpop.f32.mrb[68].mxu0 }
 0x55e   : > { %v3253_v9 = vsel %vm3125_vm6, %v2934_v3, %v3189_v21  ;;  %v2936_v2 = vadd.f32 %v2935_v8, %v7928_v46  ;;  %v3049_v10 = vadd.f32 %v3048_v63, %v7931_v45  ;;  %v2940_v49 = vadd.f32 %v2939_v35, %v7922_v23  ;;  %v2941_v18 = vpop.f32.mrb[85].mxu1  ;;  %v3054_v38 = vpop.f32.mrb[69].mxu0 }
 0x55f   : > { %8998 = vst [vmem:[#allocation24_spill] sm:$0xff] %v7973_v33  ;;  %v3340_v40 = vmul.f32 %v7934_v41, %v3253_v9  ;;  %v3255_v42 = vsel %vm3127_vm7, %v3047_v15, %v3191_v24  ;;  %v3053_v57 = vadd.f32 %v3052_v1, %v7925_v37  ;;  %v2942_v39 = vadd.f32 %v2941_v18, %v7928_v46  ;;  %v2943_v56 = vpop.f32.mrb[86].mxu1  ;;  %v3056_v0 = vpop.f32.mrb[70].mxu0 }
 0x560   : > { %v3342_v6 = vmul.f32 %v7937_v27, %v3255_v42  ;;  %vm3126_vm8 = vcmp.gt.f32.partialorder %v2936_v2, 0.0  ;;  %v3190_v7 = vmul.f32 0.2, %v2936_v2  ;;  %vm3128_vm9 = vcmp.gt.f32.partialorder %v3049_v10, 0.0  ;;  %v2945_v50 = vpop.f32.mrb[87].mxu1  ;;  %v3058_v13 = vpop.f32.mrb[71].mxu0 }
 0x561   : > { %v7983_v54 = vadd.f32 %v7947_v52, %v3340_v40  ;;  %v3192_v28 = vmul.f32 0.2, %v3049_v10  ;;  %vm3129_vm10 = vcmp.gt.f32.partialorder %v2940_v49, 0.0  ;;  %v3193_v55 = vmul.f32 0.2, %v2940_v49 }
 0x562   : > { %v7986_v11 = vadd.f32 %v7951_v36, %v3342_v6  ;;  %v3254_v19 = vsel %vm3126_vm8, %v2936_v2, %v3190_v7  ;;  %vm3131_vm11 = vcmp.gt.f32.partialorder %v3053_v57, 0.0  ;;  %v3195_v4 = vmul.f32 0.2, %v3053_v57 }
 0x563   : > { %v3487_v14 = vpack.c.bf16 %v7983_v54, %v7970_v62  ;;  %v3341_v20 = vmul.f32 %v7940_v51, %v3254_v19  ;;  %v3256_v48 = vsel %vm3128_vm9, %v3049_v10, %v3192_v28  ;;  %v3257_v17 = vsel %vm3129_vm10, %v2940_v49, %v3193_v55 }
 0x564   : > { %8999 = vst [vmem:[#allocation25_spill] sm:$0xff] %v7986_v11  ;;  %v7994_v59 = vmul.f32 %v7943_v5, %v3256_v48  ;;  %v7997_v16 = vmul.f32 %v7934_v41, %v3257_v17  ;;  %v3259_v30 = vsel %vm3131_vm11, %v3053_v57, %v3195_v4  ;;  %vm3130_vm12 = vcmp.gt.f32.partialorder %v2942_v39, 0.0  ;;  %v6222_v4 = vld [vmem:[%s8941_s6 + $0x100] ss:$8 sps:$4 sm:$0xff]   ;;  %v6227_v17 = vld [vmem:[%s8941_s6 + $0x114] ss:$8 sps:$4 sm:$0xff]  }
 0x565   : > { %v8000_v43 = vmul.f32 %v7937_v27, %v3259_v30  ;;  %v3194_v34 = vmul.f32 0.2, %v2942_v39  ;;  %v3055_v44 = vadd.f32 %v3054_v38, %v7931_v45  ;;  %v2949_v32 = vpop.f32.mrb[88].mxu1  ;;  %v3062_v3 = vpop.f32.mrb[72].mxu0  ;;  %v2944_v15 = vadd.f32 %v2943_v56, %v7922_v23 }
 0x566   : > { %v3057_v8 = vadd.f32 %v3056_v0, %v7925_v37  ;;  %v2946_v63 = vadd.f32 %v2945_v50, %v7928_v46  ;;  %v3059_v26 = vadd.f32 %v3058_v13, %v7931_v45  ;;  %v2951_v47 = vpop.f32.mrb[89].mxu1  ;;  %v3064_v12 = vpop.f32.mrb[73].mxu0  ;;  %v3424_v24 = vadd.f32 %v7956_v58, %v3337_v61 }
 0x567   : > { %v3258_v53 = vsel %vm3130_vm12, %v2942_v39, %v3194_v34  ;;  %vm3132_vm13 = vcmp.gt.f32.partialorder %v3055_v44, 0.0  ;;  %v3196_v21 = vmul.f32 0.2, %v3055_v44  ;;  %v2953_v35 = vpop.f32.mrb[90].mxu1  ;;  %v3066_v1 = vpop.f32.mrb[74].mxu0  ;;  %vm3133_vm14 = vcmp.gt.f32.partialorder %v2944_v15, 0.0 }
 0x568   : > { %v8009_v9 = vmul.f32 %v7940_v51, %v3258_v53  ;;  %v3197_v2 = vmul.f32 0.2, %v2944_v15  ;;  %vm3135_vm15 = vcmp.gt.f32.partialorder %v3057_v8, 0.0  ;;  %v2955_v10 = vpop.f32.mrb[91].mxu1  ;;  %v3068_v49 = vpop.f32.mrb[75].mxu0  ;;  %vm3134_vm0 = vcmp.gt.f32.partialorder %v2946_v63, 0.0 }
 0x569   : > { %v3260_v18 = vsel %vm3132_vm13, %v3055_v44, %v3196_v21  ;;  %v3199_v38 = vmul.f32 0.2, %v3057_v8  ;;  %v3198_v40 = vmul.f32 0.2, %v2946_v63  ;;  %vm3136_vm1 = vcmp.gt.f32.partialorder %v3059_v26, 0.0 }
 0x56a   : > { %v8012_v42 = vmul.f32 %v7943_v5, %v3260_v18  ;;  %v3261_v57 = vsel %vm3133_vm14, %v2944_v15, %v3197_v2  ;;  %v3200_v61 = vmul.f32 0.2, %v3059_v26  ;;  %v3428_v6 = vadd.f32 %v7956_v58, %v3341_v20 }
 0x56b   : > { %v8015_v39 = vmul.f32 %v7934_v41, %v3261_v57  ;;  %v3263_v56 = vsel %vm3135_vm15, %v3057_v8, %v3199_v38  ;;  %v3262_v0 = vsel %vm3134_vm0, %v2946_v63, %v3198_v40  ;;  %v2950_v28 = vadd.f32 %v2949_v32, %v7922_v23  ;;  %v6225_v38 = vld [vmem:[%s8941_s6 + $0x110] ss:$8 sps:$4 sm:$0xff]  }
 0x56c   : > { %v8019_v7 = vmul.f32 %v7937_v27, %v3263_v56  ;;  %v3349_v50 = vmul.f32 %v7940_v51, %v3262_v0  ;;  %v3264_v13 = vsel %vm3136_vm1, %v3059_v26, %v3200_v61  ;;  %v3488_v19 = vpack.c.bf16 %v3428_v6, %v3424_v24  ;;  %v6230_v56 = vld [vmem:[%s8941_s6 + $0x124] ss:$8 sps:$4 sm:$0xff]  }
 0x56d   : > { %v8024_v55 = vmul.f32 %v7943_v5, %v3264_v13  ;;  %v3063_v48 = vadd.f32 %v3062_v3, %v7925_v37  ;;  %v2952_v20 = vadd.f32 %v2951_v47, %v7928_v46  ;;  %v2959_v30 = vpop.f32.mrb[92].mxu1  ;;  %v3072_v34 = vpop.f32.mrb[76].mxu0  ;;  %vm3137_vm2 = vcmp.gt.f32.partialorder %v2950_v28, 0.0 }
 0x56e   : > { %v3201_v44 = vmul.f32 0.2, %v2950_v28  ;;  %v3065_v32 = vadd.f32 %v3064_v12, %v7931_v45  ;;  %v2954_v15 = vadd.f32 %v2953_v35, %v7922_v23  ;;  %v8036_v8 = vpop.f32.mrb[93].mxu1  ;;  %v8038_v63 = vpop.f32.mrb[77].mxu0  ;;  %3948 = vmatprep.mubr.bf16.mxu1 %v3488_v19  ;;  %v3067_v61 = vadd.f32 %v3066_v1, %v7925_v37 }
 0x56f   : > { %vm3139_vm3 = vcmp.gt.f32.partialorder %v3063_v48, 0.0  ;;  %v3203_v3 = vmul.f32 0.2, %v3063_v48  ;;  %vm3138_vm5 = vcmp.gt.f32.partialorder %v2952_v20, 0.0  ;;  %v3202_v26 = vmul.f32 0.2, %v2952_v20  ;;  %3949 = vmatmul.mubr.bf16.vlgmr.msra.gmra.mrb[112].mxu1 %v3487_v14 }
 0x570   : > { %v3265_v47 = vsel %vm3137_vm2, %v2950_v28, %v3201_v44  ;;  %vm3140_vm6 = vcmp.gt.f32.partialorder %v3065_v32, 0.0  ;;  %v3204_v53 = vmul.f32 0.2, %v3065_v32  ;;  %vm3141_vm7 = vcmp.gt.f32.partialorder %v2954_v15, 0.0  ;;  %v2963_v12 = vpop.f32.mrb[94].mxu1  ;;  %v3076_v21 = vpop.f32.mrb[78].mxu0  ;;  %4030 = vmatpush1.bf16.msra.mxu1 %v6222_v4 }
 0x571   : > { %v8044_v24 = vmul.f32 %v7934_v41, %v3265_v47  ;;  %v3267_v35 = vsel %vm3139_vm3, %v3063_v48, %v3203_v3  ;;  %v3266_v2 = vsel %vm3138_vm5, %v2952_v20, %v3202_v26  ;;  %v3205_v18 = vmul.f32 0.2, %v2954_v15  ;;  %v2965_v40 = vpop.f32.mrb[95].mxu1  ;;  %v8049_v57 = vpop.f32.mrb[79].mxu0  ;;  %4031 = vmatprep.subr.bf16.mxu1 %v6227_v17  ;;  %v6228_v48 = vld [vmem:[%s8941_s6 + $0x120] ss:$8 sps:$4 sm:$0xff]  }
 0x572   : > { %v8052_v62 = vmul.f32 %v7937_v27, %v3267_v35  ;;  %v8055_v54 = vmul.f32 %v7940_v51, %v3266_v2  ;;  %v3268_v14 = vsel %vm3140_vm6, %v3065_v32, %v3204_v53  ;;  %v2956_v13 = vadd.f32 %v2955_v10, %v7928_v46 }
 0x573   : > { %v8062_v0 = vmul.f32 %v7943_v5, %v3268_v14  ;;  %v3269_v6 = vsel %vm3141_vm7, %v2954_v15, %v3205_v18  ;;  %v3069_v28 = vadd.f32 %v3068_v49, %v7931_v45  ;;  %vm3143_vm8 = vcmp.gt.f32.partialorder %v3067_v61, 0.0 }
 0x574   : > { %9000 = vst [vmem:[#allocation26_spill] sm:$0xff] %v8052_v62  ;;  %v8068_v19 = vmul.f32 %v7934_v41, %v3269_v6  ;;  %v3207_v4 = vmul.f32 0.2, %v3067_v61  ;;  %v3432_v1 = vadd.f32 %v7956_v58, %v8009_v9  ;;  %vm3142_vm9 = vcmp.gt.f32.partialorder %v2956_v13, 0.0  ;;  %4032 = vmatpush1.bf16.msra.mxu1 %v6225_v38  ;;  %v8319_v62 = vld [vmem:[#allocation5 + $0x68] sm:$0xff]  }
 0x575   : > { %v3206_v20 = vmul.f32 0.2, %v2956_v13  ;;  %vm3144_vm10 = vcmp.gt.f32.partialorder %v3069_v28, 0.0  ;;  %v3208_v17 = vmul.f32 0.2, %v3069_v28  ;;  %v3436_v49 = vadd.f32 %v7956_v58, %v3349_v50  ;;  %4033 = vmatprep.subr.bf16.mxu1 %v6230_v56  ;;  %v8078_v15 = vpop.f32.mrb[96].mxu1 }
 0x576   : > { %v3271_v10 = vsel %vm3143_vm8, %v3067_v61, %v3207_v4  ;;  %v2960_v44 = vadd.f32 %v2959_v30, %v7922_v23  ;;  %v3073_v32 = vadd.f32 %v3072_v34, %v7925_v37  ;;  %v8080_v9 = vpop.f32.mrb[80].mxu0  ;;  %v3431_v53 = vadd.f32 %v7947_v52, %v7997_v16  ;;  %v6233_v50 = vld [vmem:[%s8941_s6 + $0x134] ss:$8 sps:$4 sm:$0xff]   ;;  %v8090_v35 = vpop.f32.mrb[97].mxu1 }
 0x577   : > { %v8083_v3 = vmul.f32 %v7937_v27, %v3271_v10  ;;  %v3270_v26 = vsel %vm3142_vm9, %v2956_v13, %v3206_v20  ;;  %v3272_v47 = vsel %vm3144_vm10, %v3069_v28, %v3208_v17  ;;  %v8092_v30 = vpop.f32.mrb[81].mxu0  ;;  %v3492_v18 = vpack.c.bf16 %v3436_v49, %v3432_v1  ;;  %v8098_v38 = vpop.f32.mrb[98].mxu1  ;;  %v6231_v20 = vld [vmem:[%s8941_s6 + $0x130] ss:$8 sps:$4 sm:$0xff]  }
 0x578   : > { %v3357_v34 = vmul.f32 %v7940_v51, %v3270_v26  ;;  %v8096_v2 = vmul.f32 %v7943_v5, %v3272_v47  ;;  %vm3145_vm11 = vcmp.gt.f32.partialorder %v2960_v44, 0.0  ;;  %v8100_v14 = vpop.f32.mrb[82].mxu0  ;;  %v3209_v16 = vmul.f32 0.2, %v2960_v44  ;;  %4034 = vmatpush1.bf16.msra.mxu1 %v6228_v48  ;;  %v8104_v6 = vpop.f32.mrb[99].mxu1 }
 0x579   : > { %9001 = vst [vmem:[#allocation27_spill] sm:$0xff] %v8083_v3  ;;  %vm3147_vm12 = vcmp.gt.f32.partialorder %v3073_v32, 0.0  ;;  %v3211_v61 = vmul.f32 0.2, %v3073_v32  ;;  %v3435_v56 = vadd.f32 %v7947_v52, %v8015_v39  ;;  %3958 = vmatprep.mubr.bf16.mxu1 %v3492_v18  ;;  %v2962_v13 = vadd.f32 %v8036_v8, %v7928_v46  ;;  %v8115_v17 = vpop.f32.mrb[83].mxu0  ;;  %4035 = vmatprep.subr.bf16.mxu1 %v6233_v50 }
 0x57a   : > { %9002 = vst [vmem:[#allocation28_spill] sm:$0xff] %v8096_v2  ;;  %v3075_v28 = vadd.f32 %v8038_v63, %v7931_v45  ;;  %v2964_v4 = vadd.f32 %v2963_v12, %v7922_v23  ;;  %v3077_v1 = vadd.f32 %v3076_v21, %v7925_v37  ;;  %v3273_v39 = vsel %vm3145_vm11, %v2960_v44, %v3209_v16  ;;  %v6236_v8 = vld [vmem:[%s8941_s6 + $0x144] ss:$8 sps:$4 sm:$0xff]   ;;  %v6234_v44 = vld [vmem:[%s8941_s6 + $0x140] ss:$8 sps:$4 sm:$0xff]  }
 0x57b   : > { %v3275_v48 = vsel %vm3147_vm12, %v3073_v32, %v3211_v61  ;;  %v3491_v10 = vpack.c.bf16 %v3435_v56, %v3431_v53  ;;  %v2966_v49 = vadd.f32 %v2965_v40, %v7928_v46  ;;  %v8123_v63 = vmul.f32 %v7934_v41, %v3273_v39  ;;  %v6239_v26 = vld [vmem:[%s8941_s6 + $0x154] ss:$8 sps:$4 sm:$0xff]  }
 0x57c   : > { %v8126_v12 = vmul.f32 %v7937_v27, %v3275_v48  ;;  %vm3146_vm13 = vcmp.gt.f32.partialorder %v2962_v13, 0.0  ;;  %v3210_v21 = vmul.f32 0.2, %v2962_v13  ;;  %vm3148_vm14 = vcmp.gt.f32.partialorder %v3075_v28, 0.0  ;;  %4036 = vmatpush1.bf16.msra.mxu1 %v6231_v20 }
 0x57d   : > { %3959 = vmatmul.mubr.bf16.gmra.mrb[116].mxu1 %v3491_v10  ;;  %v3212_v40 = vmul.f32 0.2, %v3075_v28  ;;  %vm3149_vm15 = vcmp.gt.f32.partialorder %v2964_v4, 0.0  ;;  %v3213_v32 = vmul.f32 0.2, %v2964_v4  ;;  %vm3151_vm0 = vcmp.gt.f32.partialorder %v3077_v1, 0.0  ;;  %4037 = vmatprep.subr.bf16.mxu1 %v6236_v8 }
 0x57e   : > { %9003 = vst [vmem:[#allocation29_spill] sm:$0xff] %v8126_v12  ;;  %v3274_v47 = vsel %vm3146_vm13, %v2962_v13, %v3210_v21  ;;  %v3215_v53 = vmul.f32 0.2, %v3077_v1  ;;  %vm3150_vm1 = vcmp.gt.f32.partialorder %v2966_v49, 0.0  ;;  %v8134_v50 = vpop.f32.mrb[100].mxu1  ;;  %v8136_v18 = vpop.f32.mrb[84].mxu0  ;;  %v3444_v31 = vadd.f32 %v7956_v58, %v3357_v34 }
 0x57f   : > { %v8139_v16 = vmul.f32 %v7940_v51, %v3274_v47  ;;  %v3276_v61 = vsel %vm3148_vm14, %v3075_v28, %v3212_v40  ;;  %v3277_v56 = vsel %vm3149_vm15, %v2964_v4, %v3213_v32  ;;  %v3214_v39 = vmul.f32 0.2, %v2966_v49  ;;  %v8141_v48 = vpop.f32.mrb[101].mxu1  ;;  %v8143_v10 = vpop.f32.mrb[85].mxu0  ;;  %v8145_v13 = vld [vmem:[#allocation5 + $0x40] sm:$0xff]   ;;  %v8162_v40 = vld [vmem:[#allocation5 + $0x48] sm:$0xff]  }
 0x580   : > { %v8147_v21 = vld [vmem:[#allocation5] sm:$0xff]   ;;  %v8150_v20 = vmul.f32 %v7943_v5, %v3276_v61  ;;  %v8153_v22 = vmul.f32 %v7934_v41, %v3277_v56  ;;  %v3279_v47 = vsel %vm3151_vm0, %v3077_v1, %v3215_v53  ;;  %v3079_v28 = vadd.f32 %v8049_v57, %v7931_v45  ;;  %v8158_v4 = vpop.f32.mrb[102].mxu1  ;;  %v8160_v8 = vpop.f32.mrb[86].mxu0  ;;  %9006 = vst [vmem:[#allocation32_spill] sm:$0xff] %v8162_v40  ;;  %v8185_v34 = vld [vmem:[#allocation5 + $0x8] sm:$0xff]  }
 0x581   : > { %9004 = vst [vmem:[#allocation30_spill] sm:$0xff] %v8147_v21  ;;  %v8165_v32 = vmul.f32 %v7937_v27, %v3279_v47  ;;  %v3278_v61 = vsel %vm3150_vm1, %v2966_v49, %v3214_v39  ;;  %v3440_v56 = vadd.f32 %v7956_v58, %v8055_v54  ;;  %v8171_v1 = vpop.f32.mrb[103].mxu1  ;;  %v8173_v53 = vpop.f32.mrb[87].mxu0  ;;  %5571 = vmatprep.subr.bf16.mxu0 %v8145_v13  ;;  %v6237_v54 = vld [vmem:[%s8941_s6 + $0x150] ss:$8 sps:$4 sm:$0xff]   ;;  %9008 = vst [vmem:[#allocation34_spill] sm:$0xff] %v8185_v34 }
 0x582   : > { %9005 = vst [vmem:[#allocation31_spill] sm:$0xff] %v8150_v20  ;;  %v8177_v57 = vmul.f32 %v7940_v51, %v3278_v61  ;;  %vm3152_vm2 = vcmp.gt.f32.partialorder %v3079_v28, 0.0  ;;  %v3216_v29 = vmul.f32 0.2, %v3079_v28  ;;  %v2970_v47 = vadd.f32 %v8078_v15, %v7922_v23  ;;  %4038 = vmatpush1.bf16.msra.mxu1 %v6234_v44  ;;  %5572 = vmatpush3.bf16.msra.mxu0 %v8147_v21  ;;  %v8308_v20 = vld [vmem:[#allocation5 + $0x20] sm:$0xff]  }
 0x583   : > { %9007 = vst [vmem:[#allocation33_spill] sm:$0xff] %v8165_v32  ;;  %v3496_v49 = vpack.c.bf16 %v3444_v31, %v3440_v56  ;;  %v3083_v39 = vadd.f32 %v8080_v9, %v7925_v37  ;;  %v3439_v61 = vadd.f32 %v7947_v52, %v8044_v24  ;;  %v3443_v33 = vadd.f32 %v7947_v52, %v8068_v19  ;;  %v6240_v31 = vld [vmem:[%s8941_s6 + $0x160] ss:$8 sps:$4 sm:$0xff]   ;;  %v6242_v9 = vld [vmem:[%s8941_s6 + $0x164] ss:$8 sps:$4 sm:$0xff]   ;;  %v8202_v24 = vld [vmem:[#allocation5 + $0x50] sm:$0xff]  }
 0x584   : > { %4039 = vmatprep.subr.bf16.mxu1 %v6239_v26  ;;  %v3280_v15 = vsel %vm3152_vm2, %v3079_v28, %v3216_v29  ;;  %vm3153_vm3 = vcmp.gt.f32.partialorder %v2970_v47, 0.0  ;;  %v3217_v44 = vmul.f32 0.2, %v2970_v47  ;;  %v2972_v11 = vadd.f32 %v8090_v35, %v7928_v46  ;;  %5573 = vmatprep.subr.bf16.mxu0 %v8162_v40  ;;  %9009 = vst [vmem:[#allocation35_spill] sm:$0xff] %v8202_v24 }
 0x585   : > { %v8205_v19 = vmul.f32 %v7943_v5, %v3280_v15  ;;  %3968 = vmatprep.mubr.bf16.mxu1 %v3496_v49  ;;  %vm3155_vm5 = vcmp.gt.f32.partialorder %v3083_v39, 0.0  ;;  %v3219_v29 = vmul.f32 0.2, %v3083_v39  ;;  %v3495_v26 = vpack.c.bf16 %v3443_v33, %v3439_v61  ;;  %v8207_v35 = vpop.f32.mrb[104].mxu1  ;;  %v8209_v28 = vpop.f32.mrb[88].mxu0  ;;  %v8218_v49 = vld [vmem:[#allocation5 + $0x10] sm:$0xff]  }
 0x586   : > { %v3281_v56 = vsel %vm3153_vm3, %v2970_v47, %v3217_v44  ;;  %vm3154_vm6 = vcmp.gt.f32.partialorder %v2972_v11, 0.0  ;;  %v3218_v21 = vmul.f32 0.2, %v2972_v11  ;;  %v3085_v32 = vadd.f32 %v8092_v30, %v7931_v45  ;;  %4040 = vmatpush1.bf16.msra.mxu1 %v6237_v54  ;;  %v8213_v40 = vpop.f32.mrb[105].mxu1  ;;  %v8215_v12 = vpop.f32.mrb[89].mxu0  ;;  %5574 = vmatpush3.bf16.msra.mxu0 %v8185_v34  ;;  %9011 = vst [vmem:[#allocation37_spill] sm:$0xff] %v8218_v49 }
 0x587   : > { %9010 = vst [vmem:[#allocation36_spill] sm:$0xff] %v8205_v19  ;;  %v8221_v33 = vmul.f32 %v7934_v41, %v3281_v56  ;;  %v3283_v61 = vsel %vm3155_vm5, %v3083_v39, %v3219_v29  ;;  %3969 = vmatmul.mubr.bf16.gmra.mrb[120].mxu1 %v3495_v26  ;;  %v2974_v47 = vadd.f32 %v8098_v38, %v7922_v23  ;;  %v6245_v54 = vld [vmem:[%s8941_s6 + $0x174] ss:$8 sps:$4 sm:$0xff]   ;;  %v8230_v15 = vpop.f32.mrb[106].mxu1  ;;  %v8232_v44 = vpop.f32.mrb[90].mxu0 }
 0x588   : > { %v3087_v30 = vadd.f32 %v8100_v14, %v7925_v37  ;;  %v8235_v34 = vmul.f32 %v7937_v27, %v3283_v61  ;;  %v3282_v39 = vsel %vm3154_vm6, %v2972_v11, %v3218_v21  ;;  %vm3156_vm7 = vcmp.gt.f32.partialorder %v3085_v32, 0.0  ;;  %4041 = vmatprep.subr.bf16.mxu1 %v6242_v9  ;;  %v8238_v38 = vpop.f32.mrb[107].mxu1  ;;  %v8240_v26 = vpop.f32.mrb[91].mxu0  ;;  %5575 = vmatprep.subr.bf16.mxu0 %v8202_v24  ;;  %v8243_v14 = vld [vmem:[#allocation5 + $0x58] sm:$0xff]  }
 0x589   : > { %v3220_v29 = vmul.f32 0.2, %v3085_v32  ;;  %9013 = vst [vmem:[#allocation39_spill] sm:$0xff] %v8243_v14  ;;  %v8246_v56 = vmul.f32 %v7940_v51, %v3282_v39  ;;  %vm3157_vm8 = vcmp.gt.f32.partialorder %v2974_v47, 0.0  ;;  %v3221_v19 = vmul.f32 0.2, %v2974_v47 }
 0x58a   : > { %9012 = vst [vmem:[#allocation38_spill] sm:$0xff] %v8235_v34  ;;  %vm3159_vm9 = vcmp.gt.f32.partialorder %v3087_v30, 0.0  ;;  %v3223_v34 = vmul.f32 0.2, %v3087_v30  ;;  %v2976_v11 = vadd.f32 %v8104_v6, %v7928_v46  ;;  %v3089_v21 = vadd.f32 %v8115_v17, %v7931_v45  ;;  %4042 = vmatpush1.bf16.msra.mxu1 %v6240_v31  ;;  %v6243_v9 = vld [vmem:[%s8941_s6 + $0x170] ss:$8 sps:$4 sm:$0xff]   ;;  %5576 = vmatpush3.bf16.msra.mxu0 %v8218_v49 }
 0x58b   : > { %v3284_v61 = vsel %vm3156_vm7, %v3085_v32, %v3220_v29  ;;  %v3285_v24 = vsel %vm3157_vm8, %v2974_v47, %v3221_v19  ;;  %v3448_v32 = vadd.f32 %v7956_v58, %v8139_v16  ;;  %v3452_v6 = vadd.f32 %v7956_v58, %v8177_v57  ;;  %4043 = vmatprep.subr.bf16.mxu1 %v6245_v54  ;;  %v6248_v49 = vld [vmem:[%s8941_s6 + $0x184] ss:$8 sps:$4 sm:$0xff]   ;;  %v8270_v19 = vld [vmem:[#allocation5 + $0x18] sm:$0xff]  }
 0x58c   : > { %v8257_v39 = vmul.f32 %v7943_v5, %v3284_v61  ;;  %v8264_v17 = vmul.f32 %v7934_v41, %v3285_v24  ;;  %v3287_v31 = vsel %vm3159_vm9, %v3087_v30, %v3223_v34  ;;  %vm3158_vm10 = vcmp.gt.f32.partialorder %v2976_v11, 0.0  ;;  %5577 = vmatprep.subr.bf16.mxu0 %v8243_v14  ;;  %v8279_v34 = vld [vmem:[#allocation5 + $0x60] sm:$0xff]  }
 0x58d   : > { %v3222_v29 = vmul.f32 0.2, %v2976_v11  ;;  %v8273_v16 = vmul.f32 %v7937_v27, %v3287_v31  ;;  %vm3160_vm11 = vcmp.gt.f32.partialorder %v3089_v21, 0.0  ;;  %v3224_v57 = vmul.f32 0.2, %v3089_v21  ;;  %v8275_v54 = vpop.f32.mrb[108].mxu1 }
 0x58e   : > { %9014 = vst [vmem:[#allocation40_spill] sm:$0xff] %v8257_v39  ;;  %v3500_v47 = vpack.c.bf16 %v3452_v6, %v3448_v32  ;;  %v8277_v24 = vpop.f32.mrb[92].mxu0  ;;  %9016 = vst [vmem:[#allocation42_spill] sm:$0xff] %v8279_v34  ;;  %v2980_v61 = vadd.f32 %v8134_v50, %v7922_v23  ;;  %v3093_v14 = vadd.f32 %v8136_v18, %v7925_v37  ;;  %4044 = vmatpush1.bf16.msra.mxu1 %v6243_v9  ;;  %v6246_v32 = vld [vmem:[%s8941_s6 + $0x180] ss:$8 sps:$4 sm:$0xff]   ;;  %v8290_v6 = vpop.f32.mrb[109].mxu1 }
 0x58f   : > { %9015 = vst [vmem:[#allocation41_spill] sm:$0xff] %v8273_v16  ;;  %v3286_v30 = vsel %vm3158_vm10, %v2976_v11, %v3222_v29  ;;  %v3447_v31 = vadd.f32 %v7947_v52, %v8123_v63  ;;  %v8292_v16 = vpop.f32.mrb[93].mxu0  ;;  %v3288_v29 = vsel %vm3160_vm11, %v3089_v21, %v3224_v57  ;;  %v3451_v50 = vadd.f32 %v7947_v52, %v8153_v22  ;;  %v6251_v18 = vld [vmem:[%s8941_s6 + $0x194] ss:$8 sps:$4 sm:$0xff]   ;;  %v8304_v9 = vpop.f32.mrb[110].mxu1 }
 0x590   : > { %v8295_v11 = vmul.f32 %v7940_v51, %v3286_v30  ;;  %3978 = vmatprep.mubr.bf16.mxu1 %v3500_v47  ;;  %v2982_v63 = vadd.f32 %v8141_v48, %v7928_v46  ;;  %v8306_v39 = vpop.f32.mrb[94].mxu0  ;;  %v8311_v30 = vmul.f32 %v7943_v5, %v3288_v29  ;;  %vm3161_vm12 = vcmp.gt.f32.partialorder %v2980_v61, 0.0  ;;  %4045 = vmatprep.subr.bf16.mxu1 %v6248_v49  ;;  %v8313_v22 = vpop.f32.mrb[111].mxu1 }
 0x591   : > { %v3225_v21 = vmul.f32 0.2, %v2980_v61  ;;  %vm3163_vm13 = vcmp.gt.f32.partialorder %v3093_v14, 0.0  ;;  %v8315_v48 = vpop.f32.mrb[95].mxu0  ;;  %5578 = vmatpush3.bf16.msra.mxu0 %v8270_v19  ;;  %v3227_v57 = vmul.f32 0.2, %v3093_v14  ;;  %v3499_v47 = vpack.c.bf16 %v3451_v50, %v3447_v31 }
 0x592   : > { %9017 = vst [vmem:[#allocation43_spill] sm:$0xff] %v8311_v30  ;;  %vm3162_vm14 = vcmp.gt.f32.partialorder %v2982_v63, 0.0  ;;  %v3226_v3 = vmul.f32 0.2, %v2982_v63  ;;  %5579 = vmatprep.subr.bf16.mxu0 %v8279_v34  ;;  %v3095_v30 = vadd.f32 %v8143_v10, %v7931_v45  ;;  %v2984_v49 = vadd.f32 %v8158_v4, %v7922_v23  ;;  %4046 = vmatpush1.bf16.msra.mxu1 %v6246_v32  ;;  %v6249_v31 = vld [vmem:[%s8941_s6 + $0x190] ss:$8 sps:$4 sm:$0xff]  }
 0x593   : > { %v3289_v29 = vsel %vm3161_vm12, %v2980_v61, %v3225_v21  ;;  %v3097_v2 = vadd.f32 %v8160_v8, %v7925_v37  ;;  %v3291_v34 = vsel %vm3163_vm13, %v3093_v14, %v3227_v57  ;;  %3979 = vmatmul.mubr.bf16.gmra.mrb[124].mxu1 %v3499_v47  ;;  %v2986_v10 = vadd.f32 %v8171_v1, %v7928_v46  ;;  %v6254_v4 = vld [vmem:[%s8941_s6 + $0x1a4] ss:$8 sps:$4 sm:$0xff]   ;;  %v6252_v57 = vld [vmem:[%s8941_s6 + $0x1a0] ss:$8 sps:$4 sm:$0xff]  }
 0x594   : > { %v8331_v50 = vmul.f32 %v7934_v41, %v3289_v29  ;;  %v3290_v61 = vsel %vm3162_vm14, %v2982_v63, %v3226_v3  ;;  %v8340_v8 = vmul.f32 %v7937_v27, %v3291_v34  ;;  %vm3164_vm15 = vcmp.gt.f32.partialorder %v3095_v30, 0.0  ;;  %4047 = vmatprep.subr.bf16.mxu1 %v6251_v18 }
 0x595   : > { %v8343_v32 = vmul.f32 %v7940_v51, %v3290_v61  ;;  %v3228_v21 = vmul.f32 0.2, %v3095_v30  ;;  %5580 = vmatpush3.bf16.msra.mxu0 %v8308_v20  ;;  %vm3165_vm0 = vcmp.gt.f32.partialorder %v2984_v49, 0.0  ;;  %v3229_v3 = vmul.f32 0.2, %v2984_v49 }
 0x596   : > { %vm3167_vm1 = vcmp.gt.f32.partialorder %v3097_v2, 0.0  ;;  %v3231_v14 = vmul.f32 0.2, %v3097_v2  ;;  %5581 = vmatprep.subr.bf16.mxu0 %v8319_v62  ;;  %vm3166_vm2 = vcmp.gt.f32.partialorder %v2986_v10, 0.0  ;;  %v3230_v63 = vmul.f32 0.2, %v2986_v10  ;;  %4048 = vmatpush1.bf16.msra.mxu1 %v6249_v31 }
 0x597   : > { %v3292_v1 = vsel %vm3164_vm15, %v3095_v30, %v3228_v21  ;;  %v3099_v34 = vadd.f32 %v8173_v53, %v7931_v45  ;;  %v3293_v47 = vsel %vm3165_vm0, %v2984_v49, %v3229_v3  ;;  %v3456_v61 = vadd.f32 %v7956_v58, %v8246_v56  ;;  %4049 = vmatprep.subr.bf16.mxu1 %v6254_v4  ;;  %v6257_v30 = vld [vmem:[%s8941_s6 + $0x1b4] ss:$8 sps:$4 sm:$0xff]  }
 0x598   : > { %v8353_v18 = vmul.f32 %v7943_v5, %v3292_v1  ;;  %v3295_v29 = vsel %vm3167_vm1, %v3097_v2, %v3231_v14  ;;  %v8361_v53 = vmul.f32 %v7934_v41, %v3293_v47  ;;  %v3294_v21 = vsel %vm3166_vm2, %v2986_v10, %v3230_v63 }
 0x599   : > { %v8364_v31 = vmul.f32 %v7937_v27, %v3295_v29  ;;  %vm3168_vm3 = vcmp.gt.f32.partialorder %v3099_v34, 0.0  ;;  %v3381_v1 = vmul.f32 %v7940_v51, %v3294_v21  ;;  %v3232_v49 = vmul.f32 0.2, %v3099_v34 }
 0x59a   : > { %v3460_v2 = vadd.f32 %v7956_v58, %v8295_v11  ;;  %v2990_v56 = vadd.f32 %v8207_v35, %v7922_v23  ;;  %v3103_v4 = vadd.f32 %v8209_v28, %v7925_v37  ;;  %v3455_v3 = vadd.f32 %v7947_v52, %v8221_v33  ;;  %4050 = vmatpush1.bf16.msra.mxu1 %v6252_v57  ;;  %v6255_v35 = vld [vmem:[%s8941_s6 + $0x1b0] ss:$8 sps:$4 sm:$0xff]  }
 0x59b   : > { %v3459_v14 = vadd.f32 %v7947_v52, %v8264_v17  ;;  %v2992_v10 = vadd.f32 %v8213_v40, %v7928_v46  ;;  %v3296_v63 = vsel %vm3168_vm3, %v3099_v34, %v3232_v49  ;;  %4051 = vmatprep.subr.bf16.mxu1 %v6257_v30  ;;  %v6260_v40 = vld [vmem:[%s8941_s6 + $0x1c4] ss:$8 sps:$4 sm:$0xff]   ;;  %v3105_v57 = vadd.f32 %v8215_v12, %v7931_v45  ;;  %v6258_v12 = vld [vmem:[%s8941_s6 + $0x1c0] ss:$8 sps:$4 sm:$0xff]  }
 0x59c   : > { %v3504_v47 = vpack.c.bf16 %v3460_v2, %v3456_v61  ;;  %vm3169_vm5 = vcmp.gt.f32.partialorder %v2990_v56, 0.0  ;;  %v3233_v11 = vmul.f32 0.2, %v2990_v56  ;;  %v8383_v28 = vmul.f32 %v7943_v5, %v3296_v63 }
 0x59d   : > { %vm3171_vm6 = vcmp.gt.f32.partialorder %v3103_v4, 0.0  ;;  %v3235_v33 = vmul.f32 0.2, %v3103_v4  ;;  %v3503_v29 = vpack.c.bf16 %v3459_v14, %v3455_v3  ;;  %vm3170_vm7 = vcmp.gt.f32.partialorder %v2992_v10, 0.0 }
 0x59e   : > { %3988 = vmatprep.mubr.bf16.mxu1 %v3504_v47  ;;  %v3297_v17 = vsel %vm3169_vm5, %v2990_v56, %v3233_v11  ;;  %v3234_v34 = vmul.f32 0.2, %v2992_v10  ;;  %v2994_v21 = vadd.f32 %v8230_v15, %v7922_v23  ;;  %v3107_v49 = vadd.f32 %v8232_v44, %v7925_v37  ;;  %4052 = vmatpush1.bf16.msra.mxu1 %v6255_v35  ;;  %v6263_v15 = vld [vmem:[%s8941_s6 + $0x1d4] ss:$8 sps:$4 sm:$0xff]  }
 0x59f   : > { %v8391_v61 = vmul.f32 %v7934_v41, %v3297_v17  ;;  %v3299_v30 = vsel %vm3171_vm6, %v3103_v4, %v3235_v33  ;;  %3989 = vmatmul.mubr.bf16.gmra.mrb[128].mxu1 %v3503_v29  ;;  %vm3172_vm8 = vcmp.gt.f32.partialorder %v3105_v57, 0.0  ;;  %v3236_v3 = vmul.f32 0.2, %v3105_v57  ;;  %4053 = vmatprep.subr.bf16.mxu1 %v6260_v40 }
 0x5a0   : > { %v8398_v2 = vmul.f32 %v7937_v27, %v3299_v30  ;;  %v3298_v56 = vsel %vm3170_vm7, %v2992_v10, %v3234_v34  ;;  %vm3173_vm9 = vcmp.gt.f32.partialorder %v2994_v21, 0.0  ;;  %v3237_v14 = vmul.f32 0.2, %v2994_v21 }
 0x5a1   : > { %v8404_v4 = vmul.f32 %v7940_v51, %v3298_v56  ;;  %vm3175_vm10 = vcmp.gt.f32.partialorder %v3107_v49, 0.0  ;;  %v3300_v44 = vsel %vm3172_vm8, %v3105_v57, %v3236_v3  ;;  %v3239_v10 = vmul.f32 0.2, %v3107_v49 }
 0x5a2   : > { %v2996_v63 = vadd.f32 %v8238_v38, %v7928_v46  ;;  %v3109_v47 = vadd.f32 %v8240_v26, %v7931_v45  ;;  %v8414_v11 = vmul.f32 %v7943_v5, %v3300_v44  ;;  %v3301_v35 = vsel %vm3173_vm9, %v2994_v21, %v3237_v14  ;;  %4054 = vmatpush1.bf16.msra.mxu1 %v6258_v12  ;;  %v6261_v38 = vld [vmem:[%s8941_s6 + $0x1d0] ss:$8 sps:$4 sm:$0xff]  }
 0x5a3   : > { %v3464_v33 = vadd.f32 %v7956_v58, %v8343_v32  ;;  %v3468_v29 = vadd.f32 %v7956_v58, %v3381_v1  ;;  %v8420_v40 = vmul.f32 %v7934_v41, %v3301_v35  ;;  %v3303_v17 = vsel %vm3175_vm10, %v3107_v49, %v3239_v10  ;;  %4055 = vmatprep.subr.bf16.mxu1 %v6263_v15  ;;  %v6266_v32 = vld [vmem:[%s8941_s6 + $0x1e4] ss:$8 sps:$4 sm:$0xff]  }
 0x5a4   : > { %vm3174_vm11 = vcmp.gt.f32.partialorder %v2996_v63, 0.0  ;;  %v3238_v34 = vmul.f32 0.2, %v2996_v63  ;;  %v8426_v26 = vmul.f32 %v7937_v27, %v3303_v17  ;;  %vm3176_vm12 = vcmp.gt.f32.partialorder %v3109_v47, 0.0 }
 0x5a5   : > { %v3240_v57 = vmul.f32 0.2, %v3109_v47  ;;  %v3508_v30 = vpack.c.bf16 %v3468_v29, %v3464_v33  ;;  %v3000_v21 = vadd.f32 %v8275_v54, %v7922_v23  ;;  %v3113_v49 = vadd.f32 %v8277_v24, %v7925_v37  ;;  %v6264_v54 = vld [vmem:[%s8941_s6 + $0x1e0] ss:$8 sps:$4 sm:$0xff]  }
 0x5a6   : > { %v3302_v1 = vsel %vm3174_vm11, %v2996_v63, %v3238_v34  ;;  %v3463_v56 = vadd.f32 %v7947_v52, %v8331_v50  ;;  %v3467_v14 = vadd.f32 %v7947_v52, %v8361_v53  ;;  %v3002_v15 = vadd.f32 %v8290_v6, %v7928_v46  ;;  %4056 = vmatpush1.bf16.msra.mxu1 %v6261_v38  ;;  %v6269_v50 = vld [vmem:[%s8941_s6 + $0x1f4] ss:$8 sps:$4 sm:$0xff]  }
 0x5a7   : > { %v3389_v3 = vmul.f32 %v7940_v51, %v3302_v1  ;;  %v3304_v12 = vsel %vm3176_vm12, %v3109_v47, %v3240_v57  ;;  %3998 = vmatprep.mubr.bf16.mxu1 %v3508_v30  ;;  %vm3177_vm13 = vcmp.gt.f32.partialorder %v3000_v21, 0.0  ;;  %v3241_v24 = vmul.f32 0.2, %v3000_v21  ;;  %4057 = vmatprep.subr.bf16.mxu1 %v6266_v32 }
 0x5a8   : > { %v8446_v44 = vmul.f32 %v7943_v5, %v3304_v12  ;;  %vm3179_vm14 = vcmp.gt.f32.partialorder %v3113_v49, 0.0  ;;  %v3243_v10 = vmul.f32 0.2, %v3113_v49  ;;  %v3507_v53 = vpack.c.bf16 %v3467_v14, %v3463_v56 }
 0x5a9   : > { %vm3178_vm15 = vcmp.gt.f32.partialorder %v3002_v15, 0.0  ;;  %v3242_v63 = vmul.f32 0.2, %v3002_v15  ;;  %v3305_v6 = vsel %vm3177_vm13, %v3000_v21, %v3241_v24  ;;  %v3115_v47 = vadd.f32 %v8292_v16, %v7931_v45 }
 0x5aa   : > { %v3004_v35 = vadd.f32 %v8304_v9, %v7922_v23  ;;  %v3117_v33 = vadd.f32 %v8306_v39, %v7925_v37  ;;  %v3392_v29 = vmul.f32 %v7934_v41, %v3305_v6  ;;  %v3307_v17 = vsel %vm3179_vm14, %v3113_v49, %v3243_v10  ;;  %3999 = vmatmul.mubr.bf16.gmra.mrb[132].mxu1 %v3507_v53  ;;  %v6267_v23 = vld [vmem:[%s8941_s6 + $0x1f0] ss:$8 sps:$4 sm:$0xff]  }
 0x5ab   : > { %v3306_v34 = vsel %vm3178_vm15, %v3002_v15, %v3242_v63  ;;  %v3006_v38 = vadd.f32 %v8313_v22, %v7928_v46  ;;  %v8461_v57 = vmul.f32 %v7937_v27, %v3307_v17  ;;  %vm3180_vm0 = vcmp.gt.f32.partialorder %v3115_v47, 0.0  ;;  %4058 = vmatpush1.bf16.msra.mxu1 %v6264_v54 }
 0x5ac   : > { %v3393_v30 = vmul.f32 %v7940_v51, %v3306_v34  ;;  %v3244_v16 = vmul.f32 0.2, %v3115_v47  ;;  %vm3181_vm1 = vcmp.gt.f32.partialorder %v3004_v35, 0.0  ;;  %v3245_v37 = vmul.f32 0.2, %v3004_v35  ;;  %4059 = vmatprep.subr.bf16.mxu1 %v6269_v50 }
 0x5ad   : > { %vm3183_vm2 = vcmp.gt.f32.partialorder %v3117_v33, 0.0  ;;  %v3247_v39 = vmul.f32 0.2, %v3117_v33  ;;  %vm3182_vm3 = vcmp.gt.f32.partialorder %v3006_v38, 0.0  ;;  %v3246_v46 = vmul.f32 0.2, %v3006_v38 }
 0x5ae   : > { %v3308_v9 = vsel %vm3180_vm0, %v3115_v47, %v3244_v16  ;;  %v3119_v22 = vadd.f32 %v8315_v48, %v7931_v45  ;;  %v3309_v1 = vsel %vm3181_vm1, %v3004_v35, %v3245_v37  ;;  %v3472_v49 = vadd.f32 %v7956_v58, %v8404_v4 }
 0x5af   : > { %v8470_v32 = vmul.f32 %v7943_v5, %v3308_v9  ;;  %v3311_v21 = vsel %vm3183_vm2, %v3117_v33, %v3247_v39  ;;  %v3396_v56 = vmul.f32 %v7934_v41, %v3309_v1  ;;  %v3310_v14 = vsel %vm3182_vm3, %v3006_v38, %v3246_v46  ;;  %4060 = vmatpush1.bf16.msra.mxu1 %v6267_v23  ;;  %v9024_v39 = vld [vmem:[#allocation33_spill] sm:$0xff]  ;;  %v9025_v46 = vld [vmem:[#allocation40_spill] sm:$0xff]  ;;  %v9026_v1 = vld [vmem:[#allocation43_spill] sm:$0xff] }
 0x5b0   : > { %v8476_v12 = vmul.f32 %v7937_v27, %v3311_v21  ;;  %vm3184_vm5 = vcmp.gt.f32.partialorder %v3119_v22, 0.0  ;;  %v3397_v15 = vmul.f32 %v7940_v51, %v3310_v14  ;;  %v3248_v54 = vmul.f32 0.2, %v3119_v22  ;;  %5751 = vmatprep.subr.bf16.mxu1 %v8145_v13 }
 0x5b1   : > { %v3476_v45 = vadd.f32 %v7956_v58, %v3389_v3  ;;  %v3471_v48 = vadd.f32 %v7947_v52, %v8391_v61  ;;  %v3475_v4 = vadd.f32 %v7947_v52, %v8420_v40  ;;  %v3480_v41 = vadd.f32 %v7956_v58, %v3393_v30 }
 0x5b2   : > { %v3479_v27 = vadd.f32 %v7947_v52, %v3392_v29  ;;  %v3483_v24 = vadd.f32 %v7947_v52, %v3396_v56  ;;  %v3312_v50 = vsel %vm3184_vm5, %v3119_v22, %v3248_v54  ;;  %v3484_v51 = vadd.f32 %v7956_v58, %v3397_v15  ;;  %v9027_v56 = vld [vmem:[#allocation38_spill] sm:$0xff]  ;;  %v9028_v15 = vld [vmem:[#allocation41_spill] sm:$0xff] }
 0x5b3   : > { %v3512_v10 = vpack.c.bf16 %v3476_v45, %v3472_v49  ;;  %v3426_v3 = vadd.f32 %v7959_v60, %v7967_v25  ;;  %v3399_v61 = vmul.f32 %v7943_v5, %v3312_v50  ;;  %v3511_v53 = vpack.c.bf16 %v3475_v4, %v3471_v48 }
 0x5b4   : > { %v3515_v13 = vpack.c.bf16 %v3483_v24, %v3479_v27  ;;  %v3430_v40 = vadd.f32 %v7959_v60, %v7994_v59  ;;  %v3516_v63 = vpack.c.bf16 %v3484_v51, %v3480_v41  ;;  %v3434_v6 = vadd.f32 %v7959_v60, %v8012_v42  ;;  %v9018_v59 = vld [vmem:[#allocation28_spill] sm:$0xff]  ;;  %v9019_v42 = vld [vmem:[#allocation26_spill] sm:$0xff] }
 0x5b5   : > { %4008 = vmatprep.mubr.bf16.mxu1 %v3512_v10  ;;  %v3438_v52 = vadd.f32 %v7959_v60, %v8024_v55  ;;  %v3433_v58 = vadd.f32 %v7951_v36, %v8000_v43  ;;  %v3437_v5 = vadd.f32 %v7951_v36, %v8019_v7  ;;  %v3442_v47 = vadd.f32 %v7959_v60, %v8062_v0  ;;  %v9020_v55 = vld [vmem:[#allocation27_spill] sm:$0xff]  ;;  %v9022_v7 = vld [vmem:[#allocation36_spill] sm:$0xff]  ;;  %v9023_v0 = vld [vmem:[#allocation29_spill] sm:$0xff] }
 0x5b6   : > { %4009 = vmatmul.mubr.bf16.gmra.mrb[136].mxu1 %v3511_v53  ;;  %v3490_v25 = vpack.c.bf16 %v3430_v40, %v3426_v3  ;;  %v3446_v35 = vadd.f32 %v7959_v60, %v9018_v59  ;;  %v3441_v29 = vadd.f32 %v7951_v36, %v9019_v42  ;;  %v3445_v17 = vadd.f32 %v7951_v36, %v9020_v55  ;;  %v9021_v43 = vld [vmem:[#allocation31_spill] sm:$0xff] }
 0x5b7   : > { %4018 = vmatprep.mubr.bf16.mxu1 %v3516_v63  ;;  %v3494_v33 = vpack.c.bf16 %v3438_v52, %v3434_v6  ;;  %v3450_v34 = vadd.f32 %v7959_v60, %v9021_v43  ;;  %v3493_v38 = vpack.c.bf16 %v3437_v5, %v3433_v58  ;;  %v3454_v16 = vadd.f32 %v7959_v60, %v9022_v7  ;;  %v9029_v52 = vld [vmem:[#allocation25_spill] sm:$0xff]  ;;  %v6283_v5 = vld [vmem:[#allocation5 + $0x30] sm:$0xff]   ;;  %v5384_v59 = vld [vmem:[%s8945_s10 + $0x5] ss:$8 sm:$0x3] }
 0x5b8   : > { %v3498_v30 = vpack.c.bf16 %v3446_v35, %v3442_v47  ;;  %v3449_v23 = vadd.f32 %v7951_v36, %v9023_v0  ;;  %v3497_v37 = vpack.c.bf16 %v3445_v17, %v3441_v29  ;;  %v3453_v9 = vadd.f32 %v7951_v36, %v9024_v39  ;;  %v8565_v47 = vld [vmem:[%s8943_s8] sm:$0xff]   ;;  %v9040_v42 = vld [vmem:[#allocation23_spill] sm:$0xff] }
 0x5b9   : > { %v3458_v22 = vadd.f32 %v7959_v60, %v9025_v46  ;;  %v3462_v21 = vadd.f32 %v7959_v60, %v9026_v1  ;;  %v3502_v49 = vpack.c.bf16 %v3454_v16, %v3450_v34  ;;  %v3457_v14 = vadd.f32 %v7951_v36, %v9027_v56  ;;  %v9039_v35 = vld [vmem:[#allocation22_spill] sm:$0xff] }
 0x5ba   : > { %v3461_v54 = vadd.f32 %v7951_v36, %v9028_v15  ;;  %v3466_v45 = vadd.f32 %v7959_v60, %v8353_v18  ;;  %v3501_v48 = vpack.c.bf16 %v3453_v9, %v3449_v23  ;;  %v3470_v41 = vadd.f32 %v7959_v60, %v8383_v28  ;;  %v4239_v55 = vld [vmem:[#allocation7 + $0x5] ss:$8 sm:$0x3] }
 0x5bb   : > { %v3506_v4 = vpack.c.bf16 %v3462_v21, %v3458_v22  ;;  %v3465_v27 = vadd.f32 %v7951_v36, %v8340_v8  ;;  %v3469_v50 = vadd.f32 %v7951_v36, %v8364_v31  ;;  %v3474_v10 = vadd.f32 %v7959_v60, %v8414_v11  ;;  %v4284_v34 = vld [vmem:[#allocation8 + $0x5] ss:$8 sm:$0x3] }
 0x5bc   : > { %v3505_v24 = vpack.c.bf16 %v3461_v54, %v3457_v14  ;;  %v3478_v51 = vadd.f32 %v7959_v60, %v8446_v44  ;;  %v3510_v3 = vpack.c.bf16 %v3470_v41, %v3466_v45  ;;  %v3473_v18 = vadd.f32 %v7951_v36, %v8398_v2 }
 0x5bd   : > { %v3477_v28 = vadd.f32 %v7951_v36, %v8426_v26  ;;  %v3482_v8 = vadd.f32 %v7959_v60, %v8470_v32  ;;  %v3509_v53 = vpack.c.bf16 %v3469_v50, %v3465_v27  ;;  %v3486_v31 = vadd.f32 %v7959_v60, %v3399_v61  ;;  %v9030_v26 = vld [vmem:[#allocation24_spill] sm:$0xff]  ;;  %v9032_v32 = vld [vmem:[#allocation30_spill] sm:$0xff]  ;;  %v9035_v61 = vld [vmem:[#allocation35_spill] sm:$0xff] }
 0x5be   : > { %4019 = vmatmul.mubr.bf16.gmra.mrb[140].mxu1 %v3515_v13  ;;  %v3514_v40 = vpack.c.bf16 %v3478_v51, %v3474_v10  ;;  %v3481_v11 = vadd.f32 %v7951_v36, %v8461_v57  ;;  %v3485_v63 = vadd.f32 %v7951_v36, %v8476_v12  ;;  %v9031_v58 = vpack.c.bf16 %v9029_v52, %v9030_v26  ;;  %v9033_v13 = vld [vmem:[#allocation32_spill] sm:$0xff]  ;;  %v9034_v60 = vld [vmem:[#allocation34_spill] sm:$0xff]  ;;  %v9036_v57 = vld [vmem:[#allocation37_spill] sm:$0xff] }
 0x5bf   : > { %4061 = vmatprep.mubr.bf16.mxu1 %v3490_v25  ;;  %v3513_v44 = vpack.c.bf16 %v3477_v28, %v3473_v18  ;;  %v3518_v2 = vpack.c.bf16 %v3486_v31, %v3482_v8  ;;  %v9037_v36 = vld [vmem:[#allocation39_spill] sm:$0xff]  ;;  %v9038_v12 = vld [vmem:[#allocation42_spill] sm:$0xff]  ;;  %v8575_v29 = vrot.slane %v5384_v59, %v9040_v42  ;;  %v8583_v23 = vrot.slane %v4239_v55, %v9040_v42 }
 0x5c0   : > { %v3517_v6 = vpack.c.bf16 %v3485_v63, %v3481_v11  ;;  %v6281_v25 = vld [vmem:[#allocation5 + $0x28] sm:$0xff]   ;;  %v8587_v9 = vrot.slane %v4284_v34, %v9039_v35 }
 0x5c1   : > { %5582 = vmatpush3.bf16.msra.mxu0 %v6281_v25 }
 0x5c6   : > { %4062 = vmatmul.mubr.bf16.vlgmr.msra.gmra.mrb[112].mxu1 %v9031_v58 }
 0x5c7   : > { %4071 = vmatprep.mubr.bf16.mxu1 %v3494_v33  ;;  %5759 = vmatpush3.bf16.msra.mxu1 %v9032_v32  ;;  %v8572_v33 = vrot.slane %v5384_v59, %v9039_v35 }
 0x5c8   : > { %5752 = vmatprep.subr.bf16.mxu1 %v9033_v13  ;;  %v6287_v13 = vld [vmem:[%s8943_s8 + $0x8] sm:$0xff]  }
 0x5cb   : > { %5760 = vmatpush3.bf16.msra.mxu1 %v9034_v60 }
 0x5cc   : > { %5753 = vmatprep.subr.bf16.mxu1 %v9035_v61 }
 0x5ce   : > { %4072 = vmatmul.mubr.bf16.gmra.mrb[116].mxu1 %v3493_v38 }
 0x5cf   : > { %4081 = vmatprep.mubr.bf16.mxu1 %v3498_v30  ;;  %5761 = vmatpush3.bf16.msra.mxu1 %v9036_v57  ;;  %v8579_v30 = vrot.slane %v4239_v55, %v9039_v35 }
 0x5d0   : > { %5754 = vmatprep.subr.bf16.mxu1 %v9037_v36 }
 0x5d3   : > { %5762 = vmatpush3.bf16.msra.mxu1 %v8270_v19  ;;  %v6282_v19 = vld [vmem:[#allocation5 + $0x70] sm:$0xff]  }
 0x5d4   : > { %5755 = vmatprep.subr.bf16.mxu1 %v9038_v12  ;;  %5583 = vmatprep.subr.bf16.mxu0 %v6282_v19 }
 0x5d5   : > { %5584 = vmatpush3.bf16.msra.mxu0 %v6283_v5 }
 0x5d6   : > { %4082 = vmatmul.mubr.bf16.gmra.mrb[120].mxu1 %v3497_v37 }
 0x5d7   : > { %4091 = vmatprep.mubr.bf16.mxu1 %v3502_v49  ;;  %5763 = vmatpush3.bf16.msra.mxu1 %v8308_v20  ;;  %v6284_v20 = vld [vmem:[#allocation5 + $0x78] sm:$0xff]   ;;  %v8591_v49 = vrot.slane %v4284_v34, %v9040_v42 }
 0x5d8   : > { %5756 = vmatprep.subr.bf16.mxu1 %v8319_v62  ;;  %v6285_v62 = vld [vmem:[#allocation5 + $0x38] sm:$0xff]   ;;  %5585 = vmatprep.subr.bf16.mxu0 %v6284_v20 }
 0x5d9   : > { %5586 = vmatpush3.bf16.msra.mxu0 %v6285_v62 }
 0x5da   : > { %5695 = vmatprep.subr.bf16.mxu0 %v8565_v47 }
 0x5db   : > { %5764 = vmatpush3.bf16.msra.mxu1 %v6281_v25 }
 0x5dc   : > { %5757 = vmatprep.subr.bf16.mxu1 %v6282_v19 }
 0x5de   : > { %4092 = vmatmul.mubr.bf16.gmra.mrb[124].mxu1 %v3501_v48 }
 0x5df   : > { %4101 = vmatprep.mubr.bf16.mxu1 %v3506_v4  ;;  %5765 = vmatpush3.bf16.msra.mxu1 %v6283_v5 }
 0x5e0   : > { %5758 = vmatprep.subr.bf16.mxu1 %v6284_v20 }
 0x5e3   : > { %5766 = vmatpush3.bf16.msra.mxu1 %v6285_v62 }
 0x5e6   : > { %4102 = vmatmul.mubr.bf16.gmra.mrb[128].mxu1 %v3505_v24 }
 0x5e7   : > { %4111 = vmatprep.mubr.bf16.mxu1 %v3510_v3 }
 0x5ee   : > { %4112 = vmatmul.mubr.bf16.gmra.mrb[132].mxu1 %v3509_v53 }
 0x5ef   : > { %4121 = vmatprep.mubr.bf16.mxu1 %v3514_v40 }
 0x5f6   : > { %4122 = vmatmul.mubr.bf16.gmra.mrb[136].mxu1 %v3513_v44 }
 0x5f7   : > { %4131 = vmatprep.mubr.bf16.mxu1 %v3518_v2 }
 0x5fe   : > { %4132 = vmatmul.mubr.bf16.gmra.mrb[140].mxu1 %v3517_v6 }
 0x699   : > { %v4063_v17 = vpop.f32.mrb[112].mxu1 }
 0x69a   : > { %v5799_v43 = vadd.f32 %v4063_v17, %v8572_v33  ;;  %v4065_v38 = vpop.f32.mrb[113].mxu1 }
 0x69b   : > { %v5800_v7 = vadd.f32 %v4065_v38, %v8575_v29  ;;  %v4067_v16 = vpop.f32.mrb[114].mxu1 }
 0x69c   : > { %vm4142_vm6 = vcmp.gt.f32.partialorder %v5799_v43, 0.0  ;;  %v4174_v0 = vmul.f32 0.2, %v5799_v43  ;;  %v5801_v37 = vadd.f32 %v4067_v16, %v8572_v33  ;;  %v4069_v39 = vpop.f32.mrb[115].mxu1 }
 0x69d   : > { %vm4143_vm7 = vcmp.gt.f32.partialorder %v5800_v7, 0.0  ;;  %v4175_v46 = vmul.f32 0.2, %v5800_v7  ;;  %v5802_v22 = vadd.f32 %v4069_v39, %v8575_v29 }
 0x69e   : > { %v4206_v1 = vsel %vm4142_vm6, %v5799_v43, %v4174_v0  ;;  %vm4144_vm8 = vcmp.gt.f32.partialorder %v5801_v37, 0.0  ;;  %v4176_v21 = vmul.f32 0.2, %v5801_v37 }
 0x69f   : > { %v4251_v56 = vmul.f32 %v8579_v30, %v4206_v1  ;;  %v4207_v14 = vsel %vm4143_vm7, %v5800_v7, %v4175_v46  ;;  %vm4145_vm9 = vcmp.gt.f32.partialorder %v5802_v22, 0.0  ;;  %v4177_v15 = vmul.f32 0.2, %v5802_v22 }
 0x6a0   : > { %v4252_v54 = vmul.f32 %v8583_v23, %v4207_v14  ;;  %v4208_v45 = vsel %vm4144_vm8, %v5801_v37, %v4176_v21 }
 0x6a1   : > { %v4253_v48 = vmul.f32 %v8579_v30, %v4208_v45  ;;  %v4209_v4 = vsel %vm4145_vm9, %v5802_v22, %v4177_v15  ;;  %v4073_v41 = vpop.f32.mrb[116].mxu1  ;;  %v4296_v10 = vadd.f32 %v8587_v9, %v4251_v56 }
 0x6a2   : > { %v4254_v27 = vmul.f32 %v8583_v23, %v4209_v4  ;;  %v5803_v24 = vadd.f32 %v4073_v41, %v8572_v33  ;;  %v4075_v50 = vpop.f32.mrb[117].mxu1  ;;  %v4297_v28 = vadd.f32 %v8591_v49, %v4252_v54 }
 0x6a3   : > { %v4298_v51 = vadd.f32 %v8587_v9, %v4253_v48  ;;  %v5804_v3 = vadd.f32 %v4075_v50, %v8575_v29  ;;  %v4077_v18 = vpop.f32.mrb[118].mxu1 }
 0x6a4   : > { %vm4146_vm10 = vcmp.gt.f32.partialorder %v5803_v24, 0.0  ;;  %v4178_v8 = vmul.f32 0.2, %v5803_v24  ;;  %v5805_v53 = vadd.f32 %v4077_v18, %v8572_v33  ;;  %v4079_v40 = vpop.f32.mrb[119].mxu1  ;;  %v4299_v31 = vadd.f32 %v8591_v49, %v4254_v27 }
 0x6a5   : > { %v4328_v11 = vpack.c.bf16 %v4298_v51, %v4296_v10  ;;  %vm4147_vm11 = vcmp.gt.f32.partialorder %v5804_v3, 0.0  ;;  %v4179_v44 = vmul.f32 0.2, %v5804_v3  ;;  %v5806_v63 = vadd.f32 %v4079_v40, %v8575_v29 }
 0x6a6   : > { %v4210_v2 = vsel %vm4146_vm10, %v5803_v24, %v4178_v8  ;;  %vm4148_vm12 = vcmp.gt.f32.partialorder %v5805_v53, 0.0  ;;  %v4180_v6 = vmul.f32 0.2, %v5805_v53  ;;  %v4329_v52 = vpack.c.bf16 %v4299_v31, %v4297_v28 }
 0x6a7   : > { %v4255_v26 = vmul.f32 %v8579_v30, %v4210_v2  ;;  %v4211_v58 = vsel %vm4147_vm11, %v5804_v3, %v4179_v44  ;;  %vm4149_vm13 = vcmp.gt.f32.partialorder %v5806_v63, 0.0  ;;  %v4181_v32 = vmul.f32 0.2, %v5806_v63 }
 0x6a8   : > { %v4256_v60 = vmul.f32 %v8583_v23, %v4211_v58  ;;  %v4212_v61 = vsel %vm4148_vm12, %v5805_v53, %v4180_v6  ;;  %4505 = vmatprep.mubr.bf16.mxu0 %v4329_v52 }
 0x6a9   : > { %v4257_v57 = vmul.f32 %v8579_v30, %v4212_v61  ;;  %v4213_v36 = vsel %vm4149_vm13, %v5806_v63, %v4181_v32  ;;  %v4083_v12 = vpop.f32.mrb[120].mxu1  ;;  %4506 = vmatmul.mubr.bf16.vlgmr.msra.gmra.mrb[96].mxu0 %v4328_v11  ;;  %v4300_v35 = vadd.f32 %v8587_v9, %v4255_v26 }
 0x6aa   : > { %v4258_v25 = vmul.f32 %v8583_v23, %v4213_v36  ;;  %v5807_v19 = vadd.f32 %v4083_v12, %v8572_v33  ;;  %v4085_v5 = vpop.f32.mrb[121].mxu1  ;;  %5696 = vmatpush3.bf16.msra.mxu0 %v8565_v47  ;;  %v4301_v59 = vadd.f32 %v8591_v49, %v4256_v60 }
 0x6ab   : > { %v5808_v20 = vadd.f32 %v4085_v5, %v8575_v29  ;;  %v4087_v62 = vpop.f32.mrb[122].mxu1  ;;  %v4302_v42 = vadd.f32 %v8587_v9, %v4257_v57  ;;  %5697 = vmatprep.subr.bf16.mxu0 %v6287_v13 }
 0x6ac   : > { %vm4150_vm14 = vcmp.gt.f32.partialorder %v5807_v19, 0.0  ;;  %v4182_v55 = vmul.f32 0.2, %v5807_v19  ;;  %v5809_v17 = vadd.f32 %v4087_v62, %v8572_v33  ;;  %v4089_v43 = vpop.f32.mrb[123].mxu1  ;;  %v4303_v34 = vadd.f32 %v8591_v49, %v4258_v25 }
 0x6ad   : > { %vm4151_vm15 = vcmp.gt.f32.partialorder %v5808_v20, 0.0  ;;  %v4183_v38 = vmul.f32 0.2, %v5808_v20  ;;  %v5810_v47 = vadd.f32 %v4089_v43, %v8575_v29  ;;  %v4330_v7 = vpack.c.bf16 %v4302_v42, %v4300_v35 }
 0x6ae   : > { %v4214_v16 = vsel %vm4150_vm14, %v5807_v19, %v4182_v55  ;;  %vm4152_vm0 = vcmp.gt.f32.partialorder %v5809_v17, 0.0  ;;  %v4184_v0 = vmul.f32 0.2, %v5809_v17  ;;  %v4331_v37 = vpack.c.bf16 %v4303_v34, %v4301_v59  ;;  %5698 = vmatpush3.bf16.msra.mxu0 %v6287_v13 }
 0x6af   : > { %v4259_v39 = vmul.f32 %v8579_v30, %v4214_v16  ;;  %v4215_v46 = vsel %vm4151_vm15, %v5808_v20, %v4183_v38  ;;  %vm4153_vm1 = vcmp.gt.f32.partialorder %v5810_v47, 0.0  ;;  %v4185_v22 = vmul.f32 0.2, %v5810_v47 }
 0x6b0   : > { %v4260_v1 = vmul.f32 %v8583_v23, %v4215_v46  ;;  %v4216_v21 = vsel %vm4152_vm0, %v5809_v17, %v4184_v0  ;;  %4513 = vmatprep.mubr.bf16.mxu0 %v4331_v37 }
 0x6b1   : > { %v4261_v56 = vmul.f32 %v8579_v30, %v4216_v21  ;;  %v4217_v14 = vsel %vm4153_vm1, %v5810_v47, %v4185_v22  ;;  %v4093_v15 = vpop.f32.mrb[124].mxu1  ;;  %4514 = vmatmul.mubr.bf16.gmra.mrb[100].mxu0 %v4330_v7  ;;  %v4304_v24 = vadd.f32 %v8587_v9, %v4259_v39 }
 0x6b2   : > { %v4262_v54 = vmul.f32 %v8583_v23, %v4217_v14  ;;  %v5811_v45 = vadd.f32 %v4093_v15, %v8572_v33  ;;  %v4095_v48 = vpop.f32.mrb[125].mxu1  ;;  %v4305_v27 = vadd.f32 %v8591_v49, %v4260_v1 }
 0x6b3   : > { %v5812_v4 = vadd.f32 %v4095_v48, %v8575_v29  ;;  %v4097_v41 = vpop.f32.mrb[126].mxu1  ;;  %v4306_v50 = vadd.f32 %v8587_v9, %v4261_v56 }
 0x6b4   : > { %vm4154_vm2 = vcmp.gt.f32.partialorder %v5811_v45, 0.0  ;;  %v4186_v10 = vmul.f32 0.2, %v5811_v45  ;;  %v5813_v51 = vadd.f32 %v4097_v41, %v8572_v33  ;;  %v4099_v3 = vpop.f32.mrb[127].mxu1  ;;  %v4307_v18 = vadd.f32 %v8591_v49, %v4262_v54 }
 0x6b5   : > { %vm4155_vm3 = vcmp.gt.f32.partialorder %v5812_v4, 0.0  ;;  %v4187_v28 = vmul.f32 0.2, %v5812_v4  ;;  %v5814_v8 = vadd.f32 %v4099_v3, %v8575_v29  ;;  %v4332_v53 = vpack.c.bf16 %v4306_v50, %v4304_v24 }
 0x6b6   : > { %v4218_v40 = vsel %vm4154_vm2, %v5811_v45, %v4186_v10  ;;  %vm4156_vm5 = vcmp.gt.f32.partialorder %v5813_v51, 0.0  ;;  %v4188_v31 = vmul.f32 0.2, %v5813_v51  ;;  %v4333_v11 = vpack.c.bf16 %v4307_v18, %v4305_v27 }
 0x6b7   : > { %v4263_v44 = vmul.f32 %v8579_v30, %v4218_v40  ;;  %v4219_v63 = vsel %vm4155_vm3, %v5812_v4, %v4187_v28  ;;  %vm4157_vm6 = vcmp.gt.f32.partialorder %v5814_v8, 0.0  ;;  %v4189_v2 = vmul.f32 0.2, %v5814_v8 }
 0x6b8   : > { %v4264_v6 = vmul.f32 %v8583_v23, %v4219_v63  ;;  %v4220_v52 = vsel %vm4156_vm5, %v5813_v51, %v4188_v31  ;;  %4521 = vmatprep.mubr.bf16.mxu0 %v4333_v11 }
 0x6b9   : > { %v4265_v26 = vmul.f32 %v8579_v30, %v4220_v52  ;;  %v4221_v58 = vsel %vm4157_vm6, %v5814_v8, %v4189_v2  ;;  %v4103_v32 = vpop.f32.mrb[128].mxu1  ;;  %4522 = vmatmul.mubr.bf16.gmra.mrb[104].mxu0 %v4332_v53  ;;  %v4308_v25 = vadd.f32 %v8587_v9, %v4263_v44 }
 0x6ba   : > { %v4266_v13 = vmul.f32 %v8583_v23, %v4221_v58  ;;  %v5815_v60 = vadd.f32 %v4103_v32, %v8572_v33  ;;  %v4105_v61 = vpop.f32.mrb[129].mxu1  ;;  %v4309_v12 = vadd.f32 %v8591_v49, %v4264_v6 }
 0x6bb   : > { %v5816_v57 = vadd.f32 %v4105_v61, %v8575_v29  ;;  %v4107_v36 = vpop.f32.mrb[130].mxu1  ;;  %v4310_v19 = vadd.f32 %v8587_v9, %v4265_v26 }
 0x6bc   : > { %vm4158_vm7 = vcmp.gt.f32.partialorder %v5815_v60, 0.0  ;;  %v4190_v5 = vmul.f32 0.2, %v5815_v60  ;;  %v5817_v20 = vadd.f32 %v4107_v36, %v8572_v33  ;;  %v4109_v62 = vpop.f32.mrb[131].mxu1  ;;  %v4311_v59 = vadd.f32 %v8591_v49, %v4266_v13 }
 0x6bd   : > { %vm4159_vm8 = vcmp.gt.f32.partialorder %v5816_v57, 0.0  ;;  %v4191_v35 = vmul.f32 0.2, %v5816_v57  ;;  %v5818_v42 = vadd.f32 %v4109_v62, %v8575_v29  ;;  %v4334_v55 = vpack.c.bf16 %v4310_v19, %v4308_v25 }
 0x6be   : > { %v4222_v17 = vsel %vm4158_vm7, %v5815_v60, %v4190_v5  ;;  %vm4160_vm9 = vcmp.gt.f32.partialorder %v5817_v20, 0.0  ;;  %v4192_v43 = vmul.f32 0.2, %v5817_v20  ;;  %v4335_v34 = vpack.c.bf16 %v4311_v59, %v4309_v12 }
 0x6bf   : > { %v4267_v38 = vmul.f32 %v8579_v30, %v4222_v17  ;;  %v4223_v47 = vsel %vm4159_vm8, %v5816_v57, %v4191_v35  ;;  %vm4161_vm10 = vcmp.gt.f32.partialorder %v5818_v42, 0.0  ;;  %v4193_v7 = vmul.f32 0.2, %v5818_v42 }
 0x6c0   : > { %v4268_v16 = vmul.f32 %v8583_v23, %v4223_v47  ;;  %v4224_v0 = vsel %vm4160_vm9, %v5817_v20, %v4192_v43  ;;  %4529 = vmatprep.mubr.bf16.mxu0 %v4335_v34 }
 0x6c1   : > { %v4269_v37 = vmul.f32 %v8579_v30, %v4224_v0  ;;  %v4225_v39 = vsel %vm4161_vm10, %v5818_v42, %v4193_v7  ;;  %v4113_v46 = vpop.f32.mrb[132].mxu1  ;;  %4530 = vmatmul.mubr.bf16.gmra.mrb[108].mxu0 %v4334_v55  ;;  %v4312_v54 = vadd.f32 %v8587_v9, %v4267_v38 }
 0x6c2   : > { %v4270_v22 = vmul.f32 %v8583_v23, %v4225_v39  ;;  %v5819_v1 = vadd.f32 %v4113_v46, %v8572_v33  ;;  %v4115_v21 = vpop.f32.mrb[133].mxu1  ;;  %v4313_v15 = vadd.f32 %v8591_v49, %v4268_v16 }
 0x6c3   : > { %v5820_v56 = vadd.f32 %v4115_v21, %v8575_v29  ;;  %v4117_v14 = vpop.f32.mrb[134].mxu1  ;;  %v4314_v45 = vadd.f32 %v8587_v9, %v4269_v37 }
 0x6c4   : > { %vm4162_vm11 = vcmp.gt.f32.partialorder %v5819_v1, 0.0  ;;  %v4194_v48 = vmul.f32 0.2, %v5819_v1  ;;  %v5821_v4 = vadd.f32 %v4117_v14, %v8572_v33  ;;  %v4119_v41 = vpop.f32.mrb[135].mxu1  ;;  %v4315_v27 = vadd.f32 %v8591_v49, %v4270_v22 }
 0x6c5   : > { %vm4163_vm12 = vcmp.gt.f32.partialorder %v5820_v56, 0.0  ;;  %v4195_v24 = vmul.f32 0.2, %v5820_v56  ;;  %v5822_v50 = vadd.f32 %v4119_v41, %v8575_v29  ;;  %v4336_v10 = vpack.c.bf16 %v4314_v45, %v4312_v54 }
 0x6c6   : > { %v4226_v51 = vsel %vm4162_vm11, %v5819_v1, %v4194_v48  ;;  %vm4164_vm13 = vcmp.gt.f32.partialorder %v5821_v4, 0.0  ;;  %v4196_v3 = vmul.f32 0.2, %v5821_v4  ;;  %v4337_v18 = vpack.c.bf16 %v4315_v27, %v4313_v15 }
 0x6c7   : > { %v4271_v28 = vmul.f32 %v8579_v30, %v4226_v51  ;;  %v4227_v8 = vsel %vm4163_vm12, %v5820_v56, %v4195_v24  ;;  %vm4165_vm14 = vcmp.gt.f32.partialorder %v5822_v50, 0.0  ;;  %v4197_v53 = vmul.f32 0.2, %v5822_v50 }
 0x6c8   : > { %v4272_v40 = vmul.f32 %v8583_v23, %v4227_v8  ;;  %v4228_v31 = vsel %vm4164_vm13, %v5821_v4, %v4196_v3  ;;  %4537 = vmatprep.mubr.bf16.mxu0 %v4337_v18 }
 0x6c9   : > { %v4273_v11 = vmul.f32 %v8579_v30, %v4228_v31  ;;  %v4229_v44 = vsel %vm4165_vm14, %v5822_v50, %v4197_v53  ;;  %v4123_v63 = vpop.f32.mrb[136].mxu1  ;;  %4538 = vmatmul.mubr.bf16.gmra.mrb[112].mxu0 %v4336_v10  ;;  %v4316_v13 = vadd.f32 %v8587_v9, %v4271_v28 }
 0x6ca   : > { %v4274_v2 = vmul.f32 %v8583_v23, %v4229_v44  ;;  %v5823_v6 = vadd.f32 %v4123_v63, %v8572_v33  ;;  %v4125_v52 = vpop.f32.mrb[137].mxu1  ;;  %v4317_v32 = vadd.f32 %v8591_v49, %v4272_v40  ;;  %v6292_v44 = vld [vmem:[%s8943_s8 + $0x30] sm:$0xff]   ;;  %v6293_v63 = vld [vmem:[%s8943_s8 + $0x38] sm:$0xff]  }
 0x6cb   : > { %v5824_v26 = vadd.f32 %v4125_v52, %v8575_v29  ;;  %v4127_v58 = vpop.f32.mrb[138].mxu1  ;;  %v4318_v60 = vadd.f32 %v8587_v9, %v4273_v11 }
 0x6cc   : > { %vm4166_vm15 = vcmp.gt.f32.partialorder %v5823_v6, 0.0  ;;  %v4198_v61 = vmul.f32 0.2, %v5823_v6  ;;  %v5825_v57 = vadd.f32 %v4127_v58, %v8572_v33  ;;  %v4129_v36 = vpop.f32.mrb[139].mxu1  ;;  %v4319_v12 = vadd.f32 %v8591_v49, %v4274_v2 }
 0x6cd   : > { %vm4167_vm0 = vcmp.gt.f32.partialorder %v5824_v26, 0.0  ;;  %v4199_v25 = vmul.f32 0.2, %v5824_v26  ;;  %v5826_v19 = vadd.f32 %v4129_v36, %v8575_v29  ;;  %v4338_v5 = vpack.c.bf16 %v4318_v60, %v4316_v13  ;;  %v8714_v36 = vld [vmem:[#allocation7 + $0x6] ss:$0 sm:$0xff] }
 0x6ce   : > { %v4230_v20 = vsel %vm4166_vm15, %v5823_v6, %v4198_v61  ;;  %vm4168_vm1 = vcmp.gt.f32.partialorder %v5825_v57, 0.0  ;;  %v4200_v62 = vmul.f32 0.2, %v5825_v57  ;;  %v4339_v59 = vpack.c.bf16 %v4319_v12, %v4317_v32  ;;  %v8710_v6 = vld [vmem:[%s8945_s10 + $0x6] ss:$0 sm:$0xff] }
 0x6cf   : > { %v4275_v35 = vmul.f32 %v8579_v30, %v4230_v20  ;;  %v4231_v42 = vsel %vm4167_vm0, %v5824_v26, %v4199_v25  ;;  %vm4169_vm2 = vcmp.gt.f32.partialorder %v5826_v19, 0.0  ;;  %v4201_v55 = vmul.f32 0.2, %v5826_v19 }
 0x6d0   : > { %v4276_v17 = vmul.f32 %v8583_v23, %v4231_v42  ;;  %v4232_v43 = vsel %vm4168_vm1, %v5825_v57, %v4200_v62  ;;  %4545 = vmatprep.mubr.bf16.mxu0 %v4339_v59 }
 0x6d1   : > { %v4277_v34 = vmul.f32 %v8579_v30, %v4232_v43  ;;  %v4233_v38 = vsel %vm4169_vm2, %v5826_v19, %v4201_v55  ;;  %v4133_v47 = vpop.f32.mrb[140].mxu1  ;;  %4546 = vmatmul.mubr.bf16.gmra.mrb[116].mxu0 %v4338_v5  ;;  %v4320_v37 = vadd.f32 %v8587_v9, %v4275_v35  ;;  %v8717_v35 = vld [vmem:[#allocation8 + $0x6] ss:$0 sm:$0xff] }
 0x6d2   : > { %v4278_v7 = vmul.f32 %v8583_v23, %v4233_v38  ;;  %v5827_v16 = vadd.f32 %v4133_v47, %v8572_v33  ;;  %v4135_v0 = vpop.f32.mrb[141].mxu1  ;;  %v4321_v1 = vadd.f32 %v8591_v49, %v4276_v17 }
 0x6d3   : > { %v4322_v39 = vadd.f32 %v8587_v9, %v4277_v34  ;;  %v5828_v46 = vadd.f32 %v4135_v0, %v8575_v29  ;;  %v4137_v22 = vpop.f32.mrb[142].mxu1 }
 0x6d4   : > { %vm4170_vm3 = vcmp.gt.f32.partialorder %v5827_v16, 0.0  ;;  %v4202_v21 = vmul.f32 0.2, %v5827_v16  ;;  %v5829_v56 = vadd.f32 %v4137_v22, %v8572_v33  ;;  %v4139_v14 = vpop.f32.mrb[143].mxu1  ;;  %v4323_v15 = vadd.f32 %v8591_v49, %v4278_v7 }
 0x6d5   : > { %v4340_v54 = vpack.c.bf16 %v4322_v39, %v4320_v37  ;;  %vm4171_vm5 = vcmp.gt.f32.partialorder %v5828_v46, 0.0  ;;  %v4203_v45 = vmul.f32 0.2, %v5828_v46  ;;  %v5830_v48 = vadd.f32 %v4139_v14, %v8575_v29 }
 0x6d6   : > { %v4234_v4 = vsel %vm4170_vm3, %v5827_v16, %v4202_v21  ;;  %vm4172_vm6 = vcmp.gt.f32.partialorder %v5829_v56, 0.0  ;;  %v4204_v41 = vmul.f32 0.2, %v5829_v56  ;;  %v4341_v27 = vpack.c.bf16 %v4323_v15, %v4321_v1 }
 0x6d7   : > { %v4279_v24 = vmul.f32 %v8579_v30, %v4234_v4  ;;  %v4235_v50 = vsel %vm4171_vm5, %v5828_v46, %v4203_v45  ;;  %vm4173_vm7 = vcmp.gt.f32.partialorder %v5830_v48, 0.0  ;;  %v4205_v10 = vmul.f32 0.2, %v5830_v48 }
 0x6d8   : > { %v4280_v51 = vmul.f32 %v8583_v23, %v4235_v50  ;;  %v4236_v33 = vsel %vm4172_vm6, %v5829_v56, %v4204_v41  ;;  %4553 = vmatprep.mubr.bf16.mxu1 %v4341_v27 }
 0x6d9   : > { %v4281_v3 = vmul.f32 %v8579_v30, %v4236_v33  ;;  %v4237_v18 = vsel %vm4173_vm7, %v5830_v48, %v4205_v10  ;;  %4554 = vmatmul.mubr.bf16.vlgmr.msra.gmra.mrb[144].mxu1 %v4340_v54  ;;  %v4324_v29 = vadd.f32 %v8587_v9, %v4279_v24  ;;  %v6288_v30 = vld [vmem:[%s8943_s8 + $0x10] sm:$0xff]  }
 0x6da   : > { %v4282_v28 = vmul.f32 %v8583_v23, %v4237_v18  ;;  %v4325_v53 = vadd.f32 %v8591_v49, %v4280_v51  ;;  %5699 = vmatprep.subr.bf16.mxu0 %v6288_v30  ;;  %v6289_v23 = vld [vmem:[%s8943_s8 + $0x18] sm:$0xff]  }
 0x6db   : > { %v4326_v8 = vadd.f32 %v8587_v9, %v4281_v3  ;;  %5700 = vmatpush3.bf16.msra.mxu0 %v6288_v30  ;;  %v6290_v9 = vld [vmem:[%s8943_s8 + $0x20] sm:$0xff]  }
 0x6dc   : > { %v4327_v40 = vadd.f32 %v8591_v49, %v4282_v28  ;;  %5701 = vmatprep.subr.bf16.mxu0 %v6289_v23  ;;  %v6291_v49 = vld [vmem:[%s8943_s8 + $0x28] sm:$0xff]  }
 0x6dd   : > { %v4342_v31 = vpack.c.bf16 %v4326_v8, %v4324_v29 }
 0x6de   : > { %v4343_v11 = vpack.c.bf16 %v4327_v40, %v4325_v53 }
 0x6df   : > { %5702 = vmatpush3.bf16.msra.mxu0 %v6289_v23 }
 0x6e0   : > { %4561 = vmatprep.mubr.bf16.mxu1 %v4343_v11  ;;  %5703 = vmatprep.subr.bf16.mxu0 %v6290_v9 }
 0x6e1   : > { %4562 = vmatmul.mubr.bf16.gmra.mrb[148].mxu1 %v4342_v31 }
 0x6e3   : > { %5704 = vmatpush3.bf16.msra.mxu0 %v6290_v9 }
 0x6e4   : > { %5705 = vmatprep.subr.bf16.mxu0 %v6291_v49 }
 0x6e7   : > { %5706 = vmatpush3.bf16.msra.mxu0 %v6291_v49 }
 0x6e8   : > { %5707 = vmatprep.subr.bf16.mxu0 %v6292_v44 }
 0x6eb   : > { %5708 = vmatpush3.bf16.msra.mxu0 %v6292_v44 }
 0x6ec   : > { %5709 = vmatprep.subr.bf16.mxu0 %v6293_v63 }
 0x6ef   : > { %5710 = vmatpush3.bf16.msra.mxu0 %v6293_v63 }
 0x77c   : > { %v5587_v2 = vpop.f32.mrb[96].mxu0 }
 0x77d   : > { %v5588_v52 = vpop.f32.mrb[97].mxu0 }
 0x77e   : > { %v5589_v26 = vadd.f32 %v5588_v52, %v5587_v2  ;;  %v5590_v58 = vpop.f32.mrb[98].mxu0 }
 0x77f   : > { %v5591_v32 = vpop.f32.mrb[99].mxu0 }
 0x780   : > { %v4508_v13 = vadd.f32 %v5589_v26, %v8710_v6  ;;  %v5592_v60 = vadd.f32 %v5591_v32, %v5590_v58 }
 0x782   : > { %vm4570_vm8 = vcmp.gt.f32.partialorder %v4508_v13, 0.0  ;;  %v4586_v61 = vmul.f32 0.2, %v4508_v13  ;;  %v4511_v57 = vadd.f32 %v5592_v60, %v8710_v6 }
 0x784   : > { %v4602_v12 = vsel %vm4570_vm8, %v4508_v13, %v4586_v61  ;;  %vm4571_vm9 = vcmp.gt.f32.partialorder %v4511_v57, 0.0  ;;  %v4587_v25 = vmul.f32 0.2, %v4511_v57  ;;  %v5593_v19 = vpop.f32.mrb[100].mxu0 }
 0x785   : > { %v5594_v5 = vpop.f32.mrb[101].mxu0  ;;  %v4619_v20 = vmul.f32 %v8714_v36, %v4602_v12 }
 0x786   : > { %v4603_v62 = vsel %vm4571_vm9, %v4511_v57, %v4587_v25  ;;  %v5595_v59 = vadd.f32 %v5594_v5, %v5593_v19  ;;  %v5596_v42 = vpop.f32.mrb[102].mxu0 }
 0x787   : > { %v5597_v55 = vpop.f32.mrb[103].mxu0  ;;  %v4620_v17 = vmul.f32 %v8714_v36, %v4603_v62  ;;  %v4636_v38 = vadd.f32 %v8717_v35, %v4619_v20 }
 0x788   : > { %v4516_v43 = vadd.f32 %v5595_v59, %v8710_v6  ;;  %v5598_v34 = vadd.f32 %v5597_v55, %v5596_v42 }
 0x789   : > { %v4637_v47 = vadd.f32 %v8717_v35, %v4620_v17 }
 0x78a   : > { %vm4572_vm10 = vcmp.gt.f32.partialorder %v4516_v43, 0.0  ;;  %v4588_v7 = vmul.f32 0.2, %v4516_v43  ;;  %v4519_v16 = vadd.f32 %v5598_v34, %v8710_v6 }
 0x78b   : > { %v4652_v0 = vpack.c.bf16 %v4637_v47, %v4636_v38 }
 0x78c   : > { %v4604_v37 = vsel %vm4572_vm10, %v4516_v43, %v4588_v7  ;;  %vm4573_vm11 = vcmp.gt.f32.partialorder %v4519_v16, 0.0  ;;  %v4589_v39 = vmul.f32 0.2, %v4519_v16  ;;  %v5599_v46 = vpop.f32.mrb[104].mxu0 }
 0x78d   : > { %v4621_v22 = vmul.f32 %v8714_v36, %v4604_v37  ;;  %v5600_v1 = vpop.f32.mrb[105].mxu0  ;;  %5711 = vmatprep.mubr.bf16.mxu0 %v4652_v0 }
 0x78e   : > { %v4605_v21 = vsel %vm4573_vm11, %v4519_v16, %v4589_v39  ;;  %v5601_v56 = vadd.f32 %v5600_v1, %v5599_v46  ;;  %v5602_v14 = vpop.f32.mrb[106].mxu0 }
 0x78f   : > { %v4622_v15 = vmul.f32 %v8714_v36, %v4605_v21  ;;  %v5603_v54 = vpop.f32.mrb[107].mxu0  ;;  %v4638_v4 = vadd.f32 %v8717_v35, %v4621_v22 }
 0x790   : > { %v4524_v45 = vadd.f32 %v5601_v56, %v8710_v6  ;;  %v5604_v48 = vadd.f32 %v5603_v54, %v5602_v14 }
 0x791   : > { %v4639_v41 = vadd.f32 %v8717_v35, %v4622_v15 }
 0x792   : > { %vm4574_vm12 = vcmp.gt.f32.partialorder %v4524_v45, 0.0  ;;  %v4590_v27 = vmul.f32 0.2, %v4524_v45  ;;  %v4527_v24 = vadd.f32 %v5604_v48, %v8710_v6 }
 0x793   : > { %v4653_v50 = vpack.c.bf16 %v4639_v41, %v4638_v4 }
 0x794   : > { %v4606_v10 = vsel %vm4574_vm12, %v4524_v45, %v4590_v27  ;;  %vm4575_vm13 = vcmp.gt.f32.partialorder %v4527_v24, 0.0  ;;  %v4591_v51 = vmul.f32 0.2, %v4527_v24  ;;  %v5605_v33 = vpop.f32.mrb[108].mxu0 }
 0x795   : > { %v5606_v3 = vpop.f32.mrb[109].mxu0  ;;  %5712 = vmatmul.mubr.bf16.vlgmr.msra.gmra.mrb[120].mxu0 %v4653_v50  ;;  %v4623_v18 = vmul.f32 %v8714_v36, %v4606_v10 }
 0x796   : > { %v4607_v28 = vsel %vm4575_vm13, %v4527_v24, %v4591_v51  ;;  %v5607_v29 = vadd.f32 %v5606_v3, %v5605_v33  ;;  %v5608_v8 = vpop.f32.mrb[110].mxu0 }
 0x797   : > { %v5609_v53 = vpop.f32.mrb[111].mxu0  ;;  %v4624_v40 = vmul.f32 %v8714_v36, %v4607_v28  ;;  %v4640_v30 = vadd.f32 %v8717_v35, %v4623_v18 }
 0x798   : > { %v4532_v31 = vadd.f32 %v5607_v29, %v8710_v6  ;;  %v5610_v11 = vadd.f32 %v5609_v53, %v5608_v8 }
 0x799   : > { %v4641_v23 = vadd.f32 %v8717_v35, %v4624_v40 }
 0x79a   : > { %vm4576_vm14 = vcmp.gt.f32.partialorder %v4532_v31, 0.0  ;;  %v4592_v9 = vmul.f32 0.2, %v4532_v31  ;;  %v4535_v49 = vadd.f32 %v5610_v11, %v8710_v6 }
 0x79b   : > { %v4654_v44 = vpack.c.bf16 %v4641_v23, %v4640_v30 }
 0x79c   : > { %v4608_v63 = vsel %vm4576_vm14, %v4532_v31, %v4592_v9  ;;  %vm4577_vm15 = vcmp.gt.f32.partialorder %v4535_v49, 0.0  ;;  %v4593_v2 = vmul.f32 0.2, %v4535_v49  ;;  %v5611_v52 = vpop.f32.mrb[112].mxu0 }
 0x79d   : > { %v5612_v26 = vpop.f32.mrb[113].mxu0  ;;  %5715 = vmatprep.mubr.bf16.mxu0 %v4654_v44  ;;  %v4625_v58 = vmul.f32 %v8714_v36, %v4608_v63 }
 0x79e   : > { %v4609_v32 = vsel %vm4577_vm15, %v4535_v49, %v4593_v2  ;;  %v5613_v13 = vadd.f32 %v5612_v26, %v5611_v52  ;;  %v5614_v60 = vpop.f32.mrb[114].mxu0 }
 0x79f   : > { %v5615_v61 = vpop.f32.mrb[115].mxu0  ;;  %v4626_v57 = vmul.f32 %v8714_v36, %v4609_v32  ;;  %v4642_v19 = vadd.f32 %v8717_v35, %v4625_v58 }
 0x7a0   : > { %v4540_v12 = vadd.f32 %v5613_v13, %v8710_v6  ;;  %v5616_v25 = vadd.f32 %v5615_v61, %v5614_v60 }
 0x7a1   : > { %v4643_v5 = vadd.f32 %v8717_v35, %v4626_v57 }
 0x7a2   : > { %vm4578_vm0 = vcmp.gt.f32.partialorder %v4540_v12, 0.0  ;;  %v4594_v20 = vmul.f32 0.2, %v4540_v12  ;;  %v4543_v62 = vadd.f32 %v5616_v25, %v8710_v6 }
 0x7a3   : > { %v4655_v59 = vpack.c.bf16 %v4643_v5, %v4642_v19 }
 0x7a4   : > { %v4610_v42 = vsel %vm4578_vm0, %v4540_v12, %v4594_v20  ;;  %vm4579_vm1 = vcmp.gt.f32.partialorder %v4543_v62, 0.0  ;;  %v4595_v55 = vmul.f32 0.2, %v4543_v62  ;;  %v5617_v17 = vpop.f32.mrb[116].mxu0 }
 0x7a5   : > { %v5618_v43 = vpop.f32.mrb[117].mxu0  ;;  %5716 = vmatmul.mubr.bf16.gmra.mrb[124].mxu0 %v4655_v59  ;;  %v4627_v34 = vmul.f32 %v8714_v36, %v4610_v42  ;;  %v8779_v59 = vld [vmem:[%s8945_s10 + $0x7] ss:$0 sm:$0xff] }
 0x7a6   : > { %v4611_v38 = vsel %vm4579_vm1, %v4543_v62, %v4595_v55  ;;  %v5619_v47 = vadd.f32 %v5618_v43, %v5617_v17  ;;  %v5620_v7 = vpop.f32.mrb[118].mxu0  ;;  %v6295_v62 = vld [vmem:[%s8944_s9 + $0x8] sm:$0xff]  }
 0x7a7   : > { %v5621_v16 = vpop.f32.mrb[119].mxu0  ;;  %v4628_v0 = vmul.f32 %v8714_v36, %v4611_v38  ;;  %v4644_v46 = vadd.f32 %v8717_v35, %v4627_v34 }
 0x7a8   : > { %v4548_v37 = vadd.f32 %v5619_v47, %v8710_v6  ;;  %v5622_v39 = vadd.f32 %v5621_v16, %v5620_v7  ;;  %v8783_v47 = vld [vmem:[#allocation7 + $0x7] ss:$0 sm:$0xff] }
 0x7a9   : > { %v4645_v22 = vadd.f32 %v8717_v35, %v4628_v0 }
 0x7aa   : > { %vm4580_vm2 = vcmp.gt.f32.partialorder %v4548_v37, 0.0  ;;  %v4596_v1 = vmul.f32 0.2, %v4548_v37  ;;  %v4551_v21 = vadd.f32 %v5622_v39, %v8710_v6 }
 0x7ab   : > { %v4656_v56 = vpack.c.bf16 %v4645_v22, %v4644_v46 }
 0x7ac   : > { %v4612_v14 = vsel %vm4580_vm2, %v4548_v37, %v4596_v1  ;;  %vm4581_vm3 = vcmp.gt.f32.partialorder %v4551_v21, 0.0  ;;  %v4597_v15 = vmul.f32 0.2, %v4551_v21  ;;  %v5623_v54 = vpop.f32.mrb[144].mxu1 }
 0x7ad   : > { %v5624_v45 = vpop.f32.mrb[145].mxu1  ;;  %5719 = vmatprep.mubr.bf16.mxu0 %v4656_v56  ;;  %v4629_v48 = vmul.f32 %v8714_v36, %v4612_v14  ;;  %v8788_v56 = vld [vmem:[#allocation8 + $0x7] ss:$0 sm:$0xff] }
 0x7ae   : > { %v4613_v4 = vsel %vm4581_vm3, %v4551_v21, %v4597_v15  ;;  %v5625_v41 = vadd.f32 %v5624_v45, %v5623_v54  ;;  %v5626_v27 = vpop.f32.mrb[146].mxu1 }
 0x7af   : > { %v5627_v24 = vpop.f32.mrb[147].mxu1  ;;  %v4630_v50 = vmul.f32 %v8714_v36, %v4613_v4  ;;  %v4646_v33 = vadd.f32 %v8717_v35, %v4629_v48 }
 0x7b0   : > { %v4556_v10 = vadd.f32 %v5625_v41, %v8710_v6  ;;  %v5628_v51 = vadd.f32 %v5627_v24, %v5626_v27 }
 0x7b1   : > { %v4647_v3 = vadd.f32 %v8717_v35, %v4630_v50 }
 0x7b2   : > { %vm4582_vm5 = vcmp.gt.f32.partialorder %v4556_v10, 0.0  ;;  %v4598_v18 = vmul.f32 0.2, %v4556_v10  ;;  %v4559_v28 = vadd.f32 %v5628_v51, %v8710_v6 }
 0x7b3   : > { %v4657_v29 = vpack.c.bf16 %v4647_v3, %v4646_v33 }
 0x7b4   : > { %v4614_v8 = vsel %vm4582_vm5, %v4556_v10, %v4598_v18  ;;  %vm4583_vm6 = vcmp.gt.f32.partialorder %v4559_v28, 0.0  ;;  %v4599_v53 = vmul.f32 0.2, %v4559_v28  ;;  %v5629_v40 = vpop.f32.mrb[148].mxu1 }
 0x7b5   : > { %v5630_v31 = vpop.f32.mrb[149].mxu1  ;;  %5720 = vmatmul.mubr.bf16.gmra.mrb[128].mxu0 %v4657_v29  ;;  %v4631_v11 = vmul.f32 %v8714_v36, %v4614_v8 }
 0x7b6   : > { %v4615_v30 = vsel %vm4583_vm6, %v4559_v28, %v4599_v53  ;;  %v5631_v23 = vadd.f32 %v5630_v31, %v5629_v40  ;;  %v5632_v9 = vpop.f32.mrb[150].mxu1 }
 0x7b7   : > { %v5633_v49 = vpop.f32.mrb[151].mxu1  ;;  %v4632_v44 = vmul.f32 %v8714_v36, %v4615_v30  ;;  %v4648_v52 = vadd.f32 %v8717_v35, %v4631_v11 }
 0x7b8   : > { %v4564_v63 = vadd.f32 %v5631_v23, %v8710_v6  ;;  %v5634_v2 = vadd.f32 %v5633_v49, %v5632_v9 }
 0x7b9   : > { %v4649_v26 = vadd.f32 %v8717_v35, %v4632_v44 }
 0x7ba   : > { %vm4584_vm7 = vcmp.gt.f32.partialorder %v4564_v63, 0.0  ;;  %v4600_v58 = vmul.f32 0.2, %v4564_v63  ;;  %v4567_v32 = vadd.f32 %v5634_v2, %v8710_v6  ;;  %v6294_v6 = vld [vmem:[%s8944_s9] sm:$0xff]  }
 0x7bb   : > { %v4658_v13 = vpack.c.bf16 %v4649_v26, %v4648_v52  ;;  %5727 = vmatprep.subr.bf16.mxu0 %v6294_v6 }
 0x7bc   : > { %v4616_v60 = vsel %vm4584_vm7, %v4564_v63, %v4600_v58  ;;  %vm4585_vm8 = vcmp.gt.f32.partialorder %v4567_v32, 0.0  ;;  %v4601_v61 = vmul.f32 0.2, %v4567_v32  ;;  %5728 = vmatpush3.bf16.msra.mxu0 %v6294_v6 }
 0x7bd   : > { %5723 = vmatprep.mubr.bf16.mxu0 %v4658_v13  ;;  %v4633_v57 = vmul.f32 %v8714_v36, %v4616_v60  ;;  %5729 = vmatprep.subr.bf16.mxu0 %v6295_v62 }
 0x7be   : > { %v4617_v12 = vsel %vm4585_vm8, %v4567_v32, %v4601_v61 }
 0x7bf   : > { %v4634_v25 = vmul.f32 %v8714_v36, %v4617_v12  ;;  %v4650_v19 = vadd.f32 %v8717_v35, %v4633_v57  ;;  %v6296_v36 = vld [vmem:[%s8944_s9 + $0x10] sm:$0xff]  }
 0x7c0   : > { %5730 = vmatpush3.bf16.msra.mxu0 %v6295_v62 }
 0x7c1   : > { %v4651_v5 = vadd.f32 %v8717_v35, %v4634_v25  ;;  %5731 = vmatprep.subr.bf16.mxu0 %v6296_v36  ;;  %v6297_v35 = vld [vmem:[%s8944_s9 + $0x18] sm:$0xff]  }
 0x7c3   : > { %v4659_v20 = vpack.c.bf16 %v4651_v5, %v4650_v19 }
 0x7c4   : > { %5732 = vmatpush3.bf16.msra.mxu0 %v6296_v36 }
 0x7c5   : > { %5724 = vmatmul.mubr.bf16.gmra.mrb[132].mxu0 %v4659_v20  ;;  %5733 = vmatprep.subr.bf16.mxu0 %v6297_v35 }
 0x7c8   : > { %5734 = vmatpush3.bf16.msra.mxu0 %v6297_v35 }
 0x868   : > { %v5713_v42 = vpop.f32.mrb[120].mxu0 }
 0x869   : > { %v4768_v55 = vadd.f32 %v5713_v42, %v8779_v59  ;;  %v4759_v17 = vpop.f32.mrb[121].mxu0 }
 0x86a   : > { %v4760_v43 = vadd.f32 %v4759_v17, %v8779_v59  ;;  %v5714_v34 = vpop.f32.mrb[122].mxu0 }
 0x86b   : > { %vm4824_vm9 = vcmp.gt.f32.partialorder %v4768_v55, 0.0  ;;  %v4840_v38 = vmul.f32 0.2, %v4768_v55  ;;  %v4771_v7 = vadd.f32 %v5714_v34, %v8779_v59  ;;  %v4762_v16 = vpop.f32.mrb[123].mxu0 }
 0x86c   : > { %vm4822_vm10 = vcmp.gt.f32.partialorder %v4760_v43, 0.0  ;;  %v4838_v0 = vmul.f32 0.2, %v4760_v43  ;;  %v4763_v37 = vadd.f32 %v4762_v16, %v8779_v59 }
 0x86d   : > { %v4856_v39 = vsel %vm4824_vm9, %v4768_v55, %v4840_v38  ;;  %vm4825_vm11 = vcmp.gt.f32.partialorder %v4771_v7, 0.0  ;;  %v4841_v46 = vmul.f32 0.2, %v4771_v7 }
 0x86e   : > { %v4873_v22 = vmul.f32 %v8783_v47, %v4856_v39  ;;  %v4854_v1 = vsel %vm4822_vm10, %v4760_v43, %v4838_v0  ;;  %vm4823_vm12 = vcmp.gt.f32.partialorder %v4763_v37, 0.0  ;;  %v4839_v21 = vmul.f32 0.2, %v4763_v37 }
 0x86f   : > { %v4871_v14 = vmul.f32 %v8783_v47, %v4854_v1  ;;  %v4857_v15 = vsel %vm4825_vm11, %v4771_v7, %v4841_v46 }
 0x870   : > { %v4874_v54 = vmul.f32 %v8783_v47, %v4857_v15  ;;  %v4855_v45 = vsel %vm4823_vm12, %v4763_v37, %v4839_v21  ;;  %v4890_v4 = vadd.f32 %v8788_v56, %v4873_v22 }
 0x871   : > { %v4872_v48 = vmul.f32 %v8783_v47, %v4855_v45  ;;  %v4888_v27 = vadd.f32 %v8788_v56, %v4871_v14 }
 0x872   : > { %v4891_v41 = vadd.f32 %v8788_v56, %v4874_v54 }
 0x873   : > { %v4889_v24 = vadd.f32 %v8788_v56, %v4872_v48 }
 0x874   : > { %v4905_v50 = vpack.c.bf16 %v4891_v41, %v4890_v4 }
 0x875   : > { %v4904_v10 = vpack.c.bf16 %v4889_v24, %v4888_v27 }
 0x877   : > { %5735 = vmatprep.mubr.msk.bf16.mxu0 %vm2870_vm4, %v4904_v10 }
 0x878   : > { %v5717_v51 = vpop.f32.mrb[124].mxu0  ;;  %5736 = vmatmul.mubr.msk.bf16.vlgmr.msra.gmra.mrb[136].mxu0 %vm2870_vm4, %v4905_v50 }
 0x879   : > { %v4784_v33 = vadd.f32 %v5717_v51, %v8779_v59  ;;  %v4775_v3 = vpop.f32.mrb[125].mxu0 }
 0x87a   : > { %v4776_v18 = vadd.f32 %v4775_v3, %v8779_v59  ;;  %v5718_v28 = vpop.f32.mrb[126].mxu0 }
 0x87b   : > { %vm4828_vm13 = vcmp.gt.f32.partialorder %v4784_v33, 0.0  ;;  %v4844_v29 = vmul.f32 0.2, %v4784_v33  ;;  %v4787_v8 = vadd.f32 %v5718_v28, %v8779_v59  ;;  %v4778_v53 = vpop.f32.mrb[127].mxu0 }
 0x87c   : > { %vm4826_vm14 = vcmp.gt.f32.partialorder %v4776_v18, 0.0  ;;  %v4842_v40 = vmul.f32 0.2, %v4776_v18  ;;  %v4779_v31 = vadd.f32 %v4778_v53, %v8779_v59 }
 0x87d   : > { %v4860_v11 = vsel %vm4828_vm13, %v4784_v33, %v4844_v29  ;;  %vm4829_vm15 = vcmp.gt.f32.partialorder %v4787_v8, 0.0  ;;  %v4845_v30 = vmul.f32 0.2, %v4787_v8 }
 0x87e   : > { %v4877_v23 = vmul.f32 %v8783_v47, %v4860_v11  ;;  %v4858_v9 = vsel %vm4826_vm14, %v4776_v18, %v4842_v40  ;;  %vm4827_vm0 = vcmp.gt.f32.partialorder %v4779_v31, 0.0  ;;  %v4843_v49 = vmul.f32 0.2, %v4779_v31 }
 0x87f   : > { %v4875_v44 = vmul.f32 %v8783_v47, %v4858_v9  ;;  %v4861_v63 = vsel %vm4829_vm15, %v4787_v8, %v4845_v30 }
 0x880   : > { %v4878_v2 = vmul.f32 %v8783_v47, %v4861_v63  ;;  %v4859_v52 = vsel %vm4827_vm0, %v4779_v31, %v4843_v49  ;;  %v4894_v58 = vadd.f32 %v8788_v56, %v4877_v23 }
 0x881   : > { %v4876_v26 = vmul.f32 %v8783_v47, %v4859_v52  ;;  %v4892_v13 = vadd.f32 %v8788_v56, %v4875_v44 }
 0x882   : > { %v4895_v32 = vadd.f32 %v8788_v56, %v4878_v2 }
 0x883   : > { %v4893_v60 = vadd.f32 %v8788_v56, %v4876_v26 }
 0x884   : > { %v4907_v61 = vpack.c.bf16 %v4895_v32, %v4894_v58 }
 0x885   : > { %v4906_v57 = vpack.c.bf16 %v4893_v60, %v4892_v13 }
 0x887   : > { %5739 = vmatprep.mubr.msk.bf16.mxu0 %vm2870_vm4, %v4906_v57 }
 0x888   : > { %v5721_v12 = vpop.f32.mrb[128].mxu0  ;;  %5740 = vmatmul.mubr.msk.bf16.gmra.mrb[140].mxu0 %vm2870_vm4, %v4907_v61 }
 0x889   : > { %v4800_v25 = vadd.f32 %v5721_v12, %v8779_v59  ;;  %v4791_v19 = vpop.f32.mrb[129].mxu0 }
 0x88a   : > { %v4792_v5 = vadd.f32 %v4791_v19, %v8779_v59  ;;  %v5722_v20 = vpop.f32.mrb[130].mxu0 }
 0x88b   : > { %vm4832_vm1 = vcmp.gt.f32.partialorder %v4800_v25, 0.0  ;;  %v4848_v6 = vmul.f32 0.2, %v4800_v25  ;;  %v4803_v62 = vadd.f32 %v5722_v20, %v8779_v59  ;;  %v4794_v36 = vpop.f32.mrb[131].mxu0 }
 0x88c   : > { %vm4830_vm2 = vcmp.gt.f32.partialorder %v4792_v5, 0.0  ;;  %v4846_v35 = vmul.f32 0.2, %v4792_v5  ;;  %v4795_v42 = vadd.f32 %v4794_v36, %v8779_v59 }
 0x88d   : > { %v4864_v55 = vsel %vm4832_vm1, %v4800_v25, %v4848_v6  ;;  %vm4833_vm3 = vcmp.gt.f32.partialorder %v4803_v62, 0.0  ;;  %v4849_v17 = vmul.f32 0.2, %v4803_v62 }
 0x88e   : > { %v4881_v43 = vmul.f32 %v8783_v47, %v4864_v55  ;;  %v4862_v34 = vsel %vm4830_vm2, %v4792_v5, %v4846_v35  ;;  %vm4831_vm5 = vcmp.gt.f32.partialorder %v4795_v42, 0.0  ;;  %v4847_v38 = vmul.f32 0.2, %v4795_v42 }
 0x88f   : > { %v4879_v7 = vmul.f32 %v8783_v47, %v4862_v34  ;;  %v4865_v16 = vsel %vm4833_vm3, %v4803_v62, %v4849_v17 }
 0x890   : > { %v4882_v0 = vmul.f32 %v8783_v47, %v4865_v16  ;;  %v4863_v37 = vsel %vm4831_vm5, %v4795_v42, %v4847_v38  ;;  %v4898_v46 = vadd.f32 %v8788_v56, %v4881_v43 }
 0x891   : > { %v4880_v39 = vmul.f32 %v8783_v47, %v4863_v37  ;;  %v4896_v1 = vadd.f32 %v8788_v56, %v4879_v7 }
 0x892   : > { %v4899_v22 = vadd.f32 %v8788_v56, %v4882_v0 }
 0x893   : > { %v4897_v21 = vadd.f32 %v8788_v56, %v4880_v39 }
 0x894   : > { %v4909_v14 = vpack.c.bf16 %v4899_v22, %v4898_v46 }
 0x895   : > { %v4908_v15 = vpack.c.bf16 %v4897_v21, %v4896_v1 }
 0x897   : > { %5743 = vmatprep.mubr.msk.bf16.mxu0 %vm2870_vm4, %v4908_v15 }
 0x898   : > { %v5725_v54 = vpop.f32.mrb[132].mxu0  ;;  %5744 = vmatmul.mubr.msk.bf16.gmra.mrb[144].mxu0 %vm2870_vm4, %v4909_v14 }
 0x899   : > { %v4816_v45 = vadd.f32 %v5725_v54, %v8779_v59  ;;  %v4807_v48 = vpop.f32.mrb[133].mxu0 }
 0x89a   : > { %v4808_v4 = vadd.f32 %v4807_v48, %v8779_v59  ;;  %v5726_v41 = vpop.f32.mrb[134].mxu0 }
 0x89b   : > { %vm4836_vm6 = vcmp.gt.f32.partialorder %v4816_v45, 0.0  ;;  %v4852_v27 = vmul.f32 0.2, %v4816_v45  ;;  %v4819_v24 = vadd.f32 %v5726_v41, %v8779_v59  ;;  %v4810_v50 = vpop.f32.mrb[135].mxu0 }
 0x89c   : > { %vm4834_vm7 = vcmp.gt.f32.partialorder %v4808_v4, 0.0  ;;  %v4850_v10 = vmul.f32 0.2, %v4808_v4  ;;  %v4811_v51 = vadd.f32 %v4810_v50, %v8779_v59 }
 0x89d   : > { %v4868_v33 = vsel %vm4836_vm6, %v4816_v45, %v4852_v27  ;;  %vm4837_vm8 = vcmp.gt.f32.partialorder %v4819_v24, 0.0  ;;  %v4853_v3 = vmul.f32 0.2, %v4819_v24 }
 0x89e   : > { %v4885_v18 = vmul.f32 %v8783_v47, %v4868_v33  ;;  %v4866_v28 = vsel %vm4834_vm7, %v4808_v4, %v4850_v10  ;;  %vm4835_vm9 = vcmp.gt.f32.partialorder %v4811_v51, 0.0  ;;  %v4851_v29 = vmul.f32 0.2, %v4811_v51 }
 0x89f   : > { %v4883_v8 = vmul.f32 %v8783_v47, %v4866_v28  ;;  %v4869_v53 = vsel %vm4837_vm8, %v4819_v24, %v4853_v3 }
 0x8a0   : > { %v4886_v40 = vmul.f32 %v8783_v47, %v4869_v53  ;;  %v4867_v31 = vsel %vm4835_vm9, %v4811_v51, %v4851_v29  ;;  %v4902_v30 = vadd.f32 %v8788_v56, %v4885_v18 }
 0x8a1   : > { %v4884_v11 = vmul.f32 %v8783_v47, %v4867_v31  ;;  %v4900_v23 = vadd.f32 %v8788_v56, %v4883_v8  ;;  %v8844_v47 = vld [vmem:[%s8945_s10 + $0x20] ss:$0 sm:$0xff] }
 0x8a2   : > { %v4903_v59 = vadd.f32 %v8788_v56, %v4886_v40 }
 0x8a3   : > { %v4901_v9 = vadd.f32 %v8788_v56, %v4884_v11 }
 0x8a4   : > { %v4911_v49 = vpack.c.bf16 %v4903_v59, %v4902_v30 }
 0x8a5   : > { %v4910_v44 = vpack.c.bf16 %v4901_v9, %v4900_v23 }
 0x8a7   : > { %5747 = vmatprep.mubr.msk.bf16.mxu0 %vm2870_vm4, %v4910_v44 }
 0x8a8   : > { %5748 = vmatmul.mubr.msk.bf16.gmra.mrb[148].mxu0 %vm2870_vm4, %v4911_v49 }
 0x94b   : > { %v5737_v63 = vpop.f32.mrb[136].mxu0 }
 0x94c   : > { %v5012_v2 = vadd.f32 %v5737_v63, %v8844_v47  ;;  %v5003_v52 = vpop.f32.mrb[137].mxu0 }
 0x94d   : > { %v5004_v26 = vadd.f32 %v5003_v52, %v8844_v47  ;;  %v5738_v56 = vpop.f32.mrb[138].mxu0 }
 0x94e   : > { %6298 = vtanh.f32 %v5012_v2  ;;  %v5015_v58 = vadd.f32 %v5738_v56, %v8844_v47  ;;  %v5006_v32 = vpop.f32.mrb[139].mxu0 }
 0x94f   : > { %6300 = vtanh.f32 %v5004_v26  ;;  %v5007_v13 = vadd.f32 %v5006_v32, %v8844_v47 }
 0x950   : > { %6302 = vtanh.f32 %v5015_v58 }
 0x951   : > { %6304 = vtanh.f32 %v5007_v13 }
 0x958   : > { %v6299_v60 = vpop.eup %6298 }
 0x959   : > { %v6301_v61 = vpop.eup %6300  ;;  %5084 = vst [vmem:[%s8853_s14 + $0x10] sm:$0xff] %v6299_v60 }
 0x95a   : > { %v6303_v57 = vpop.eup %6302  ;;  %5082 = vst [vmem:[%s8853_s14] sm:$0xff] %v6301_v61 }
 0x95b   : > { %v6305_v12 = vpop.eup %6304  ;;  %5085 = vst [vmem:[%s8853_s14 + $0x18] sm:$0xff] %v6303_v57  ;;  %v5741_v25 = vpop.f32.mrb[140].mxu0 }
 0x95c   : > { %5083 = vst [vmem:[%s8853_s14 + $0x8] sm:$0xff] %v6305_v12  ;;  %v5028_v19 = vadd.f32 %v5741_v25, %v8844_v47  ;;  %v5019_v5 = vpop.f32.mrb[141].mxu0 }
 0x95d   : > { %v5020_v20 = vadd.f32 %v5019_v5, %v8844_v47  ;;  %v5742_v6 = vpop.f32.mrb[142].mxu0 }
 0x95e   : > { %6306 = vtanh.f32 %v5028_v19  ;;  %v5031_v62 = vadd.f32 %v5742_v6, %v8844_v47  ;;  %v5022_v36 = vpop.f32.mrb[143].mxu0 }
 0x95f   : > { %6308 = vtanh.f32 %v5020_v20  ;;  %v5023_v35 = vadd.f32 %v5022_v36, %v8844_v47 }
 0x960   : > { %6310 = vtanh.f32 %v5031_v62 }
 0x961   : > { %6312 = vtanh.f32 %v5023_v35 }
 0x968   : > { %v6307_v42 = vpop.eup %6306 }
 0x969   : > { %v6309_v55 = vpop.eup %6308  ;;  %5088 = vst [vmem:[%s8853_s14 + $0x30] sm:$0xff] %v6307_v42 }
 0x96a   : > { %v6311_v17 = vpop.eup %6310  ;;  %5086 = vst [vmem:[%s8853_s14 + $0x20] sm:$0xff] %v6309_v55 }
 0x96b   : > { %v6313_v43 = vpop.eup %6312  ;;  %5089 = vst [vmem:[%s8853_s14 + $0x38] sm:$0xff] %v6311_v17  ;;  %v5745_v34 = vpop.f32.mrb[144].mxu0 }
 0x96c   : > { %5087 = vst [vmem:[%s8853_s14 + $0x28] sm:$0xff] %v6313_v43  ;;  %v5044_v38 = vadd.f32 %v5745_v34, %v8844_v47  ;;  %v5035_v7 = vpop.f32.mrb[145].mxu0 }
 0x96d   : > { %v5036_v16 = vadd.f32 %v5035_v7, %v8844_v47  ;;  %v5746_v0 = vpop.f32.mrb[146].mxu0 }
 0x96e   : > { %6314 = vtanh.f32 %v5044_v38  ;;  %v5047_v37 = vadd.f32 %v5746_v0, %v8844_v47  ;;  %v5038_v39 = vpop.f32.mrb[147].mxu0 }
 0x96f   : > { %6316 = vtanh.f32 %v5036_v16  ;;  %v5039_v46 = vadd.f32 %v5038_v39, %v8844_v47 }
 0x970   : > { %6318 = vtanh.f32 %v5047_v37 }
 0x971   : > { %6320 = vtanh.f32 %v5039_v46 }
 0x978   : > { %v6315_v22 = vpop.eup %6314 }
 0x979   : > { %v6317_v1 = vpop.eup %6316  ;;  %5092 = vst [vmem:[%s8853_s14 + $0x50] sm:$0xff] %v6315_v22 }
 0x97a   : > { %v6319_v21 = vpop.eup %6318  ;;  %5090 = vst [vmem:[%s8853_s14 + $0x40] sm:$0xff] %v6317_v1 }
 0x97b   : > { %v6321_v14 = vpop.eup %6320  ;;  %5093 = vst [vmem:[%s8853_s14 + $0x58] sm:$0xff] %v6319_v21  ;;  %v5749_v15 = vpop.f32.mrb[148].mxu0 }
 0x97c   : > { %5091 = vst [vmem:[%s8853_s14 + $0x48] sm:$0xff] %v6321_v14  ;;  %v5060_v54 = vadd.f32 %v5749_v15, %v8844_v47  ;;  %v5051_v45 = vpop.f32.mrb[149].mxu0 }
 0x97d   : > { %v5052_v48 = vadd.f32 %v5051_v45, %v8844_v47  ;;  %v5750_v4 = vpop.f32.mrb[150].mxu0 }
 0x97e   : > { %6322 = vtanh.f32 %v5060_v54  ;;  %v5063_v41 = vadd.f32 %v5750_v4, %v8844_v47  ;;  %v5054_v27 = vpop.f32.mrb[151].mxu0 }
 0x97f   : > { %6324 = vtanh.f32 %v5052_v48  ;;  %v5055_v24 = vadd.f32 %v5054_v27, %v8844_v47 }
 0x980   : > { %6326 = vtanh.f32 %v5063_v41 }
 0x981   : > { %6328 = vtanh.f32 %v5055_v24 }
 0x988   : > { %v6323_v50 = vpop.eup %6322 }
 0x989   : > { %v6325_v10 = vpop.eup %6324  ;;  %5096 = vst [vmem:[%s8853_s14 + $0x70] sm:$0xff] %v6323_v50 }
 0x98a   : > { %v6327_v51 = vpop.eup %6326  ;;  %5094 = vst [vmem:[%s8853_s14 + $0x60] sm:$0xff] %v6325_v10 }
 0x98b   : > { %v6329_v33 = vpop.eup %6328  ;;  %5097 = vst [vmem:[%s8853_s14 + $0x78] sm:$0xff] %v6327_v51 }
 0x98c   : > { %5095 = vst [vmem:[%s8853_s14 + $0x68] sm:$0xff] %v6329_v33 }
 0x98d   : > { %6455 = shalt.err (!%p6452_p5)
}
 0x98e   : > { %s6456_s28 = scalar_lea.hbm %s8885_s7, 2048  ;;  %s6460_s24 = scalar_lea.hbm %s9042_s17, 4096 }
 0x98f   : > { %p6457_p0 = scmp.ne.s32.totalorder %s8885_s7, %s6456_s28  ;;  %p6461_p10 = scmp.lt.u32.totalorder %s8885_s7, %s9042_s17 }
 0x990   : > { %p6462_p12 = scmp.lt.u32.totalorder %s6460_s24, %s6456_s28  ;;  %p6464_p2 = scmp.lt.u32.totalorder %s6456_s28, %s8885_s7 }
 0x991   : > { %p6458_p6 = pnand %p6457_p0, %p9043_p3 }
 0x992   : > { %p6463_p1 = por %p6462_p12, %p6461_p10 }
 0x993   : > { %p6459_p9 = pneg %p6458_p6 }
 0x994   : > { %p6465_p4 = por %p6464_p2, %p6463_p1 }
 0x996   : > { %p6466_p7 = pnand %p6465_p4, %p6459_p9 }
 0x998   : > { %6469 = shalt.err (!%p6466_p7)
}
 0x999   : > { %s6528_s30 = smov 128   ;;  %s6529_s23 = smov 8  }
 0x99a   : > { %5911 = dma.vmem_to_hbm [thread:$0]  (%p9043_p3), %s8887_s20, 2048, %s8885_s7, %s8894_s29, %s6528_s30, %s6528_s30, %s6529_s23  }
 0x99b PF: > { %s9044_s21 = sld [smem:[#allocation17_spill]]  ;;  %s9045_s13 = sld [smem:[#allocation15_spill]] }
 0x99c   : > { %s9046_s25 = sld [smem:[#allocation21_spill]] }
 0x9a1   : > { %p5938_p8 = scmp.ge.s32.totalorder %s9044_s21, 2  ;;  %s5127_s18 = sand.u32 1, %s9045_s13  }
 0x9a2   : > { %p9047_p11 = scmp.ne.s32.totalorder %s9046_s25, 0  ;;  %s5128_s27 = scalar_lea.sflag [#allocation4], %s5127_s18 }
 0x9a4   : > { %p5927_p13 = pnand %p5938_p8, %p9047_p11 }
 0x9a6   : > { %6499 = dma.done.wait (!%p5927_p13), %s5128_s27, 2048  }
 0x9a7   : > { %6501 = vsyncadd (!%p5927_p13), %s5128_s27, 4294965248  ;;  %s9048_s28 = sld [smem:[#allocation18_spill]]  ;;  %s9049_s19 = sld [smem:[#allocation16_spill]] }
 0x9a8   : > { %s9050_s27 = sld [smem:[#allocation19_spill]]  ;;  %s9051_s25 = smov %s6508_s26 }
 0x9ad   : > { %p26_p5 = scmp.ge.s32.totalorder %s9048_s28, 4   ;;  %s9052_s26 = smov %s9049_s19 }
 0x9af   :  { %28 = sbr.rel (!%p26_p5) target bundleno = 9 (0x9), region = 133 }
 0x9b6   :  { %5133 = vsyncpa [#allocation3], 1 }
 0x9b7   :  { %5135 = vsyncpa [#allocation3 + $0x1], 1 }
 0x9b8   :  { %5136 = vsyncpa [#allocation6], 1 }
 0x9b9   :  { %5137 = vsyncpa [#allocation9], 1 }
 0x9ba   :  { %5138 = vsyncpa [#allocation4], 1 }
 0x9bb   :  { %5140 = vsyncpa [#allocation4 + $0x1], 1 }

</bundles_post_ra>
